<compile_context>
chip_gen: v7x
topology: tpu7x:2x2x1
jax: 0.10.0
libtpu: 0.0.40
codegen_flags: <defaults>
</compile_context>

<pallas_src>
import numpy as np
import jax
import jax.numpy as jnp
from jax import lax
from jax.experimental import pallas as pl
from jax.experimental.pallas import tpu as pltpu

IN_SHAPE = 16                          # H = W of the input image
IN_CH, OUT_CH, K = 3, 5, 3             # conv1 = Conv2d(3, 5, 3)
CONV_OUT = IN_SHAPE - K + 1            # 14 (valid conv)
POOL_OUT = CONV_OUT // 2               # 7
HIDDEN = POOL_OUT * POOL_OUT * OUT_CH  # 245 == PyTorch self.hidden_size

TB = 128                               # images per grid block (128*16 = 2048 lanes)
LANES = TB * IN_SHAPE                  # 2048
CH_ROWS = IN_CH * IN_SHAPE             # 48   rows per kj shift = (channel, height)
KROWS = K * CH_ROWS                    # 144  data rows of the contraction axis
KPAD = 152                             # 144 data + 1 ones (bias) + 7 zero pad (8-aligned)
CONV_ROWS = OUT_CH * CONV_OUT          # 70   conv slab rows = (out_ch, i)
R_PAD = 72                             # conv rows padded 70 -> 72 (8-aligned)


def _net_kernel(x_ref, w3_ref, fcw_ref, s_ref, fcb_ref, out_ref):
    # x_ref  : (152, 2048) bf16  rows=(kj,c,h)+ones, cols=(img_in_block, w)
    # w3_ref : (72, 152)   bf16  conv weight (kj on contraction axis, bias col 144)
    # fcw_ref: (71, 2047)  f32   fc1 weight scattered onto pooled (even,even) positions
    # s_ref  : (2047, 128) f32   0/1 per-image segment-sum matrix
    # fcb_ref: (1, 1)      f32   fc1 bias (SMEM scalar)
    # out_ref: (1, 1, 128) f32   one lane-dense store per block
    r = jnp.dot(w3_ref[...], x_ref[...],
                preferred_element_type=jnp.float32)           # (72, 2048): conv + bias
    act = jnp.maximum(r, 0.0)                                 # ReLU
    # 2x2 max-pool via shifted maxes; only (even i<=12, even j<=12) positions of
    # each image slot are read later (fcw is zero everywhere else, including the
    # cross-image columns j=14,15 and the cross-channel rows i=13).
    mj = jnp.maximum(act[:, :-1], act[:, 1:])                 # (72, 2047)
    mi = jnp.maximum(mj[:-1, :], mj[1:, :])                   # (71, 2047)
    # fc1: multiply by the pre-scattered weight mask, reduce rows on the VPU/XLU,
    # then reduce per-image column segments with one MXU dot against S.
    col = jnp.sum(mi * fcw_ref[...], axis=0, keepdims=True)   # (1, 2047)
    y = jnp.dot(col, s_ref[...],
                preferred_element_type=jnp.float32)           # (1, 128) one value/image
    out_ref[...] = jnp.maximum(y + fcb_ref[0, 0], 0.0).reshape(1, 1, TB)


def _pack_x(x):
    """x (B,3,16,16) NCHW -> (152, Bp*16) bf16.

    Rows 0..143: X[kj*48 + c*16 + h, b*16 + j] = x[b, c, h, j+kj] (0 past edge).
    Row 144: constant 1 (carries the conv bias).  Rows 145..151: zero padding.
    """
    B = x.shape[0]
    Bp = ((B + TB - 1) // TB) * TB
    if Bp != B:
        x = jnp.concatenate(
            [x, jnp.zeros((Bp - B,) + x.shape[1:], x.dtype)], axis=0)
    xp = jnp.pad(x, ((0, 0), (0, 0), (0, 0), (0, K - 1)))       # (Bp,3,16,18)
    shifts = jnp.stack([xp[..., kj:kj + IN_SHAPE] for kj in range(K)],
                       axis=0)                                  # (3,Bp,3,16,16)
    rows = jnp.transpose(shifts, (0, 2, 3, 1, 4)).reshape(KROWS, Bp * IN_SHAPE)
    ones = jnp.ones((1, Bp * IN_SHAPE), rows.dtype)
    pad = jnp.zeros((KPAD - KROWS - 1, Bp * IN_SHAPE), rows.dtype)
    x3 = jnp.concatenate([rows, ones, pad], axis=0)
    return x3.astype(jnp.bfloat16), Bp


def _pack_conv_weight(conv_w, conv_b):
    """W3[o*14 + i, kj*48 + c*16 + (i+ki)] = conv_w[o,c,ki,kj]; W3[o*14+i, 144] = conv_b[o]."""
    o, c, ki, kj, i = np.meshgrid(np.arange(OUT_CH), np.arange(IN_CH),
                                  np.arange(K), np.arange(K),
                                  np.arange(CONV_OUT), indexing="ij")
    rows = o * CONV_OUT + i
    cols = kj * CH_ROWS + c * IN_SHAPE + (i + ki)
    vals = conv_w[o, c, ki, kj]                                 # (5,3,3,3,14) gather
    w3 = jnp.zeros((R_PAD, KPAD), jnp.float32)
    w3 = w3.at[rows.ravel(), cols.ravel()].set(vals.reshape(-1))
    w3 = w3.at[np.arange(CONV_ROWS), KROWS].set(
        jnp.repeat(conv_b.astype(jnp.float32), CONV_OUT))       # bias column
    return w3.astype(jnp.bfloat16)


def _pack_fc_weight(fc_w):
    """fcw[o*14 + 2*pi, b*16 + 2*pj] = fc_w[0, o*49 + pi*7 + pj]; zeros elsewhere."""
    o, pi_, pj, b = np.meshgrid(np.arange(OUT_CH), np.arange(POOL_OUT),
                                np.arange(POOL_OUT), np.arange(TB), indexing="ij")
    rows = o * CONV_OUT + 2 * pi_
    cols = b * IN_SHAPE + 2 * pj
    vals = fc_w[0, o * POOL_OUT * POOL_OUT + pi_ * POOL_OUT + pj]   # (5,7,7,TB)
    fcw = jnp.zeros((R_PAD - 1, LANES - 1), jnp.float32)            # (71, 2047)
    fcw = fcw.at[rows.ravel(), cols.ravel()].set(vals.reshape(-1))
    return fcw


def _segment_matrix():
    """S[b*16 + j, b] = 1: sums each 16-lane image slot into one output lane."""
    s = np.kron(np.eye(TB, dtype=np.float32), np.ones((IN_SHAPE, 1), np.float32))
    return jnp.asarray(s[: LANES - 1])                          # (2047, TB)


def net_forward(x, conv_w, conv_b, fc_w, fc_b):
    B = x.shape[0]
    x3, Bp = _pack_x(x)
    G = Bp // TB
    w3 = _pack_conv_weight(conv_w, conv_b)
    fcw = _pack_fc_weight(fc_w)
    s_mat = _segment_matrix()
    fcb = fc_b.reshape(1, 1).astype(jnp.float32)
    out = pl.pallas_call(
        _net_kernel,
        out_shape=jax.ShapeDtypeStruct((G, 1, TB), jnp.float32),
        grid=(G,),
        in_specs=[
            pl.BlockSpec((KPAD, LANES), lambda g: (0, g)),            # x block
            pl.BlockSpec((R_PAD, KPAD), lambda g: (0, 0)),            # conv weight
            pl.BlockSpec((R_PAD - 1, LANES - 1), lambda g: (0, 0)),   # fc weight mask
            pl.BlockSpec((LANES - 1, TB), lambda g: (0, 0)),          # segment matrix
            pl.BlockSpec(memory_space=pltpu.MemorySpace.SMEM),        # fc bias scalar
        ],
        out_specs=pl.BlockSpec((1, 1, TB), lambda g: (g, 0, 0)),
        compiler_params=pltpu.CompilerParams(
            dimension_semantics=("parallel",),        # shards blocks across v7x's 2 TCs
            vmem_limit_bytes=32 * 1024 * 1024),
    )(x3, w3, fcw, s_mat, fcb)
    return out.reshape(Bp, 1)[:B]


def net_reference(x, conv_w, conv_b, fc_w, fc_b):
    """Pure-JAX reference of the PyTorch forward (for correctness checking)."""
    conv = lax.conv_general_dilated(
        x, conv_w, window_strides=(1, 1), padding="VALID",
        dimension_numbers=("NCHW", "OIHW", "NCHW")) + conv_b.reshape(1, OUT_CH, 1, 1)
    r = jnp.maximum(conv, 0.0)
    pooled = lax.reduce_window(r, -jnp.inf, lax.max,
                               (1, 1, 2, 2), (1, 1, 2, 2), "VALID")
    flat = pooled.reshape(x.shape[0], -1)
    return jnp.maximum(flat @ fc_w.T + fc_b, 0.0)


if __name__ == "__main__":
    key = jax.random.PRNGKey(0)
    kx, kw, kb, kfw, kfb = jax.random.split(key, 5)
    B = 2
    x = jax.random.normal(kx, (B, IN_CH, IN_SHAPE, IN_SHAPE), jnp.float32)

    # Deterministic parameter init (PyTorch-like uniform fan-in scaling).
    fan_in_conv = IN_CH * K * K
    lim_c = 1.0 / (fan_in_conv ** 0.5)
    conv_w = jax.random.uniform(kw, (OUT_CH, IN_CH, K, K), jnp.float32, -lim_c, lim_c)
    conv_b = jax.random.uniform(kb, (OUT_CH,), jnp.float32, -lim_c, lim_c)
    lim_f = 1.0 / (HIDDEN ** 0.5)
    fc_w = jax.random.uniform(kfw, (1, HIDDEN), jnp.float32, -lim_f, lim_f)
    fc_b = jax.random.uniform(kfb, (1,), jnp.float32, -lim_f, lim_f)

    out = net_forward(x, conv_w, conv_b, fc_w, fc_b)
    out = jax.block_until_ready(out)

    # Reference with the same bf16 rounding applied to the MXU-side inputs
    # (kernel accumulates in f32), so a tight-ish tolerance is meaningful.
    x_q = x.astype(jnp.bfloat16).astype(jnp.float32)
    cw_q = conv_w.astype(jnp.bfloat16).astype(jnp.float32)
    cb_q = conv_b.astype(jnp.bfloat16).astype(jnp.float32)
    ref = net_reference(x_q, cw_q, cb_q, fc_w, fc_b)

    assert out.shape == (B, 1), out.shape
    assert jnp.allclose(out, ref, atol=1e-2, rtol=1e-2), (out, ref)
    print("KERNEL_OK")
</pallas_src>

<mosaic_0001>
module attributes {stable_mosaic.version = 11 : i64} {
  func.func @_net_kernel(%arg0: i32, %arg1: memref<152x2048xbf16, #tpu.memory_space<vmem>>, %arg2: memref<72x152xbf16, #tpu.memory_space<vmem>>, %arg3: memref<71x2047xf32, #tpu.memory_space<vmem>>, %arg4: memref<2047x128xf32, #tpu.memory_space<vmem>>, %arg5: memref<1x1xf32, #tpu.memory_space<smem>>, %arg6: memref<1x1x128xf32, #tpu.memory_space<vmem>>) attributes {dimension_semantics = [#tpu.dimension_semantics<parallel>], iteration_bounds = array<i64: 1>, scalar_prefetch = 0 : i64, scratch_operands = 0 : i64, tpu.core_type = #tpu.core_type<tc>, window_params = [{transform_indices = @transform_0, window_bounds = array<i64: 152, 2048>}, {pipeline_mode = #tpu.pipeline_mode<synchronous>, transform_indices = @transform_1, window_bounds = array<i64: 72, 152>}, {pipeline_mode = #tpu.pipeline_mode<synchronous>, transform_indices = @transform_2, window_bounds = array<i64: 71, 2047>}, {pipeline_mode = #tpu.pipeline_mode<synchronous>, transform_indices = @transform_3, window_bounds = array<i64: 2047, 128>}, {transform_indices = @transform_4, window_bounds = array<i64: 1, 1>}, {transform_indices = @transform_5, window_bounds = array<i64: 1, 1, 128>}]} {
    %c0 = arith.constant 0 : index
    %c0_0 = arith.constant 0 : index
    %0 = vector.load %arg2[%c0, %c0_0] : memref<72x152xbf16, #tpu.memory_space<vmem>>, vector<72x152xbf16>
    %c0_1 = arith.constant 0 : index
    %c0_2 = arith.constant 0 : index
    %1 = vector.load %arg1[%c0_1, %c0_2] : memref<152x2048xbf16, #tpu.memory_space<vmem>>, vector<152x2048xbf16>
    %cst = arith.constant dense<0.000000e+00> : vector<72x2048xf32>
    %2 = tpu.matmul %0, %1, %cst {dimension_numbers = #tpu.dot_dimension_numbers<[1], [0], [0], [1], [0, 0, 1, 1], [], []>} : vector<72x152xbf16>, vector<152x2048xbf16>, vector<72x2048xf32> -> vector<72x2048xf32>
    %cst_3 = arith.constant 0.000000e+00 : f32
    %3 = vector.broadcast %cst_3 : f32 to vector<72x2048xf32>
    %4 = arith.maximumf %2, %3 : vector<72x2048xf32>
    %5 = vector.extract_strided_slice %4 {offsets = [0, 0], sizes = [72, 2047], strides = [1, 1]} : vector<72x2048xf32> to vector<72x2047xf32>
    %6 = vector.extract_strided_slice %4 {offsets = [0, 1], sizes = [72, 2047], strides = [1, 1]} : vector<72x2048xf32> to vector<72x2047xf32>
    %7 = arith.maximumf %5, %6 : vector<72x2047xf32>
    %8 = vector.extract_strided_slice %7 {offsets = [0, 0], sizes = [71, 2047], strides = [1, 1]} : vector<72x2047xf32> to vector<71x2047xf32>
    %9 = vector.extract_strided_slice %7 {offsets = [1, 0], sizes = [71, 2047], strides = [1, 1]} : vector<72x2047xf32> to vector<71x2047xf32>
    %10 = arith.maximumf %8, %9 : vector<71x2047xf32>
    %c0_4 = arith.constant 0 : index
    %c0_5 = arith.constant 0 : index
    %11 = vector.load %arg3[%c0_4, %c0_5] : memref<71x2047xf32, #tpu.memory_space<vmem>>, vector<71x2047xf32>
    %12 = arith.mulf %10, %11 : vector<71x2047xf32>
    %cst_6 = arith.constant dense<0.000000e+00> : vector<2047xf32>
    %13 = vector.multi_reduction <add>, %12, %cst_6 [0] : vector<71x2047xf32> to vector<2047xf32>
    %14 = vector.shape_cast %13 : vector<2047xf32> to vector<1x2047xf32>
    %c0_7 = arith.constant 0 : index
    %c0_8 = arith.constant 0 : index
    %15 = vector.load %arg4[%c0_7, %c0_8] : memref<2047x128xf32, #tpu.memory_space<vmem>>, vector<2047x128xf32>
    %cst_9 = arith.constant dense<0.000000e+00> : vector<1x128xf32>
    %16 = tpu.matmul %14, %15, %cst_9 {dimension_numbers = #tpu.dot_dimension_numbers<[1], [0], [0], [1], [0, 0, 1, 1], [], []>} : vector<1x2047xf32>, vector<2047x128xf32>, vector<1x128xf32> -> vector<1x128xf32>
    %c0_10 = arith.constant 0 : index
    %c0_11 = arith.constant 0 : index
    %17 = memref.load %arg5[%c0_10, %c0_11] : memref<1x1xf32, #tpu.memory_space<smem>>
    %18 = vector.broadcast %17 : f32 to vector<1x128xf32>
    %19 = arith.addf %16, %18 : vector<1x128xf32>
    %cst_12 = arith.constant 0.000000e+00 : f32
    %20 = vector.broadcast %cst_12 : f32 to vector<1x128xf32>
    %21 = arith.maximumf %19, %20 : vector<1x128xf32>
    %22 = vector.shape_cast %21 : vector<1x128xf32> to vector<1x1x128xf32>
    %c0_13 = arith.constant 0 : index
    %c0_14 = arith.constant 0 : index
    %c0_15 = arith.constant 0 : index
    %23 = vector.load %arg6[%c0_13, %c0_14, %c0_15] : memref<1x1x128xf32, #tpu.memory_space<vmem>>, vector<1x1x128xf32>
    tpu.vector_store %arg6[%c0_13, %c0_14, %c0_15], %22 {strides = array<i32>} : memref<1x1x128xf32, #tpu.memory_space<vmem>>, vector<1x1x128xf32>,
    return
  }
  func.func @transform_0(%arg0: i32) -> (i32, i32) {
    %c0_i32 = arith.constant 0 : i32
    %c0_i32_0 = arith.constant 0 : i32
    return %c0_i32, %arg0 : i32, i32
  }
  func.func @transform_1(%arg0: i32) -> (i32, i32) {
    %c0_i32 = arith.constant 0 : i32
    %c0_i32_0 = arith.constant 0 : i32
    %c0_i32_1 = arith.constant 0 : i32
    return %c0_i32, %c0_i32_0 : i32, i32
  }
  func.func @transform_2(%arg0: i32) -> (i32, i32) {
    %c0_i32 = arith.constant 0 : i32
    %c0_i32_0 = arith.constant 0 : i32
    %c0_i32_1 = arith.constant 0 : i32
    return %c0_i32, %c0_i32_0 : i32, i32
  }
  func.func @transform_3(%arg0: i32) -> (i32, i32) {
    %c0_i32 = arith.constant 0 : i32
    %c0_i32_0 = arith.constant 0 : i32
    %c0_i32_1 = arith.constant 0 : i32
    return %c0_i32, %c0_i32_0 : i32, i32
  }
  func.func @transform_4(%arg0: i32) -> (i32, i32) {
    %c0_i32 = arith.constant 0 : i32
    %c0_i32_0 = arith.constant 0 : i32
    %c0_i32_1 = arith.constant 0 : i32
    return %c0_i32, %c0_i32_0 : i32, i32
  }
  func.func @transform_5(%arg0: i32) -> (i32, i32, i32) {
    %c0_i32 = arith.constant 0 : i32
    %c0_i32_0 = arith.constant 0 : i32
    %c0_i32_1 = arith.constant 0 : i32
    return %arg0, %c0_i32, %c0_i32_0 : i32, i32, i32
  }
}

</mosaic_0001>

<bundles_post_ra>
// kernel: tpu_custom_call.1
= control target key start
LH: loop header
LB: loop body
LE: loop exit
PB: predicated region body
PF: predicated region fallthrough
CT: control target
= control target key end

     0   :  { %11 = vsyncpa [#allocation4], 0  ;;  %s9223_s0 = inlined_call_operand.hbm [shape: bf16[152,2048], index: 0, kind: input, shape index: {}]   ;;  %s9224_s1 = inlined_call_operand.hbm [shape: bf16[72,152], index: 1, kind: input, shape index: {}]   ;;  %s9225_s2 = inlined_call_operand.hbm [shape: f32[71,2047], index: 2, kind: input, shape index: {}]   ;;  %s9226_s3 = inlined_call_operand.hbm [shape: f32[2047,128], index: 3, kind: input, shape index: {}]   ;;  %s9227_s4 = inlined_call_operand.<no memory space> [shape: f32[1,1], index: 4, kind: input, shape index: {}]   ;;  %s9228_s5 = inlined_call_operand.hbm [shape: f32[1,1,128], index: 5, kind: output, shape index: {}]  }
   0x1   :  { %12 = vsyncpa [#allocation7], 0 }
   0x2   :  { %13 = vsyncpa [#allocation10], 0 }
   0x3   :  { %14 = vsyncpa [#allocation5], 0  ;;  %s5756_s18 = smov [#allocation6]   ;;  %s5638_s22 = scalar_lea.hbm %s9224_s1, 1152 }
   0x4   :  { %s32_s19 = sshll.u32 %s5756_s18, 4  ;;  %p5639_p0 = scmp.ne.s32.totalorder %s9224_s1, %s5638_s22  ;;  %s33_s19 = int_to_ptr.vmem [resolvable:$true] %s32_s19 }
   0x5   :  { %p5642_p1 = scmp.lt.u32.totalorder %s5638_s22, %s9224_s1 }
   0x7   :  { %p5644_p2 = pnand %p5642_p1, %p5639_p0 }
   0x9   :  { %5647 = shalt.err (!%p5644_p2)
}
   0xa   :  { %s5648_s27 = scalar_lea.vmem %s33_s19, 1152  ;;  %p5653_p4 = scmp.lt.s32.totalorder %s33_s19, %s33_s19 }
   0xb   :  { %p5649_p3 = scmp.ne.s32.totalorder %s33_s19, %s5648_s27  ;;  %p5654_p5 = scmp.lt.s32.totalorder %s5648_s27, %s5648_s27 }
   0xd   :  { %p5655_p6 = por %p5654_p5, %p5653_p4 }
   0xf   :  { %p5656_p7 = pnand %p5655_p6, %p5649_p3 }
  0x11   :  { %5659 = shalt.err (!%p5656_p7)
}
  0x12   :  { %s5757_s28 = smov 128   ;;  %s5758_s29 = smov 8  }
  0x13   :  { %38 = dma.hbm_to_vmem [thread:$0]  %s9224_s1, 1152, %s33_s19, [#allocation7], %s5757_s28, %s5757_s28, %s5758_s29  }
  0x14   :  { %s5759_s7 = smov [#allocation3]   ;;  %s5660_s11 = scalar_lea.hbm %s9223_s0, 19456 }
  0x15   :  { %s20_s8 = sshll.u32 %s5759_s7, 4  ;;  %p5661_p8 = scmp.ne.s32.totalorder %s9223_s0, %s5660_s11  ;;  %s21_s8 = int_to_ptr.vmem [resolvable:$true] %s20_s8 }
  0x16   :  { %p5664_p9 = scmp.lt.u32.totalorder %s5660_s11, %s9223_s0 }
  0x18   :  { %p5666_p10 = pnand %p5664_p9, %p5661_p8 }
  0x1a   :  { %5669 = shalt.err (!%p5666_p10)
}
  0x1b   :  { %s5670_s16 = scalar_lea.vmem %s21_s8, 19456  ;;  %p5675_p12 = scmp.lt.s32.totalorder %s21_s8, %s21_s8 }
  0x1c   :  { %p5671_p11 = scmp.ne.s32.totalorder %s21_s8, %s5670_s16  ;;  %p5676_p13 = scmp.lt.s32.totalorder %s5670_s16, %s5670_s16 }
  0x1e   :  { %p5677_p0 = por %p5676_p13, %p5675_p12 }
  0x20   :  { %p5678_p1 = pnand %p5677_p0, %p5671_p11 }
  0x22   :  { %5681 = shalt.err (!%p5678_p1)
}
  0x23   :  { %s5760_s1 = smov 1024   ;;  %s5761_s17 = smov 64  }
  0x24   :  { %26 = dma.hbm_to_vmem [thread:$0]  %s9223_s0, 19456, %s21_s8, [#allocation4], %s5760_s1, %s5760_s1, %s5761_s17  }
  0x25   :  { %s5762_s20 = smov [#allocation8]   ;;  %s5763_s22 = smov [#allocation9]  }
  0x26   :  { %s44_s21 = sshll.u32 %s5762_s20, 4  ;;  %s56_s23 = sshll.u32 %s5763_s22, 4  ;;  %s45_s21 = int_to_ptr.vmem [resolvable:$true] %s44_s21  ;;  %s57_s23 = int_to_ptr.vmem [resolvable:$true] %s56_s23 }
  0x27   :  { %s5682_s26 = scalar_lea.hbm %s9225_s2, 18432 }
  0x28   :  { %p5683_p2 = scmp.ne.s32.totalorder %s9225_s2, %s5682_s26  ;;  %p5686_p3 = scmp.lt.u32.totalorder %s5682_s26, %s9225_s2 }
  0x2a   :  { %p5688_p4 = pnand %p5686_p3, %p5683_p2 }
  0x2c   :  { %5691 = shalt.err (!%p5688_p4)
}
  0x2d   :  { %s5692_s0 = scalar_lea.vmem %s45_s21, 18432  ;;  %p5697_p6 = scmp.lt.s32.totalorder %s45_s21, %s45_s21 }
  0x2e   :  { %p5693_p5 = scmp.ne.s32.totalorder %s45_s21, %s5692_s0  ;;  %p5698_p7 = scmp.lt.s32.totalorder %s5692_s0, %s5692_s0 }
  0x30   :  { %p5699_p8 = por %p5698_p7, %p5697_p6 }
  0x32   :  { %p5700_p9 = pnand %p5699_p8, %p5693_p5 }
  0x34   :  { %5703 = shalt.err (!%p5700_p9)
}
  0x35   :  { %s5764_s8 = smov 2048   ;;  %s5704_s13 = scalar_lea.hbm %s9226_s3, 32768 }
  0x36   :  { %50 = dma.hbm_to_vmem [thread:$0]  %s9225_s2, 18432, %s45_s21, [#allocation7], %s5764_s8, %s5764_s8, %s5757_s28  }
  0x37   :  { %p5705_p10 = scmp.ne.s32.totalorder %s9226_s3, %s5704_s13  ;;  %p5708_p11 = scmp.lt.u32.totalorder %s5704_s13, %s9226_s3 }
  0x39   :  { %p5710_p12 = pnand %p5708_p11, %p5705_p10 }
  0x3b   :  { %5713 = shalt.err (!%p5710_p12)
}
  0x3c   :  { %s5714_s17 = scalar_lea.vmem %s57_s23, 32768  ;;  %p5719_p0 = scmp.lt.s32.totalorder %s57_s23, %s57_s23 }
  0x3d   :  { %p5715_p13 = scmp.ne.s32.totalorder %s57_s23, %s5714_s17  ;;  %p5720_p1 = scmp.lt.s32.totalorder %s5714_s17, %s5714_s17 }
  0x3f   :  { %p5721_p2 = por %p5720_p1, %p5719_p0 }
  0x41   :  { %p5722_p3 = pnand %p5721_p2, %p5715_p13 }
  0x43   :  { %5725 = shalt.err (!%p5722_p3)
}
  0x44   :  { %62 = dma.hbm_to_vmem [thread:$0]  %s9226_s3, 32768, %s57_s23, [#allocation10], %s5757_s28, %s5757_s28, %s5758_s29  }
  0x45   :  { %5748 = dma.done.wait [#allocation4], 19456  }
  0x46   :  { %5749 = vsyncadd [#allocation4], 4294947840 }
  0x47   :  { %5750 = dma.done.wait [#allocation7], 19584  }
  0x48   :  { %5751 = vsyncadd [#allocation7], 4294947712 }
  0x49   :  { %5752 = dma.done.wait [#allocation10], 32768  }
  0x4a   :  { %5753 = vsyncadd [#allocation10], 4294934528  ;;  %v88_v0 = vld [vmem:[#allocation3 + $0x8] sm:$0xff]  ;;  %v87_v2 = vld [vmem:[#allocation3] sm:$0xff]  ;;  %vm1041_vm0 = vcmask 195584   ;;  %vm1057_vm1 = vcmask 1043456  }
  0x4b   :  { %v96_v1 = vld [vmem:[#allocation3 + $0x48] sm:$0xff]  ;;  %v95_v4 = vld [vmem:[#allocation3 + $0x40] sm:$0xff]  ;;  %s5765_s3 = smov 127   ;;  %vm2330_vm2 = vcmask 1039360   ;;  %vm2898_vm3 = vcmask 1046528   ;;  %vm3987_vm4 = vcmask 1038336  }
  0x4c   :  { %v4852_v3 = vcombine.high %v88_v0, %v96_v1  ;;  %v4851_v5 = vcombine.low %v88_v0, %v96_v1  ;;  %v104_v6 = vld [vmem:[#allocation3 + $0x88] sm:$0xff]  ;;  %v4850_v8 = vcombine.high %v87_v2, %v95_v4  ;;  %v4849_v9 = vcombine.low %v87_v2, %v95_v4  ;;  %v103_v11 = vld [vmem:[#allocation3 + $0x80] sm:$0xff] }
  0x4d   :  { %v112_v7 = vld [vmem:[#allocation3 + $0xc8] sm:$0xff]  ;;  %v111_v12 = vld [vmem:[#allocation3 + $0xc0] sm:$0xff]  ;;  %vm5766_vm5 = vmmov 1  }
  0x4e   :  { %v4868_v10 = vcombine.high %v104_v6, %v112_v7  ;;  %v120_v13 = vld [vmem:[#allocation3 + $0x108] sm:$0xff]  ;;  %1187 = vmatprep.subr.bf16.mxu1 %v4852_v3  ;;  %v4866_v14 = vcombine.high %v103_v11, %v111_v12  ;;  %v119_v16 = vld [vmem:[#allocation3 + $0x100] sm:$0xff]  ;;  %1106 = vmatprep.subr.bf16.mxu0 %v4850_v8  ;;  %v4867_v18 = vcombine.low %v104_v6, %v112_v7  ;;  %vm5592_vm6 = vmpackc.low %vm2898_vm3, %vm5766_vm5 }
  0x4f   :  { %v128_v15 = vld [vmem:[#allocation3 + $0x148] sm:$0xff]  ;;  %v127_v17 = vld [vmem:[#allocation3 + $0x140] sm:$0xff]  ;;  %1188 = vmatpush1.bf16.msra.mxu1 %v4851_v5  ;;  %1107 = vmatpush1.bf16.msra.mxu0 %v4849_v9  ;;  %v4865_v19 = vcombine.low %v103_v11, %v111_v12 }
  0x50   :  { %1189 = vmatprep.subr.bf16.mxu1 %v4868_v10  ;;  %v4884_v20 = vcombine.high %v120_v13, %v128_v15  ;;  %1108 = vmatprep.subr.bf16.mxu0 %v4866_v14  ;;  %v4882_v21 = vcombine.high %v119_v16, %v127_v17  ;;  %v136_v22 = vld [vmem:[#allocation3 + $0x188] sm:$0xff]  ;;  %v135_v24 = vld [vmem:[#allocation3 + $0x180] sm:$0xff]  ;;  %v4883_v26 = vcombine.low %v120_v13, %v128_v15  ;;  %v90_v15 = vld [vmem:[#allocation3 + $0x18] sm:$0xff] }
  0x51   :  { %v144_v23 = vld [vmem:[#allocation3 + $0x1c8] sm:$0xff]  ;;  %v143_v25 = vld [vmem:[#allocation3 + $0x1c0] sm:$0xff]  ;;  %v4881_v27 = vcombine.low %v119_v16, %v127_v17  ;;  %v98_v16 = vld [vmem:[#allocation3 + $0x58] sm:$0xff] }
  0x52   :  { %v4900_v28 = vcombine.high %v136_v22, %v144_v23  ;;  %v4898_v29 = vcombine.high %v135_v24, %v143_v25  ;;  %v152_v30 = vld [vmem:[#allocation3 + $0x208] sm:$0xff]  ;;  %v151_v32 = vld [vmem:[#allocation3 + $0x200] sm:$0xff]  ;;  %v4899_v34 = vcombine.low %v136_v22, %v144_v23  ;;  %v4897_v36 = vcombine.low %v135_v24, %v143_v25  ;;  %v89_v17 = vld [vmem:[#allocation3 + $0x10] sm:$0xff] }
  0x53   :  { %1190 = vmatpush1.bf16.msra.mxu1 %v4867_v18  ;;  %1109 = vmatpush1.bf16.msra.mxu0 %v4865_v19  ;;  %v160_v31 = vld [vmem:[#allocation3 + $0x248] sm:$0xff]  ;;  %v159_v33 = vld [vmem:[#allocation3 + $0x240] sm:$0xff]  ;;  %v97_v18 = vld [vmem:[#allocation3 + $0x50] sm:$0xff] }
  0x54   :  { %1191 = vmatprep.subr.bf16.mxu1 %v4884_v20  ;;  %1110 = vmatprep.subr.bf16.mxu0 %v4882_v21  ;;  %v168_v35 = vld [vmem:[#allocation3 + $0x288] sm:$0xff]  ;;  %v4916_v37 = vcombine.high %v152_v30, %v160_v31  ;;  %v4914_v40 = vcombine.high %v151_v32, %v159_v33  ;;  %v167_v41 = vld [vmem:[#allocation3 + $0x280] sm:$0xff]  ;;  %v4915_v43 = vcombine.low %v152_v30, %v160_v31  ;;  %v105_v24 = vld [vmem:[#allocation3 + $0x90] sm:$0xff] }
  0x55   :  { %v176_v38 = vld [vmem:[#allocation3 + $0x2c8] sm:$0xff]  ;;  %v175_v42 = vld [vmem:[#allocation3 + $0x2c0] sm:$0xff]  ;;  %v4913_v44 = vcombine.low %v151_v32, %v159_v33  ;;  %v4856_v20 = vcombine.high %v90_v15, %v98_v16  ;;  %v4854_v22 = vcombine.high %v89_v17, %v97_v18  ;;  %v113_v25 = vld [vmem:[#allocation3 + $0xd0] sm:$0xff]  ;;  %v4855_v31 = vcombine.low %v90_v15, %v98_v16 }
  0x56   :  { %v5853_v39 = vld [vmem:[#allocation6 + $0x4] ss:$8 sps:$4 sm:$0xff]   ;;  %v4932_v45 = vcombine.high %v168_v35, %v176_v38  ;;  %v4930_v46 = vcombine.high %v167_v41, %v175_v42  ;;  %v4931_v51 = vcombine.low %v168_v35, %v176_v38  ;;  %v4929_v52 = vcombine.low %v167_v41, %v175_v42  ;;  %v5863_v23 = vld [vmem:[#allocation6] ss:$8 sps:$4 sm:$0xff]   ;;  %v121_v32 = vld [vmem:[#allocation3 + $0x110] sm:$0xff] }
  0x57   :  { %1192 = vmatpush1.bf16.msra.mxu1 %v4883_v26  ;;  %1111 = vmatpush1.bf16.msra.mxu0 %v4881_v27  ;;  %v184_v47 = vld [vmem:[#allocation3 + $0x308] sm:$0xff]  ;;  %v183_v49 = vld [vmem:[#allocation3 + $0x300] sm:$0xff]  ;;  %v106_v26 = vld [vmem:[#allocation3 + $0x98] sm:$0xff]  ;;  %v4870_v30 = vcombine.high %v105_v24, %v113_v25 }
  0x58   :  { %1193 = vmatprep.subr.bf16.mxu1 %v4900_v28  ;;  %1112 = vmatprep.subr.bf16.mxu0 %v4898_v29  ;;  %v192_v48 = vld [vmem:[#allocation3 + $0x348] sm:$0xff]  ;;  %v191_v50 = vld [vmem:[#allocation3 + $0x340] sm:$0xff]  ;;  %v114_v27 = vld [vmem:[#allocation3 + $0xd8] sm:$0xff]  ;;  %v4853_v29 = vcombine.low %v89_v17, %v97_v18 }
  0x59   :  { %5016 = vmatprep.mubr.msk.bf16.mxu1 %vm1041_vm0, %v5853_v39  ;;  %5010 = vmatprep.mubr.msk.bf16.mxu0 %vm1041_vm0, %v5853_v39  ;;  %v4948_v53 = vcombine.high %v184_v47, %v192_v48  ;;  %v4946_v54 = vcombine.high %v183_v49, %v191_v50  ;;  %v200_v55 = vld [vmem:[#allocation3 + $0x388] sm:$0xff]  ;;  %v199_v57 = vld [vmem:[#allocation3 + $0x380] sm:$0xff]  ;;  %v4947_v59 = vcombine.low %v184_v47, %v192_v48  ;;  %v5865_v28 = vld [vmem:[#allocation6 + $0x14] ss:$8 sps:$4 sm:$0xff]  }
  0x5a   :  { %v208_v56 = vld [vmem:[#allocation3 + $0x3c8] sm:$0xff]  ;;  %v207_v58 = vld [vmem:[#allocation3 + $0x3c0] sm:$0xff]  ;;  %v4945_v60 = vcombine.low %v183_v49, %v191_v50  ;;  %v129_v33 = vld [vmem:[#allocation3 + $0x150] sm:$0xff] }
  0x5b   :  { %1194 = vmatpush1.bf16.msra.mxu1 %v4899_v34  ;;  %1113 = vmatpush1.bf16.msra.mxu0 %v4897_v36  ;;  %v4964_v61 = vcombine.high %v200_v55, %v208_v56  ;;  %v4962_v62 = vcombine.high %v199_v57, %v207_v58  ;;  %v216_v63 = vld [vmem:[#allocation3 + $0x408] sm:$0xff]  ;;  %v215_v1 = vld [vmem:[#allocation3 + $0x400] sm:$0xff]  ;;  %v4963_v3 = vcombine.low %v200_v55, %v208_v56  ;;  %v122_v35 = vld [vmem:[#allocation3 + $0x118] sm:$0xff] }
  0x5c   :  { %1195 = vmatprep.subr.bf16.mxu1 %v4916_v37  ;;  %1114 = vmatprep.subr.bf16.mxu0 %v4914_v40  ;;  %v224_v0 = vld [vmem:[#allocation3 + $0x448] sm:$0xff]  ;;  %v223_v2 = vld [vmem:[#allocation3 + $0x440] sm:$0xff]  ;;  %v4961_v4 = vcombine.low %v199_v57, %v207_v58  ;;  %v4872_v34 = vcombine.high %v106_v26, %v114_v27  ;;  %v130_v36 = vld [vmem:[#allocation3 + $0x158] sm:$0xff]  ;;  %v4869_v37 = vcombine.low %v105_v24, %v113_v25 }
  0x5d   :  { %v4980_v5 = vcombine.high %v216_v63, %v224_v0  ;;  %v4978_v6 = vcombine.high %v215_v1, %v223_v2  ;;  %v232_v7 = vld [vmem:[#allocation3 + $0x488] sm:$0xff]  ;;  %v231_v8 = vld [vmem:[#allocation3 + $0x480] sm:$0xff]  ;;  %v4979_v9 = vcombine.low %v216_v63, %v224_v0  ;;  %v4977_v10 = vcombine.low %v215_v1, %v223_v2  ;;  %v137_v41 = vld [vmem:[#allocation3 + $0x190] sm:$0xff] }
  0x5e   :  { %v4996_v11 = vcombine.high %v232_v7, %v232_v7  ;;  %v4995_v12 = vcombine.low %v232_v7, %v232_v7  ;;  %v4994_v13 = vcombine.high %v231_v8, %v231_v8  ;;  %v4993_v14 = vcombine.low %v231_v8, %v231_v8  ;;  %v145_v42 = vld [vmem:[#allocation3 + $0x1d0] sm:$0xff]  ;;  %v5875_v47 = vld [vmem:[#allocation6 + $0x24] ss:$8 sps:$4 sm:$0xff]   ;;  %v162_v55 = vld [vmem:[#allocation3 + $0x258] sm:$0xff] }
  0x5f   :  { %1196 = vmatpush1.bf16.msra.mxu1 %v4915_v43  ;;  %1115 = vmatpush1.bf16.msra.mxu0 %v4913_v44  ;;  %v4886_v38 = vcombine.high %v121_v32, %v129_v33  ;;  %v4871_v40 = vcombine.low %v106_v26, %v114_v27  ;;  %v4888_v43 = vcombine.high %v122_v35, %v130_v36  ;;  %v5873_v44 = vld [vmem:[#allocation6 + $0x10] ss:$8 sps:$4 sm:$0xff]   ;;  %v5885_v1 = vld [vmem:[#allocation6 + $0x34] ss:$8 sps:$4 sm:$0xff]  }
  0x60   :  { %1197 = vmatprep.subr.bf16.mxu1 %v4932_v45  ;;  %1116 = vmatprep.subr.bf16.mxu0 %v4930_v46  ;;  %v1065_v19 = vsel %vm1057_vm1, %v4995_v12, 0  ;;  %v1059_v21 = vsel %vm1057_vm1, %v4993_v14, 0  ;;  %v138_v45 = vld [vmem:[#allocation3 + $0x198] sm:$0xff]  ;;  %v4885_v48 = vcombine.low %v121_v32, %v129_v33  ;;  %v4902_v49 = vcombine.high %v137_v41, %v145_v42  ;;  %v201_v14 = vld [vmem:[#allocation3 + $0x390] sm:$0xff] }
  0x61   :  { %v146_v46 = vld [vmem:[#allocation3 + $0x1d8] sm:$0xff]  ;;  %v4887_v50 = vcombine.low %v122_v35, %v130_v36  ;;  %v4901_v56 = vcombine.low %v137_v41, %v145_v42  ;;  %v209_v15 = vld [vmem:[#allocation3 + $0x3d0] sm:$0xff] }
  0x62   :  { %v4903_v58 = vcombine.low %v138_v45, %v146_v46  ;;  %v170_v63 = vld [vmem:[#allocation3 + $0x298] sm:$0xff]  ;;  %v217_v25 = vld [vmem:[#allocation3 + $0x410] sm:$0xff] }
  0x63   :  { %1198 = vmatpush1.bf16.msra.mxu1 %v4931_v51  ;;  %1117 = vmatpush1.bf16.msra.mxu0 %v4929_v52  ;;  %v153_v51 = vld [vmem:[#allocation3 + $0x210] sm:$0xff]  ;;  %v178_v0 = vld [vmem:[#allocation3 + $0x2d8] sm:$0xff] }
  0x64   :  { %1199 = vmatprep.subr.bf16.mxu1 %v4948_v53  ;;  %1118 = vmatprep.subr.bf16.mxu0 %v4946_v54  ;;  %v161_v52 = vld [vmem:[#allocation3 + $0x250] sm:$0xff]  ;;  %v4904_v53 = vcombine.high %v138_v45, %v146_v46  ;;  %v154_v54 = vld [vmem:[#allocation3 + $0x218] sm:$0xff]  ;;  %v4936_v7 = vcombine.high %v170_v63, %v178_v0  ;;  %v4935_v12 = vcombine.low %v170_v63, %v178_v0  ;;  %v91_v46 = vld [vmem:[#allocation3 + $0x20] sm:$0xff] }
  0x65   :  { %v4918_v57 = vcombine.high %v153_v51, %v161_v52  ;;  %v4917_v2 = vcombine.low %v153_v51, %v161_v52  ;;  %v186_v8 = vld [vmem:[#allocation3 + $0x318] sm:$0xff]  ;;  %v225_v26 = vld [vmem:[#allocation3 + $0x450] sm:$0xff]  ;;  %v123_v63 = vld [vmem:[#allocation3 + $0x120] sm:$0xff] }
  0x66   :  { %v5893_v17 = vld [vmem:[#allocation6 + $0x30] ss:$8 sps:$4 sm:$0xff]   ;;  %v4982_v32 = vcombine.high %v217_v25, %v225_v26  ;;  %v131_v0 = vld [vmem:[#allocation3 + $0x160] sm:$0xff] }
  0x67   :  { %1200 = vmatpush1.bf16.msra.mxu1 %v4947_v59  ;;  %1119 = vmatpush1.bf16.msra.mxu0 %v4945_v60  ;;  %v169_v59 = vld [vmem:[#allocation3 + $0x290] sm:$0xff]  ;;  %v202_v18 = vld [vmem:[#allocation3 + $0x398] sm:$0xff] }
  0x68   :  { %1201 = vmatprep.subr.bf16.mxu1 %v4964_v61  ;;  %1120 = vmatprep.subr.bf16.mxu0 %v4962_v62  ;;  %v177_v60 = vld [vmem:[#allocation3 + $0x2d0] sm:$0xff]  ;;  %v4920_v61 = vcombine.high %v154_v54, %v162_v55  ;;  %v5883_v62 = vld [vmem:[#allocation6 + $0x20] ss:$8 sps:$4 sm:$0xff]  }
  0x6b   :  { %1202 = vmatpush1.bf16.msra.mxu1 %v4963_v3  ;;  %1121 = vmatpush1.bf16.msra.mxu0 %v4961_v4  ;;  %v4934_v3 = vcombine.high %v169_v59, %v177_v60  ;;  %v4919_v4 = vcombine.low %v154_v54, %v162_v55  ;;  %v107_v55 = vld [vmem:[#allocation3 + $0xa0] sm:$0xff] }
  0x6c   :  { %1203 = vmatprep.subr.bf16.mxu1 %v4980_v5  ;;  %1122 = vmatprep.subr.bf16.mxu0 %v4978_v6  ;;  %v185_v5 = vld [vmem:[#allocation3 + $0x310] sm:$0xff] }
  0x6d   :  { %v193_v6 = vld [vmem:[#allocation3 + $0x350] sm:$0xff] }
  0x6f   :  { %1204 = vmatpush1.bf16.msra.mxu1 %v4979_v9  ;;  %1123 = vmatpush1.bf16.msra.mxu0 %v4977_v10  ;;  %v194_v9 = vld [vmem:[#allocation3 + $0x358] sm:$0xff]  ;;  %v4933_v10 = vcombine.low %v169_v59, %v177_v60 }
  0x70   :  { %5015 = vmatprep.subr.msk.bf16.mxu1 %vm1057_vm1, %v4996_v11  ;;  %5009 = vmatprep.subr.msk.bf16.mxu0 %vm1057_vm1, %v4994_v13  ;;  %v4950_v11 = vcombine.high %v185_v5, %v193_v6  ;;  %v86_v13 = vld [vmem:[#allocation6 + $0x40] sm:$0xff]  ;;  %v4952_v16 = vcombine.high %v186_v8, %v194_v9  ;;  %v4951_v24 = vcombine.low %v186_v8, %v194_v9 }
  0x71   :  { %v5903_v36 = vcombine.low %v86_v13, %v86_v13  ;;  %v139_v8 = vld [vmem:[#allocation3 + $0x1a0] sm:$0xff] }
  0x72   :  { %v147_v9 = vld [vmem:[#allocation3 + $0x1e0] sm:$0xff] }
  0x73   :  { %1206 = vmatpush1.bf16.msra.mxu1 %v1065_v19  ;;  %1125 = vmatpush1.bf16.msra.mxu0 %v1059_v21  ;;  %v210_v19 = vld [vmem:[#allocation3 + $0x3d8] sm:$0xff]  ;;  %v5895_v21 = vcombine.high %v86_v13, %v86_v13  ;;  %v4889_v13 = vcombine.low %v123_v63, %v131_v0 }
  0x74   :  { %1349 = vmatprep.subr.bf16.mxu1 %v4856_v20  ;;  %1268 = vmatprep.subr.bf16.mxu0 %v4854_v22  ;;  %v4949_v20 = vcombine.low %v185_v5, %v193_v6  ;;  %v4966_v22 = vcombine.high %v201_v14, %v209_v15  ;;  %v4968_v27 = vcombine.high %v202_v18, %v210_v19 }
  0x75   :  { %v4967_v33 = vcombine.low %v202_v18, %v210_v19  ;;  %v4890_v6 = vcombine.high %v123_v63, %v131_v0  ;;  %v163_v18 = vld [vmem:[#allocation3 + $0x260] sm:$0xff] }
  0x76   :  { %1220 = vmatmul.mubr.bf16.vlgmr.msra.gmra.mrb[0].mxu1 %v5863_v23  ;;  %1139 = vmatmul.mubr.bf16.vlgmr.msra.gmra.mrb[0].mxu0 %v5863_v23 }
  0x77   :  { %5017 = vmatprep.mubr.msk.bf16.mxu1 %vm1041_vm0, %v5865_v28  ;;  %5011 = vmatprep.mubr.msk.bf16.mxu0 %vm1041_vm0, %v5865_v28 }
  0x78   :  { %1269 = vmatpush1.bf16.msra.mxu0 %v4853_v29  ;;  %1350 = vmatpush1.bf16.msra.mxu1 %v4855_v31  ;;  %v218_v29 = vld [vmem:[#allocation3 + $0x418] sm:$0xff]  ;;  %v4965_v31 = vcombine.low %v201_v14, %v209_v15  ;;  %v4906_v14 = vcombine.high %v139_v8, %v147_v9 }
  0x79   :  { %1270 = vmatprep.subr.bf16.mxu0 %v4870_v30  ;;  %1351 = vmatprep.subr.bf16.mxu1 %v4872_v34  ;;  %v226_v30 = vld [vmem:[#allocation3 + $0x458] sm:$0xff]  ;;  %v233_v34 = vld [vmem:[#allocation3 + $0x490] sm:$0xff] }
  0x7a   :  { %v4984_v35 = vcombine.high %v218_v29, %v226_v30  ;;  %v4983_v41 = vcombine.low %v218_v29, %v226_v30  ;;  %v4997_v42 = vcombine.low %v233_v34, %v233_v34  ;;  %v179_v29 = vld [vmem:[#allocation3 + $0x2e0] sm:$0xff] }
  0x7c   :  { %1271 = vmatpush1.bf16.msra.mxu0 %v4869_v37  ;;  %1352 = vmatpush1.bf16.msra.mxu1 %v4871_v40  ;;  %v234_v37 = vld [vmem:[#allocation3 + $0x498] sm:$0xff]  ;;  %v4998_v40 = vcombine.high %v233_v34, %v233_v34  ;;  %v1071_v51 = vsel %vm1057_vm1, %v4997_v42, 0  ;;  %v196_v42 = vld [vmem:[#allocation3 + $0x368] sm:$0xff] }
  0x7d   :  { %1272 = vmatprep.subr.bf16.mxu0 %v4886_v38  ;;  %1353 = vmatprep.subr.bf16.mxu1 %v4888_v43  ;;  %v4981_v38 = vcombine.low %v217_v25, %v225_v26  ;;  %v5000_v43 = vcombine.high %v234_v37, %v234_v37  ;;  %v4999_v45 = vcombine.low %v234_v37, %v234_v37  ;;  %v187_v37 = vld [vmem:[#allocation3 + $0x320] sm:$0xff] }
  0x7e   :  { %1230 = vmatmul.mubr.bf16.gmra.mrb[4].mxu1 %v5873_v44  ;;  %1149 = vmatmul.mubr.bf16.gmra.mrb[4].mxu0 %v5873_v44 }
  0x7f   :  { %5018 = vmatprep.mubr.msk.bf16.mxu1 %vm1041_vm0, %v5875_v47  ;;  %5012 = vmatprep.mubr.msk.bf16.mxu0 %vm1041_vm0, %v5875_v47 }
  0x80   :  { %1273 = vmatpush1.bf16.msra.mxu0 %v4885_v48  ;;  %1354 = vmatpush1.bf16.msra.mxu1 %v4887_v50  ;;  %v99_v48 = vld [vmem:[#allocation3 + $0x60] sm:$0xff]  ;;  %v100_v50 = vld [vmem:[#allocation3 + $0x68] sm:$0xff] }
  0x81   :  { %1274 = vmatprep.subr.bf16.mxu0 %v4902_v49  ;;  %1355 = vmatprep.subr.bf16.mxu1 %v4904_v53  ;;  %v92_v49 = vld [vmem:[#allocation3 + $0x28] sm:$0xff]  ;;  %v4858_v52 = vcombine.high %v91_v46, %v99_v48  ;;  %v1077_v53 = vsel %vm1057_vm1, %v4999_v45, 0  ;;  %v4857_v59 = vcombine.low %v91_v46, %v99_v48  ;;  %v203_v48 = vld [vmem:[#allocation3 + $0x3a0] sm:$0xff] }
  0x82   :  { %v4860_v54 = vcombine.high %v92_v49, %v100_v50 }
  0x84   :  { %1275 = vmatpush1.bf16.msra.mxu0 %v4901_v56  ;;  %1356 = vmatpush1.bf16.msra.mxu1 %v4903_v58  ;;  %v115_v56 = vld [vmem:[#allocation3 + $0xe0] sm:$0xff]  ;;  %v116_v58 = vld [vmem:[#allocation3 + $0xe8] sm:$0xff] }
  0x85   :  { %1276 = vmatprep.subr.bf16.mxu0 %v4918_v57  ;;  %1357 = vmatprep.subr.bf16.mxu1 %v4920_v61  ;;  %v108_v57 = vld [vmem:[#allocation3 + $0xa8] sm:$0xff]  ;;  %v4874_v60 = vcombine.high %v107_v55, %v115_v56  ;;  %v4859_v61 = vcombine.low %v92_v49, %v100_v50  ;;  %v4873_v5 = vcombine.low %v107_v55, %v115_v56  ;;  %v211_v49 = vld [vmem:[#allocation3 + $0x3e0] sm:$0xff] }
  0x86   :  { %1240 = vmatmul.mubr.bf16.gmra.mrb[8].mxu1 %v5883_v62  ;;  %1159 = vmatmul.mubr.bf16.gmra.mrb[8].mxu0 %v5883_v62  ;;  %v219_v56 = vld [vmem:[#allocation3 + $0x420] sm:$0xff] }
  0x87   :  { %5019 = vmatprep.mubr.msk.bf16.mxu1 %vm1041_vm0, %v5885_v1  ;;  %5013 = vmatprep.mubr.msk.bf16.mxu0 %vm1041_vm0, %v5885_v1 }
  0x88   :  { %1277 = vmatpush1.bf16.msra.mxu0 %v4917_v2  ;;  %1358 = vmatpush1.bf16.msra.mxu1 %v4919_v4  ;;  %v4876_v2 = vcombine.high %v108_v57, %v116_v58  ;;  %v132_v4 = vld [vmem:[#allocation3 + $0x168] sm:$0xff] }
  0x89   :  { %1278 = vmatprep.subr.bf16.mxu0 %v4934_v3  ;;  %1359 = vmatprep.subr.bf16.mxu1 %v4936_v7  ;;  %v124_v3 = vld [vmem:[#allocation3 + $0x128] sm:$0xff]  ;;  %v4875_v7 = vcombine.low %v108_v57, %v116_v58  ;;  %v227_v57 = vld [vmem:[#allocation3 + $0x460] sm:$0xff] }
  0x8a   :  { %v4891_v15 = vcombine.low %v124_v3, %v132_v4  ;;  %v4986_v63 = vcombine.high %v219_v56, %v227_v57 }
  0x8c   :  { %1279 = vmatpush1.bf16.msra.mxu0 %v4933_v10  ;;  %1360 = vmatpush1.bf16.msra.mxu1 %v4935_v12  ;;  %v4892_v10 = vcombine.high %v124_v3, %v132_v4  ;;  %v148_v12 = vld [vmem:[#allocation3 + $0x1e8] sm:$0xff] }
  0x8d   :  { %1280 = vmatprep.subr.bf16.mxu0 %v4950_v11  ;;  %1361 = vmatprep.subr.bf16.mxu1 %v4952_v16  ;;  %v140_v11 = vld [vmem:[#allocation3 + $0x1a8] sm:$0xff]  ;;  %v155_v16 = vld [vmem:[#allocation3 + $0x220] sm:$0xff] }
  0x8e   :  { %1250 = vmatmul.mubr.bf16.gmra.mrb[12].mxu1 %v5893_v17  ;;  %1169 = vmatmul.mubr.bf16.gmra.mrb[12].mxu0 %v5893_v17  ;;  %v4908_v19 = vcombine.high %v140_v11, %v148_v12  ;;  %v4922_v25 = vcombine.high %v155_v16, %v163_v18  ;;  %v4907_v26 = vcombine.low %v140_v11, %v148_v12  ;;  %v236_v4 = vld [vmem:[#allocation3 + $0x4a8] sm:$0xff]  ;;  %v93_v11 = vld [vmem:[#allocation3 + $0x30] sm:$0xff] }
  0x8f   :  { %5020 = vmatprep.mubr.msk.bf16.mxu1 %vm1041_vm0, %v5895_v21  ;;  %5014 = vmatprep.mubr.msk.bf16.mxu0 %vm1041_vm0, %v5895_v21  ;;  %v101_v12 = vld [vmem:[#allocation3 + $0x70] sm:$0xff] }
  0x90   :  { %1281 = vmatpush1.bf16.msra.mxu0 %v4949_v20  ;;  %1362 = vmatpush1.bf16.msra.mxu1 %v4951_v24  ;;  %v156_v20 = vld [vmem:[#allocation3 + $0x228] sm:$0xff]  ;;  %v4905_v24 = vcombine.low %v139_v8, %v147_v9  ;;  %v5004_v9 = vcombine.high %v236_v4, %v236_v4 }
  0x91   :  { %1282 = vmatprep.subr.bf16.mxu0 %v4966_v22  ;;  %1363 = vmatprep.subr.bf16.mxu1 %v4968_v27  ;;  %v164_v22 = vld [vmem:[#allocation3 + $0x268] sm:$0xff]  ;;  %v171_v27 = vld [vmem:[#allocation3 + $0x2a0] sm:$0xff] }
  0x92   :  { %v4924_v30 = vcombine.high %v156_v20, %v164_v22  ;;  %v4938_v34 = vcombine.high %v171_v27, %v179_v29 }
  0x94   :  { %1283 = vmatpush1.bf16.msra.mxu0 %v4965_v31  ;;  %1364 = vmatpush1.bf16.msra.mxu1 %v4967_v33  ;;  %v172_v31 = vld [vmem:[#allocation3 + $0x2a8] sm:$0xff]  ;;  %v4921_v33 = vcombine.low %v155_v16, %v163_v18  ;;  %v4862_v16 = vcombine.high %v93_v11, %v101_v12 }
  0x95   :  { %1284 = vmatprep.subr.bf16.mxu0 %v4982_v32  ;;  %1365 = vmatprep.subr.bf16.mxu1 %v4984_v35  ;;  %v180_v32 = vld [vmem:[#allocation3 + $0x2e8] sm:$0xff]  ;;  %v4923_v35 = vcombine.low %v156_v20, %v164_v22  ;;  %v109_v20 = vld [vmem:[#allocation3 + $0xb0] sm:$0xff] }
  0x96   :  { %1260 = vmatmul.mubr.bf16.gmra.mrb[16].mxu1 %v5903_v36  ;;  %1179 = vmatmul.mubr.bf16.gmra.mrb[16].mxu0 %v5903_v36  ;;  %v4939_v46 = vcombine.low %v172_v31, %v180_v32  ;;  %v117_v22 = vld [vmem:[#allocation3 + $0xf0] sm:$0xff] }
  0x97   :  { %5028 = vmatprep.mubr.msk.bf16.mxu1 %vm1041_vm0, %v5853_v39  ;;  %5022 = vmatprep.mubr.msk.bf16.mxu0 %vm1041_vm0, %v5853_v39 }
  0x98   :  { %1285 = vmatpush1.bf16.msra.mxu0 %v4981_v38  ;;  %1366 = vmatpush1.bf16.msra.mxu1 %v4983_v41  ;;  %v195_v38 = vld [vmem:[#allocation3 + $0x360] sm:$0xff]  ;;  %v188_v41 = vld [vmem:[#allocation3 + $0x328] sm:$0xff] }
  0x99   :  { %5021 = vmatprep.subr.msk.bf16.mxu0 %vm1057_vm1, %v4998_v40  ;;  %5027 = vmatprep.subr.msk.bf16.mxu1 %vm1057_vm1, %v5000_v43  ;;  %v4940_v40 = vcombine.high %v172_v31, %v180_v32  ;;  %v4937_v43 = vcombine.low %v171_v27, %v179_v29  ;;  %v4954_v45 = vcombine.high %v187_v37, %v195_v38  ;;  %v133_v31 = vld [vmem:[#allocation3 + $0x170] sm:$0xff] }
  0x9a   :  { %v4956_v50 = vcombine.high %v188_v41, %v196_v42  ;;  %v4955_v55 = vcombine.low %v188_v41, %v196_v42  ;;  %v4878_v27 = vcombine.high %v109_v20, %v117_v22  ;;  %v149_v41 = vld [vmem:[#allocation3 + $0x1f0] sm:$0xff] }
  0x9c   :  { %1287 = vmatpush1.bf16.msra.mxu0 %v1071_v51  ;;  %1368 = vmatpush1.bf16.msra.mxu1 %v1077_v53  ;;  %v204_v51 = vld [vmem:[#allocation3 + $0x3a8] sm:$0xff]  ;;  %v4953_v53 = vcombine.low %v187_v37, %v195_v38 }
  0x9d   :  { %1430 = vmatprep.subr.bf16.mxu0 %v4858_v52  ;;  %1511 = vmatprep.subr.bf16.mxu1 %v4860_v54  ;;  %v212_v52 = vld [vmem:[#allocation3 + $0x3e8] sm:$0xff]  ;;  %v4970_v54 = vcombine.high %v203_v48, %v211_v49 }
  0x9e   :  { %v4972_v58 = vcombine.high %v204_v51, %v212_v52  ;;  %v4971_v0 = vcombine.low %v204_v51, %v212_v52  ;;  %v165_v51 = vld [vmem:[#allocation3 + $0x270] sm:$0xff] }
  0x9f   :  { %1301 = vmatmul.mubr.bf16.vlgmr.msra.gmra.mrb[20].mxu0 %v5863_v23  ;;  %1382 = vmatmul.mubr.bf16.vlgmr.msra.gmra.mrb[20].mxu1 %v5863_v23 }
  0xa0   :  { %5023 = vmatprep.mubr.msk.bf16.mxu0 %vm1041_vm0, %v5865_v28  ;;  %5029 = vmatprep.mubr.msk.bf16.mxu1 %vm1041_vm0, %v5865_v28 }
  0xa1   :  { %1431 = vmatpush1.bf16.msra.mxu0 %v4857_v59  ;;  %1512 = vmatpush1.bf16.msra.mxu1 %v4859_v61  ;;  %v220_v59 = vld [vmem:[#allocation3 + $0x428] sm:$0xff]  ;;  %v4969_v61 = vcombine.low %v203_v48, %v211_v49 }
  0xa2   :  { %1432 = vmatprep.subr.bf16.mxu0 %v4874_v60  ;;  %1513 = vmatprep.subr.bf16.mxu1 %v4876_v2  ;;  %v228_v60 = vld [vmem:[#allocation3 + $0x468] sm:$0xff]  ;;  %v235_v2 = vld [vmem:[#allocation3 + $0x4a0] sm:$0xff] }
  0xa3   :  { %v4988_v3 = vcombine.high %v220_v59, %v228_v60  ;;  %v5001_v8 = vcombine.low %v235_v2, %v235_v2 }
  0xa5   :  { %1433 = vmatpush1.bf16.msra.mxu0 %v4873_v5  ;;  %1514 = vmatpush1.bf16.msra.mxu1 %v4875_v7  ;;  %v4985_v5 = vcombine.low %v219_v56, %v227_v57  ;;  %v4987_v7 = vcombine.low %v220_v59, %v228_v60  ;;  %v181_v59 = vld [vmem:[#allocation3 + $0x2f0] sm:$0xff] }
  0xa6   :  { %1434 = vmatprep.subr.bf16.mxu0 %v4890_v6  ;;  %1515 = vmatprep.subr.bf16.mxu1 %v4892_v10  ;;  %v5002_v6 = vcombine.high %v235_v2, %v235_v2  ;;  %v5003_v10 = vcombine.low %v236_v4, %v236_v4  ;;  %v189_v4 = vld [vmem:[#allocation3 + $0x330] sm:$0xff] }
  0xa7   :  { %1311 = vmatmul.mubr.bf16.gmra.mrb[24].mxu0 %v5873_v44  ;;  %1392 = vmatmul.mubr.bf16.gmra.mrb[24].mxu1 %v5873_v44 }
  0xa8   :  { %5024 = vmatprep.mubr.msk.bf16.mxu0 %vm1041_vm0, %v5875_v47  ;;  %5030 = vmatprep.mubr.msk.bf16.mxu1 %vm1041_vm0, %v5875_v47  ;;  %v1089_v18 = vsel %vm1057_vm1, %v5003_v10, 0 }
  0xa9   :  { %1435 = vmatpush1.bf16.msra.mxu0 %v4889_v13  ;;  %1516 = vmatpush1.bf16.msra.mxu1 %v4891_v15  ;;  %v94_v13 = vld [vmem:[#allocation3 + $0x38] sm:$0xff]  ;;  %v1083_v15 = vsel %vm1057_vm1, %v5001_v8, 0 }
  0xaa   :  { %1436 = vmatprep.subr.bf16.mxu0 %v4906_v14  ;;  %1517 = vmatprep.subr.bf16.mxu1 %v4908_v19  ;;  %v102_v14 = vld [vmem:[#allocation3 + $0x78] sm:$0xff] }
  0xab   :  { %v4864_v19 = vcombine.high %v94_v13, %v102_v14  ;;  %v4863_v29 = vcombine.low %v94_v13, %v102_v14  ;;  %v198_v8 = vld [vmem:[#allocation3 + $0x378] sm:$0xff]  ;;  %v213_v13 = vld [vmem:[#allocation3 + $0x3f0] sm:$0xff] }
  0xad   :  { %1437 = vmatpush1.bf16.msra.mxu0 %v4905_v24  ;;  %1518 = vmatpush1.bf16.msra.mxu1 %v4907_v26  ;;  %v110_v24 = vld [vmem:[#allocation3 + $0xb8] sm:$0xff]  ;;  %v4861_v26 = vcombine.low %v93_v11, %v101_v12  ;;  %v205_v12 = vld [vmem:[#allocation3 + $0x3b0] sm:$0xff] }
  0xae   :  { %1438 = vmatprep.subr.bf16.mxu0 %v4922_v25  ;;  %1519 = vmatprep.subr.bf16.mxu1 %v4924_v30  ;;  %v118_v25 = vld [vmem:[#allocation3 + $0xf8] sm:$0xff]  ;;  %v125_v30 = vld [vmem:[#allocation3 + $0x130] sm:$0xff] }
  0xaf   :  { %1321 = vmatmul.mubr.bf16.gmra.mrb[28].mxu0 %v5883_v62  ;;  %1402 = vmatmul.mubr.bf16.gmra.mrb[28].mxu1 %v5883_v62  ;;  %v4880_v32 = vcombine.high %v110_v24, %v118_v25  ;;  %v4894_v37 = vcombine.high %v125_v30, %v133_v31  ;;  %v4879_v38 = vcombine.low %v110_v24, %v118_v25  ;;  %v229_v24 = vld [vmem:[#allocation3 + $0x470] sm:$0xff] }
  0xb0   :  { %5025 = vmatprep.mubr.msk.bf16.mxu0 %vm1041_vm0, %v5885_v1  ;;  %5031 = vmatprep.mubr.msk.bf16.mxu1 %vm1041_vm0, %v5885_v1 }
  0xb1   :  { %1439 = vmatpush1.bf16.msra.mxu0 %v4921_v33  ;;  %1520 = vmatpush1.bf16.msra.mxu1 %v4923_v35  ;;  %v126_v33 = vld [vmem:[#allocation3 + $0x138] sm:$0xff]  ;;  %v4877_v35 = vcombine.low %v109_v20, %v117_v22  ;;  %v221_v22 = vld [vmem:[#allocation3 + $0x430] sm:$0xff] }
  0xb2   :  { %1440 = vmatprep.subr.bf16.mxu0 %v4938_v34  ;;  %1521 = vmatprep.subr.bf16.mxu1 %v4940_v40  ;;  %v134_v34 = vld [vmem:[#allocation3 + $0x178] sm:$0xff]  ;;  %v141_v40 = vld [vmem:[#allocation3 + $0x1b0] sm:$0xff] }
  0xb3   :  { %v4896_v42 = vcombine.high %v126_v33, %v134_v34  ;;  %v4910_v48 = vcombine.high %v141_v40, %v149_v41  ;;  %v4895_v49 = vcombine.low %v126_v33, %v134_v34  ;;  %v238_v34 = vld [vmem:[#allocation3 + $0x4b8] sm:$0xff] }
  0xb5   :  { %1441 = vmatpush1.bf16.msra.mxu0 %v4937_v43  ;;  %1522 = vmatpush1.bf16.msra.mxu1 %v4939_v46  ;;  %v142_v43 = vld [vmem:[#allocation3 + $0x1b8] sm:$0xff]  ;;  %v4893_v46 = vcombine.low %v125_v30, %v133_v31  ;;  %v4990_v30 = vcombine.high %v221_v22, %v229_v24 }
  0xb6   :  { %1442 = vmatprep.subr.bf16.mxu0 %v4954_v45  ;;  %1523 = vmatprep.subr.bf16.mxu1 %v4956_v50  ;;  %v150_v45 = vld [vmem:[#allocation3 + $0x1f8] sm:$0xff]  ;;  %v157_v50 = vld [vmem:[#allocation3 + $0x230] sm:$0xff] }
  0xb7   :  { %1331 = vmatmul.mubr.bf16.gmra.mrb[32].mxu0 %v5893_v17  ;;  %1412 = vmatmul.mubr.bf16.gmra.mrb[32].mxu1 %v5893_v17  ;;  %v4912_v52 = vcombine.high %v142_v43, %v150_v45  ;;  %v4926_v56 = vcombine.high %v157_v50, %v165_v51  ;;  %v4911_v57 = vcombine.low %v142_v43, %v150_v45 }
  0xb8   :  { %5026 = vmatprep.mubr.msk.bf16.mxu0 %vm1041_vm0, %v5895_v21  ;;  %5032 = vmatprep.mubr.msk.bf16.mxu1 %vm1041_vm0, %v5895_v21 }
  0xb9   :  { %1443 = vmatpush1.bf16.msra.mxu0 %v4953_v53  ;;  %1524 = vmatpush1.bf16.msra.mxu1 %v4955_v55  ;;  %v158_v53 = vld [vmem:[#allocation3 + $0x238] sm:$0xff]  ;;  %v4909_v55 = vcombine.low %v141_v40, %v149_v41  ;;  %v5008_v41 = vcombine.high %v238_v34, %v238_v34 }
  0xba   :  { %1444 = vmatprep.subr.bf16.mxu0 %v4970_v54  ;;  %1525 = vmatprep.subr.bf16.mxu1 %v4972_v58  ;;  %v166_v54 = vld [vmem:[#allocation3 + $0x278] sm:$0xff]  ;;  %v173_v58 = vld [vmem:[#allocation3 + $0x2b0] sm:$0xff] }
  0xbb   :  { %v4928_v60 = vcombine.high %v158_v53, %v166_v54  ;;  %v4942_v2 = vcombine.high %v173_v58, %v181_v59 }
  0xbd   :  { %1445 = vmatpush1.bf16.msra.mxu0 %v4969_v61  ;;  %1526 = vmatpush1.bf16.msra.mxu1 %v4971_v0  ;;  %v174_v61 = vld [vmem:[#allocation3 + $0x2b8] sm:$0xff]  ;;  %v4925_v0 = vcombine.low %v157_v50, %v165_v51 }
  0xbe   :  { %1446 = vmatprep.subr.bf16.mxu0 %v4986_v63  ;;  %1527 = vmatprep.subr.bf16.mxu1 %v4988_v3  ;;  %v182_v63 = vld [vmem:[#allocation3 + $0x2f8] sm:$0xff]  ;;  %v4927_v3 = vcombine.low %v158_v53, %v166_v54 }
  0xbf   :  { %1341 = vmatmul.mubr.bf16.gmra.mrb[36].mxu0 %v5903_v36  ;;  %1422 = vmatmul.mubr.bf16.gmra.mrb[36].mxu1 %v5903_v36  ;;  %v4943_v11 = vcombine.low %v174_v61, %v182_v63 }
  0xc0   :  { %5034 = vmatprep.mubr.msk.bf16.mxu0 %vm1041_vm0, %v5853_v39  ;;  %5040 = vmatprep.mubr.msk.bf16.mxu1 %vm1041_vm0, %v5853_v39 }
  0xc1   :  { %1447 = vmatpush1.bf16.msra.mxu0 %v4985_v5  ;;  %1528 = vmatpush1.bf16.msra.mxu1 %v4987_v7  ;;  %v197_v5 = vld [vmem:[#allocation3 + $0x370] sm:$0xff]  ;;  %v190_v7 = vld [vmem:[#allocation3 + $0x338] sm:$0xff] }
  0xc2   :  { %5033 = vmatprep.subr.msk.bf16.mxu0 %vm1057_vm1, %v5002_v6  ;;  %5039 = vmatprep.subr.msk.bf16.mxu1 %vm1057_vm1, %v5004_v9  ;;  %v4944_v6 = vcombine.high %v174_v61, %v182_v63  ;;  %v4941_v9 = vcombine.low %v173_v58, %v181_v59  ;;  %v4958_v10 = vcombine.high %v189_v4, %v197_v5 }
  0xc3   :  { %v4960_v14 = vcombine.high %v190_v7, %v198_v8  ;;  %v4959_v20 = vcombine.low %v190_v7, %v198_v8 }
  0xc5   :  { %1449 = vmatpush1.bf16.msra.mxu0 %v1083_v15  ;;  %1530 = vmatpush1.bf16.msra.mxu1 %v1089_v18  ;;  %v206_v15 = vld [vmem:[#allocation3 + $0x3b8] sm:$0xff]  ;;  %v4957_v18 = vcombine.low %v189_v4, %v197_v5 }
  0xc6   :  { %1592 = vmatprep.subr.bf16.mxu0 %v4862_v16  ;;  %1673 = vmatprep.subr.bf16.mxu1 %v4864_v19  ;;  %v214_v16 = vld [vmem:[#allocation3 + $0x3f8] sm:$0xff]  ;;  %v4974_v19 = vcombine.high %v205_v12, %v213_v13 }
  0xc7   :  { %v4976_v25 = vcombine.high %v206_v15, %v214_v16  ;;  %v4975_v31 = vcombine.low %v206_v15, %v214_v16 }
  0xc8   :  { %1463 = vmatmul.mubr.bf16.vlgmr.msra.gmra.mrb[40].mxu0 %v5863_v23  ;;  %1544 = vmatmul.mubr.bf16.vlgmr.msra.gmra.mrb[40].mxu1 %v5863_v23 }
  0xc9   :  { %5035 = vmatprep.mubr.msk.bf16.mxu0 %vm1041_vm0, %v5865_v28  ;;  %5041 = vmatprep.mubr.msk.bf16.mxu1 %vm1041_vm0, %v5865_v28 }
  0xca   :  { %1593 = vmatpush1.bf16.msra.mxu0 %v4861_v26  ;;  %1674 = vmatpush1.bf16.msra.mxu1 %v4863_v29  ;;  %v222_v26 = vld [vmem:[#allocation3 + $0x438] sm:$0xff]  ;;  %v4973_v29 = vcombine.low %v205_v12, %v213_v13 }
  0xcb   :  { %1594 = vmatprep.subr.bf16.mxu0 %v4878_v27  ;;  %1675 = vmatprep.subr.bf16.mxu1 %v4880_v32  ;;  %v230_v27 = vld [vmem:[#allocation3 + $0x478] sm:$0xff]  ;;  %v237_v32 = vld [vmem:[#allocation3 + $0x4b0] sm:$0xff] }
  0xcc   :  { %v4992_v33 = vcombine.high %v222_v26, %v230_v27  ;;  %v5005_v40 = vcombine.low %v237_v32, %v237_v32 }
  0xce   :  { %1595 = vmatpush1.bf16.msra.mxu0 %v4877_v35  ;;  %1676 = vmatpush1.bf16.msra.mxu1 %v4879_v38  ;;  %v4989_v35 = vcombine.low %v221_v22, %v229_v24  ;;  %v4991_v38 = vcombine.low %v222_v26, %v230_v27  ;;  %v1095_v43 = vsel %vm1057_vm1, %v5005_v40, 0 }
  0xcf   :  { %1596 = vmatprep.subr.bf16.mxu0 %v4894_v37  ;;  %1677 = vmatprep.subr.bf16.mxu1 %v4896_v42  ;;  %v5006_v37 = vcombine.high %v237_v32, %v237_v32  ;;  %v5007_v42 = vcombine.low %v238_v34, %v238_v34 }
  0xd0   :  { %1473 = vmatmul.mubr.bf16.gmra.mrb[44].mxu0 %v5873_v44  ;;  %1554 = vmatmul.mubr.bf16.gmra.mrb[44].mxu1 %v5873_v44 }
  0xd1   :  { %5036 = vmatprep.mubr.msk.bf16.mxu0 %vm1041_vm0, %v5875_v47  ;;  %5042 = vmatprep.mubr.msk.bf16.mxu1 %vm1041_vm0, %v5875_v47  ;;  %v1101_v45 = vsel %vm1057_vm1, %v5007_v42, 0 }
  0xd2   :  { %1597 = vmatpush1.bf16.msra.mxu0 %v4893_v46  ;;  %1678 = vmatpush1.bf16.msra.mxu1 %v4895_v49 }
  0xd3   :  { %1598 = vmatprep.subr.bf16.mxu0 %v4910_v48  ;;  %1679 = vmatprep.subr.bf16.mxu1 %v4912_v52 }
  0xd6   :  { %1599 = vmatpush1.bf16.msra.mxu0 %v4909_v55  ;;  %1680 = vmatpush1.bf16.msra.mxu1 %v4911_v57 }
  0xd7   :  { %1600 = vmatprep.subr.bf16.mxu0 %v4926_v56  ;;  %1681 = vmatprep.subr.bf16.mxu1 %v4928_v60 }
  0xd8   :  { %1483 = vmatmul.mubr.bf16.gmra.mrb[48].mxu0 %v5883_v62  ;;  %1564 = vmatmul.mubr.bf16.gmra.mrb[48].mxu1 %v5883_v62 }
  0xd9   :  { %5037 = vmatprep.mubr.msk.bf16.mxu0 %vm1041_vm0, %v5885_v1  ;;  %5043 = vmatprep.mubr.msk.bf16.mxu1 %vm1041_vm0, %v5885_v1 }
  0xda   :  { %1601 = vmatpush1.bf16.msra.mxu0 %v4925_v0  ;;  %1682 = vmatpush1.bf16.msra.mxu1 %v4927_v3 }
  0xdb   :  { %1602 = vmatprep.subr.bf16.mxu0 %v4942_v2  ;;  %1683 = vmatprep.subr.bf16.mxu1 %v4944_v6 }
  0xde   :  { %1603 = vmatpush1.bf16.msra.mxu0 %v4941_v9  ;;  %1684 = vmatpush1.bf16.msra.mxu1 %v4943_v11 }
  0xdf   :  { %1604 = vmatprep.subr.bf16.mxu0 %v4958_v10  ;;  %1685 = vmatprep.subr.bf16.mxu1 %v4960_v14 }
  0xe0   :  { %1493 = vmatmul.mubr.bf16.gmra.mrb[52].mxu0 %v5893_v17  ;;  %1574 = vmatmul.mubr.bf16.gmra.mrb[52].mxu1 %v5893_v17 }
  0xe1   :  { %5038 = vmatprep.mubr.msk.bf16.mxu0 %vm1041_vm0, %v5895_v21  ;;  %5044 = vmatprep.mubr.msk.bf16.mxu1 %vm1041_vm0, %v5895_v21 }
  0xe2   :  { %1605 = vmatpush1.bf16.msra.mxu0 %v4957_v18  ;;  %1686 = vmatpush1.bf16.msra.mxu1 %v4959_v20 }
  0xe3   :  { %1606 = vmatprep.subr.bf16.mxu0 %v4974_v19  ;;  %1687 = vmatprep.subr.bf16.mxu1 %v4976_v25 }
  0xe6   :  { %1607 = vmatpush1.bf16.msra.mxu0 %v4973_v29  ;;  %1688 = vmatpush1.bf16.msra.mxu1 %v4975_v31 }
  0xe7   :  { %1608 = vmatprep.subr.bf16.mxu0 %v4990_v30  ;;  %1689 = vmatprep.subr.bf16.mxu1 %v4992_v33 }
  0xe8   :  { %1503 = vmatmul.mubr.bf16.gmra.mrb[56].mxu0 %v5903_v36  ;;  %1584 = vmatmul.mubr.bf16.gmra.mrb[56].mxu1 %v5903_v36 }
  0xe9   :  { %5046 = vmatprep.mubr.msk.bf16.mxu0 %vm1041_vm0, %v5853_v39  ;;  %5052 = vmatprep.mubr.msk.bf16.mxu1 %vm1041_vm0, %v5853_v39 }
  0xea   :  { %1609 = vmatpush1.bf16.msra.mxu0 %v4989_v35  ;;  %1690 = vmatpush1.bf16.msra.mxu1 %v4991_v38 }
  0xeb   :  { %5045 = vmatprep.subr.msk.bf16.mxu0 %vm1057_vm1, %v5006_v37  ;;  %5051 = vmatprep.subr.msk.bf16.mxu1 %vm1057_vm1, %v5008_v41 }
  0xee   :  { %1611 = vmatpush1.bf16.msra.mxu0 %v1095_v43  ;;  %1692 = vmatpush1.bf16.msra.mxu1 %v1101_v45 }
  0xf1   :  { %1625 = vmatmul.mubr.bf16.vlgmr.msra.gmra.mrb[60].mxu0 %v5863_v23  ;;  %1706 = vmatmul.mubr.bf16.vlgmr.msra.gmra.mrb[60].mxu1 %v5863_v23 }
  0xf2   :  { %5047 = vmatprep.mubr.msk.bf16.mxu0 %vm1041_vm0, %v5865_v28  ;;  %5053 = vmatprep.mubr.msk.bf16.mxu1 %vm1041_vm0, %v5865_v28 }
  0xf9   :  { %1635 = vmatmul.mubr.bf16.gmra.mrb[64].mxu0 %v5873_v44  ;;  %1716 = vmatmul.mubr.bf16.gmra.mrb[64].mxu1 %v5873_v44 }
  0xfa   :  { %5048 = vmatprep.mubr.msk.bf16.mxu0 %vm1041_vm0, %v5875_v47  ;;  %5054 = vmatprep.mubr.msk.bf16.mxu1 %vm1041_vm0, %v5875_v47 }
 0x101   :  { %1645 = vmatmul.mubr.bf16.gmra.mrb[68].mxu0 %v5883_v62  ;;  %1726 = vmatmul.mubr.bf16.gmra.mrb[68].mxu1 %v5883_v62 }
 0x102   :  { %5049 = vmatprep.mubr.msk.bf16.mxu0 %vm1041_vm0, %v5885_v1  ;;  %5055 = vmatprep.mubr.msk.bf16.mxu1 %vm1041_vm0, %v5885_v1 }
 0x109   :  { %1655 = vmatmul.mubr.bf16.gmra.mrb[72].mxu0 %v5893_v17  ;;  %1736 = vmatmul.mubr.bf16.gmra.mrb[72].mxu1 %v5893_v17 }
 0x10a   :  { %5050 = vmatprep.mubr.msk.bf16.mxu0 %vm1041_vm0, %v5895_v21  ;;  %5056 = vmatprep.mubr.msk.bf16.mxu1 %vm1041_vm0, %v5895_v21 }
 0x111   :  { %1665 = vmatmul.mubr.bf16.gmra.mrb[76].mxu0 %v5903_v36  ;;  %1746 = vmatmul.mubr.bf16.gmra.mrb[76].mxu1 %v5903_v36 }
 0x149   :  { %v6009_v39 = vpop.f32.mrb[0].mxu1  ;;  %v6012_v28 = vpop.f32.mrb[0].mxu0 }
 0x14a   :  { %v9254_v23 = vmax.f32 %v6009_v39, 0.0  ;;  %v6014_v44 = vpop.f32.mrb[1].mxu1  ;;  %v6017_v62 = vpop.f32.mrb[1].mxu0  ;;  %v9250_v17 = vmax.f32 %v6012_v28, 0.0 }
 0x14b   :  { %9579 = vst [vmem:[#allocation16_spill] sm:$0xff] %v6014_v44  ;;  %v9231_v47 = vmax.f32 %v6014_v44, 0.0  ;;  %v6019_v1 = vpop.f32.mrb[2].mxu1  ;;  %v6025_v21 = vpop.f32.mrb[2].mxu0  ;;  %v9248_v50 = vmax.f32 %v6017_v62, 0.0  ;;  %v4000_v44 = vld [vmem:[#allocation9 + $0x20] sm:$0xff] }
 0x14c   :  { %9580 = vst [vmem:[#allocation17_spill] sm:$0xff] %v6019_v1  ;;  %2046 = vrot.lane.b32.xlu0 %v9254_v23, %s5765_s3  ;;  %v6027_v36 = vpop.f32.mrb[3].mxu1  ;;  %v6032_v46 = vpop.f32.mrb[3].mxu0  ;;  %v9246_v48 = vmax.f32 %v6019_v1, 0.0  ;;  %v9253_v53 = vmax.f32 %v6025_v21, 0.0 }
 0x14d   :  { %9581 = vst [vmem:[#allocation18_spill] sm:$0xff] %v6027_v36  ;;  %2048 = vrot.lane.b32.xlu1 %v9231_v47, %s5765_s3  ;;  %v9252_v60 = vmax.f32 %v6032_v46, 0.0  ;;  %v9232_v3 = vmax.f32 %v6027_v36, 0.0  ;;  %v4001_v36 = vld [vmem:[#allocation9 + $0x28] sm:$0xff] }
 0x150   :  { %2042 = vrot.lane.b32.xlu0 %v9250_v17, %s5765_s3 }
 0x151   :  { %2078 = vrot.lane.b32.xlu1 %v9246_v48, %s5765_s3  ;;  %v6041_v49 = vpop.f32.mrb[4].mxu1  ;;  %v6044_v51 = vpop.f32.mrb[4].mxu0  ;;  %v3996_v48 = vld [vmem:[#allocation9] sm:$0xff] }
 0x152   :  { %9582 = vst [vmem:[#allocation19_spill] sm:$0xff] %v6041_v49  ;;  %v6046_v52 = vpop.f32.mrb[5].mxu1  ;;  %v6049_v54 = vpop.f32.mrb[5].mxu0  ;;  %v9249_v56 = vmax.f32 %v6044_v51, 0.0  ;;  %v9244_v10 = vmax.f32 %v6041_v49, 0.0 }
 0x153   :  { %9583 = vst [vmem:[#allocation20_spill] sm:$0xff] %v6046_v52  ;;  %9584 = vst [vmem:[#allocation21_spill] sm:$0xff] %v6049_v54  ;;  %v6051_v55 = vpop.f32.mrb[6].mxu1  ;;  %v6057_v57 = vpop.f32.mrb[6].mxu0  ;;  %v9245_v63 = vmax.f32 %v6049_v54, 0.0  ;;  %v9230_v15 = vmax.f32 %v6046_v52, 0.0 }
 0x154   :  { %9585 = vst [vmem:[#allocation22_spill] sm:$0xff] %v6051_v55  ;;  %2044 = vrot.lane.b32.xlu0 %v9248_v50, %s5765_s3  ;;  %9586 = vst [vmem:[#allocation23_spill] sm:$0xff] %v6057_v57  ;;  %v6059_v58 = vpop.f32.mrb[7].mxu1  ;;  %v6064_v59 = vpop.f32.mrb[7].mxu0  ;;  %v9243_v9 = vmax.f32 %v6051_v55, 0.0  ;;  %v9242_v25 = vmax.f32 %v6057_v57, 0.0 }
 0x155   :  { %9587 = vst [vmem:[#allocation24_spill] sm:$0xff] %v6059_v58  ;;  %2074 = vrot.lane.b32.xlu1 %v9253_v53, %s5765_s3  ;;  %9588 = vst [vmem:[#allocation25_spill] sm:$0xff] %v6064_v59  ;;  %v9229_v12 = vmax.f32 %v6059_v58, 0.0  ;;  %v9241_v31 = vmax.f32 %v6064_v59, 0.0 }
 0x158   :  { %2106 = vrot.lane.b32.xlu0 %v9249_v56, %s5765_s3 }
 0x159   :  { %2076 = vrot.lane.b32.xlu1 %v9252_v60, %s5765_s3  ;;  %v6073_v61 = vpop.f32.mrb[8].mxu1  ;;  %v6076_v0 = vpop.f32.mrb[8].mxu0  ;;  %v4015_v60 = vld [vmem:[#allocation9 + $0x98] sm:$0xff] }
 0x15a   :  { %9589 = vst [vmem:[#allocation26_spill] sm:$0xff] %v6073_v61  ;;  %9590 = vst [vmem:[#allocation27_spill] sm:$0xff] %v6076_v0  ;;  %v6078_v2 = vpop.f32.mrb[9].mxu1  ;;  %v6081_v4 = vpop.f32.mrb[9].mxu0  ;;  %v9238_v19 = vmax.f32 %v6076_v0, 0.0  ;;  %v9236_v40 = vmax.f32 %v6073_v61, 0.0 }
 0x15b   :  { %9591 = vst [vmem:[#allocation28_spill] sm:$0xff] %v6078_v2  ;;  %9592 = vst [vmem:[#allocation29_spill] sm:$0xff] %v6081_v4  ;;  %v6083_v5 = vpop.f32.mrb[10].mxu1  ;;  %v6088_v6 = vpop.f32.mrb[10].mxu0  ;;  %v9237_v27 = vmax.f32 %v6081_v4, 0.0  ;;  %v9235_v43 = vmax.f32 %v6078_v2, 0.0 }
 0x15c   :  { %9593 = vst [vmem:[#allocation30_spill] sm:$0xff] %v6083_v5  ;;  %2108 = vrot.lane.b32.xlu0 %v9245_v63, %s5765_s3  ;;  %9594 = vst [vmem:[#allocation31_spill] sm:$0xff] %v6088_v6  ;;  %v6090_v7 = vpop.f32.mrb[11].mxu1  ;;  %v6095_v8 = vpop.f32.mrb[11].mxu0  ;;  %v9234_v38 = vmax.f32 %v6083_v5, 0.0  ;;  %v4013_v63 = vld [vmem:[#allocation9 + $0x88] sm:$0xff] }
 0x15d   :  { %9595 = vst [vmem:[#allocation32_spill] sm:$0xff] %v6090_v7  ;;  %2080 = vrot.lane.b32.xlu1 %v9232_v3, %s5765_s3  ;;  %9596 = vst [vmem:[#allocation33_spill] sm:$0xff] %v6095_v8  ;;  %v9233_v41 = vmax.f32 %v6090_v7, 0.0  ;;  %v9240_v3 = vmax.f32 %v6088_v6, 0.0  ;;  %v4016_v2 = vld [vmem:[#allocation9 + $0xa0] sm:$0xff]  ;;  %v4025_v5 = vld [vmem:[#allocation9 + $0xe8] sm:$0xff] }
 0x160   :  { %2142 = vrot.lane.b32.xlu0 %v9243_v9, %s5765_s3 }
 0x161   :  { %2110 = vrot.lane.b32.xlu1 %v9244_v10, %s5765_s3  ;;  %v6105_v11 = vpop.f32.mrb[12].mxu1  ;;  %v6108_v13 = vpop.f32.mrb[12].mxu0 }
 0x162   :  { %9597 = vst [vmem:[#allocation34_spill] sm:$0xff] %v6105_v11  ;;  %9598 = vst [vmem:[#allocation35_spill] sm:$0xff] %v6108_v13  ;;  %v6110_v14 = vpop.f32.mrb[13].mxu1  ;;  %v6113_v16 = vpop.f32.mrb[13].mxu0  ;;  %v9258_v50 = vmax.f32 %v6105_v11, 0.0  ;;  %v4004_v11 = vld [vmem:[#allocation9 + $0x40] sm:$0xff] }
 0x163   :  { %9599 = vst [vmem:[#allocation36_spill] sm:$0xff] %v6110_v14  ;;  %9600 = vst [vmem:[#allocation37_spill] sm:$0xff] %v6113_v16  ;;  %v6115_v18 = vpop.f32.mrb[14].mxu1  ;;  %v6121_v20 = vpop.f32.mrb[14].mxu0 }
 0x164   :  { %9601 = vst [vmem:[#allocation38_spill] sm:$0xff] %v6115_v18  ;;  %2144 = vrot.lane.b32.xlu0 %v9229_v12, %s5765_s3  ;;  %9602 = vst [vmem:[#allocation39_spill] sm:$0xff] %v6121_v20  ;;  %v6123_v22 = vpop.f32.mrb[15].mxu1  ;;  %v6128_v24 = vpop.f32.mrb[15].mxu0  ;;  %v9256_v9 = vmax.f32 %v6115_v18, 0.0 }
 0x165   :  { %9603 = vst [vmem:[#allocation40_spill] sm:$0xff] %v6123_v22  ;;  %2112 = vrot.lane.b32.xlu1 %v9230_v15, %s5765_s3  ;;  %9604 = vst [vmem:[#allocation41_spill] sm:$0xff] %v6128_v24  ;;  %v9261_v53 = vmax.f32 %v6123_v22, 0.0  ;;  %v4017_v22 = vld [vmem:[#allocation9 + $0xa8] sm:$0xff] }
 0x166   :  { %v5347_v52 = vpack.c.bf16 %v4017_v22, %v4016_v2  ;;  %v9277_v2 = vmax.f32 %v6128_v24, 0.0 }
 0x168   :  { %2170 = vrot.lane.b32.xlu0 %v9238_v19, %s5765_s3 }
 0x169   :  { %2138 = vrot.lane.b32.xlu1 %v9242_v25, %s5765_s3  ;;  %v6137_v26 = vpop.f32.mrb[16].mxu1  ;;  %v6140_v29 = vpop.f32.mrb[16].mxu0  ;;  %v4012_v25 = vld [vmem:[#allocation9 + $0x80] sm:$0xff] }
 0x16a   :  { %9605 = vst [vmem:[#allocation42_spill] sm:$0xff] %v6137_v26  ;;  %9606 = vst [vmem:[#allocation43_spill] sm:$0xff] %v6140_v29  ;;  %v6142_v30 = vpop.f32.mrb[17].mxu1  ;;  %v6145_v32 = vpop.f32.mrb[17].mxu0  ;;  %v5339_v56 = vpack.c.bf16 %v4013_v63, %v4012_v25  ;;  %v9265_v63 = vmax.f32 %v6110_v14, 0.0  ;;  %v4019_v14 = vld [vmem:[#allocation9 + $0xb8] sm:$0xff] }
 0x16b   :  { %9607 = vst [vmem:[#allocation44_spill] sm:$0xff] %v6142_v30  ;;  %9608 = vst [vmem:[#allocation45_spill] sm:$0xff] %v6145_v32  ;;  %v1265_v33 = vpop.f32.mrb[18].mxu1  ;;  %v1184_v34 = vpop.f32.mrb[18].mxu0 }
 0x16c   :  { %2172 = vrot.lane.b32.xlu0 %v9237_v27, %s5765_s3  ;;  %v1266_v35 = vpop.f32.mrb[19].mxu1  ;;  %v1185_v37 = vpop.f32.mrb[19].mxu0  ;;  %v9239_v34 = vmax.f32 %v6108_v13, 0.0  ;;  %5340 = vmatprep.subr.bf16.mxu0 %v5339_v56 }
 0x16d   :  { %2140 = vrot.lane.b32.xlu1 %v9241_v31, %s5765_s3 }
 0x170   :  { %2206 = vrot.lane.b32.xlu0 %v9234_v38, %s5765_s3 }
 0x171   :  { %2174 = vrot.lane.b32.xlu1 %v9236_v40, %s5765_s3 }
 0x172   :  { %v6162_v42 = vpop.f32.mrb[20].mxu0  ;;  %v6167_v33 = vpop.f32.mrb[20].mxu1 }
 0x173   :  { %9609 = vst [vmem:[#allocation46_spill] sm:$0xff] %v6162_v42  ;;  %v6165_v45 = vpop.f32.mrb[21].mxu0  ;;  %9611 = vst [vmem:[#allocation48_spill] sm:$0xff] %v6167_v33  ;;  %v6175_v37 = vpop.f32.mrb[21].mxu1 }
 0x174   :  { %9610 = vst [vmem:[#allocation47_spill] sm:$0xff] %v6165_v45  ;;  %2208 = vrot.lane.b32.xlu0 %v9233_v41, %s5765_s3  ;;  %v6173_v35 = vpop.f32.mrb[22].mxu0  ;;  %9613 = vst [vmem:[#allocation50_spill] sm:$0xff] %v6175_v37  ;;  %v6182_v15 = vpop.f32.mrb[22].mxu1  ;;  %v9247_v41 = vmax.f32 %v6113_v16, 0.0  ;;  %v9287_v61 = vmax.f32 %v6165_v45, 0.0 }
 0x175   :  { %9612 = vst [vmem:[#allocation49_spill] sm:$0xff] %v6173_v35  ;;  %2176 = vrot.lane.b32.xlu1 %v9235_v43, %s5765_s3  ;;  %v6180_v12 = vpop.f32.mrb[23].mxu0  ;;  %9615 = vst [vmem:[#allocation52_spill] sm:$0xff] %v6182_v15  ;;  %v6184_v47 = vpop.f32.mrb[23].mxu1  ;;  %v9251_v43 = vmax.f32 %v6095_v8, 0.0  ;;  %v4005_v8 = vld [vmem:[#allocation9 + $0x48] sm:$0xff] }
 0x176   :  { %9614 = vst [vmem:[#allocation51_spill] sm:$0xff] %v6180_v12  ;;  %9616 = vst [vmem:[#allocation53_spill] sm:$0xff] %v6184_v47  ;;  %v5357_v24 = vpack.c.bf16 %v4005_v8, %v4004_v11  ;;  %v9646_v8 = vmax.f32 %v6167_v33, 0.0  ;;  %v4009_v33 = vld [vmem:[#allocation9 + $0x68] sm:$0xff] }
 0x178   :  { %2234 = vrot.lane.b32.xlu0 %v9239_v34, %s5765_s3 }
 0x179   :  { %2202 = vrot.lane.b32.xlu1 %v9240_v3, %s5765_s3 }
 0x17a   :  { %v6194_v38 = vpop.f32.mrb[24].mxu0  ;;  %v6199_v27 = vpop.f32.mrb[24].mxu1 }
 0x17b   :  { %9617 = vst [vmem:[#allocation54_spill] sm:$0xff] %v6194_v38  ;;  %v6197_v40 = vpop.f32.mrb[25].mxu0  ;;  %9619 = vst [vmem:[#allocation56_spill] sm:$0xff] %v6199_v27  ;;  %v6206_v34 = vpop.f32.mrb[25].mxu1 }
 0x17c   :  { %9618 = vst [vmem:[#allocation55_spill] sm:$0xff] %v6197_v40  ;;  %2236 = vrot.lane.b32.xlu0 %v9247_v41, %s5765_s3  ;;  %v6204_v19 = vpop.f32.mrb[26].mxu0  ;;  %9621 = vst [vmem:[#allocation58_spill] sm:$0xff] %v6206_v34  ;;  %v6213_v31 = vpop.f32.mrb[26].mxu1  ;;  %v3997_v41 = vld [vmem:[#allocation9 + $0x8] sm:$0xff] }
 0x17d   :  { %9620 = vst [vmem:[#allocation57_spill] sm:$0xff] %v6204_v19  ;;  %2204 = vrot.lane.b32.xlu1 %v9251_v43, %s5765_s3  ;;  %v6211_v3 = vpop.f32.mrb[27].mxu0  ;;  %9623 = vst [vmem:[#allocation60_spill] sm:$0xff] %v6213_v31  ;;  %v6216_v10 = vpop.f32.mrb[27].mxu1  ;;  %v5341_v17 = vpack.c.bf16 %v3997_v41, %v3996_v48  ;;  %v4014_v43 = vld [vmem:[#allocation9 + $0x90] sm:$0xff] }
 0x17e   :  { %9622 = vst [vmem:[#allocation59_spill] sm:$0xff] %v6211_v3  ;;  %9624 = vst [vmem:[#allocation61_spill] sm:$0xff] %v6216_v10  ;;  %v5343_v7 = vpack.c.bf16 %v4015_v60, %v4014_v43  ;;  %v3998_v41 = vld [vmem:[#allocation9 + $0x10] sm:$0xff]  ;;  %v9326_v0 = vmax.f32 %v6216_v10, 0.0 }
 0x17f   :  { %5342 = vmatpush3.bf16.msra.mxu0 %v5341_v17 }
 0x180   :  { %2270 = vrot.lane.b32.xlu0 %v9256_v9, %s5765_s3  ;;  %v3999_v9 = vld [vmem:[#allocation9 + $0x18] sm:$0xff]  ;;  %5344 = vmatprep.subr.bf16.mxu0 %v5343_v7  ;;  %v9633_v7 = vmax.f32 %v6140_v29, 0.0 }
 0x181   :  { %2238 = vrot.lane.b32.xlu1 %v9258_v50, %s5765_s3  ;;  %v5345_v17 = vpack.c.bf16 %v3999_v9, %v3998_v41  ;;  %v5349_v9 = vpack.c.bf16 %v4001_v36, %v4000_v44  ;;  %v9272_v41 = vmax.f32 %v6145_v32, 0.0  ;;  %v4002_v44 = vld [vmem:[#allocation9 + $0x30] sm:$0xff]  ;;  %v4020_v36 = vld [vmem:[#allocation9 + $0xc0] sm:$0xff]  ;;  %v4021_v32 = vld [vmem:[#allocation9 + $0xc8] sm:$0xff] }
 0x182   :  { %v6226_v23 = vpop.f32.mrb[28].mxu0  ;;  %v6231_v25 = vpop.f32.mrb[28].mxu1  ;;  %v5355_v16 = vpack.c.bf16 %v4021_v32, %v4020_v36  ;;  %v9286_v32 = vmax.f32 %v6142_v30, 0.0 }
 0x183   :  { %9625 = vst [vmem:[#allocation62_spill] sm:$0xff] %v6226_v23  ;;  %v6229_v48 = vpop.f32.mrb[29].mxu0  ;;  %9627 = vst [vmem:[#allocation64_spill] sm:$0xff] %v6231_v25  ;;  %v6239_v50 = vpop.f32.mrb[29].mxu1  ;;  %5346 = vmatpush3.bf16.msra.mxu0 %v5345_v17 }
 0x184   :  { %9626 = vst [vmem:[#allocation63_spill] sm:$0xff] %v6229_v48  ;;  %2272 = vrot.lane.b32.xlu0 %v9261_v53, %s5765_s3  ;;  %v6237_v56 = vpop.f32.mrb[30].mxu0  ;;  %9629 = vst [vmem:[#allocation66_spill] sm:$0xff] %v6239_v50  ;;  %v6246_v43 = vpop.f32.mrb[30].mxu1  ;;  %v9268_v53 = vmax.f32 %v6121_v20, 0.0  ;;  %5348 = vmatprep.subr.bf16.mxu0 %v5347_v52 }
 0x185   :  { %9628 = vst [vmem:[#allocation65_spill] sm:$0xff] %v6237_v56  ;;  %2240 = vrot.lane.b32.xlu1 %v9265_v63, %s5765_s3  ;;  %v6244_v60 = vpop.f32.mrb[31].mxu0  ;;  %9631 = vst [vmem:[#allocation68_spill] sm:$0xff] %v6246_v43  ;;  %v6248_v58 = vpop.f32.mrb[31].mxu1  ;;  %v4018_v63 = vld [vmem:[#allocation9 + $0xb0] sm:$0xff] }
 0x186   :  { %9630 = vst [vmem:[#allocation67_spill] sm:$0xff] %v6244_v60  ;;  %9632 = vst [vmem:[#allocation69_spill] sm:$0xff] %v6248_v58 }
 0x187   :  { %5350 = vmatpush3.bf16.msra.mxu0 %v5349_v9  ;;  %v4003_v9 = vld [vmem:[#allocation9 + $0x38] sm:$0xff] }
 0x188   :  { %2298 = vrot.lane.b32.xlu0 %v9633_v7, %s5765_s3  ;;  %v5351_v7 = vpack.c.bf16 %v4019_v14, %v4018_v63  ;;  %v5353_v14 = vpack.c.bf16 %v4003_v9, %v4002_v44  ;;  %v4022_v44 = vld [vmem:[#allocation9 + $0xd0] sm:$0xff]  ;;  %v4023_v9 = vld [vmem:[#allocation9 + $0xd8] sm:$0xff] }
 0x189   :  { %2266 = vrot.lane.b32.xlu1 %v9268_v53, %s5765_s3  ;;  %v5359_v13 = vpack.c.bf16 %v4023_v9, %v4022_v44  ;;  %v4024_v9 = vld [vmem:[#allocation9 + $0xe0] sm:$0xff] }
 0x18a   :  { %v6258_v17 = vpop.f32.mrb[32].mxu0  ;;  %v6263_v18 = vpop.f32.mrb[32].mxu1  ;;  %5352 = vmatprep.subr.bf16.mxu0 %v5351_v7 }
 0x18b   :  { %9634 = vst [vmem:[#allocation70_spill] sm:$0xff] %v6258_v17  ;;  %v6261_v22 = vpop.f32.mrb[33].mxu0  ;;  %9636 = vst [vmem:[#allocation72_spill] sm:$0xff] %v6263_v18  ;;  %v6271_v53 = vpop.f32.mrb[33].mxu1  ;;  %5354 = vmatpush3.bf16.msra.mxu0 %v5353_v14  ;;  %v9682_v55 = vmax.f32 %v6258_v17, 0.0 }
 0x18c   :  { %9635 = vst [vmem:[#allocation71_spill] sm:$0xff] %v6261_v22  ;;  %2300 = vrot.lane.b32.xlu0 %v9272_v41, %s5765_s3  ;;  %v6269_v52 = vpop.f32.mrb[34].mxu0  ;;  %9638 = vst [vmem:[#allocation74_spill] sm:$0xff] %v6271_v53  ;;  %v6278_v29 = vpop.f32.mrb[34].mxu1  ;;  %v9280_v41 = vmax.f32 %v6137_v26, 0.0  ;;  %5356 = vmatprep.subr.bf16.mxu0 %v5355_v16 }
 0x18d   :  { %9637 = vst [vmem:[#allocation73_spill] sm:$0xff] %v6269_v52  ;;  %2268 = vrot.lane.b32.xlu1 %v9277_v2, %s5765_s3  ;;  %v6276_v20 = vpop.f32.mrb[35].mxu0  ;;  %9640 = vst [vmem:[#allocation76_spill] sm:$0xff] %v6278_v29  ;;  %v6280_v63 = vpop.f32.mrb[35].mxu1  ;;  %v9642_v2 = vmax.f32 %v6162_v42, 0.0  ;;  %v4006_v42 = vld [vmem:[#allocation9 + $0x50] sm:$0xff] }
 0x18e   :  { %9639 = vst [vmem:[#allocation75_spill] sm:$0xff] %v6276_v20  ;;  %9641 = vst [vmem:[#allocation77_spill] sm:$0xff] %v6280_v63 }
 0x18f   :  { %5358 = vmatpush3.bf16.msra.mxu0 %v5357_v24  ;;  %v9289_v24 = vmax.f32 %v6173_v35, 0.0 }
 0x190   :  { %2050 = vrot.lane.b32.xlu0 %v9642_v2, %s5765_s3  ;;  %v4007_v2 = vld [vmem:[#allocation9 + $0x58] sm:$0xff]  ;;  %5360 = vmatprep.subr.bf16.mxu0 %v5359_v13  ;;  %v4026_v13 = vld [vmem:[#allocation9 + $0xf0] sm:$0xff] }
 0x191   :  { %2302 = vrot.lane.b32.xlu1 %v9280_v41, %s5765_s3  ;;  %v5361_v41 = vpack.c.bf16 %v4007_v2, %v4006_v42  ;;  %v9290_v2 = vmax.f32 %v6175_v37, 0.0 }
 0x192   :  { %v6290_v7 = vpop.f32.mrb[36].mxu0  ;;  %v6295_v14 = vpop.f32.mrb[36].mxu1 }
 0x193   :  { %9643 = vst [vmem:[#allocation78_spill] sm:$0xff] %v6290_v7  ;;  %v6293_v36 = vpop.f32.mrb[37].mxu0  ;;  %9645 = vst [vmem:[#allocation80_spill] sm:$0xff] %v6295_v14  ;;  %v6300_v16 = vpop.f32.mrb[37].mxu1  ;;  %5362 = vmatpush3.bf16.msra.mxu0 %v5361_v41 }
 0x194   :  { %9644 = vst [vmem:[#allocation79_spill] sm:$0xff] %v6293_v36  ;;  %2054 = vrot.lane.b32.xlu0 %v9646_v8, %s5765_s3  ;;  %v1346_v11 = vpop.f32.mrb[38].mxu0  ;;  %9647 = vst [vmem:[#allocation81_spill] sm:$0xff] %v6300_v16  ;;  %v1427_v6 = vpop.f32.mrb[38].mxu1  ;;  %v5363_v8 = vpack.c.bf16 %v4025_v5, %v4024_v9  ;;  %v9295_v9 = vmax.f32 %v6199_v27, 0.0 }
 0x195   :  { %2304 = vrot.lane.b32.xlu1 %v9286_v32, %s5765_s3  ;;  %v1347_v26 = vpop.f32.mrb[39].mxu0  ;;  %v1428_v44 = vpop.f32.mrb[39].mxu1  ;;  %v4008_v11 = vld [vmem:[#allocation9 + $0x60] sm:$0xff]  ;;  %v9288_v6 = vmax.f32 %v6182_v15, 0.0  ;;  %v9308_v15 = vmax.f32 %v6226_v23, 0.0 }
 0x196   :  { %v5365_v42 = vpack.c.bf16 %v4009_v33, %v4008_v11  ;;  %5364 = vmatprep.subr.bf16.mxu0 %v5363_v8  ;;  %v4027_v26 = vld [vmem:[#allocation9 + $0xf8] sm:$0xff]  ;;  %v4010_v44 = vld [vmem:[#allocation9 + $0x70] sm:$0xff] }
 0x197   :  { %v5367_v5 = vpack.c.bf16 %v4027_v26, %v4026_v13  ;;  %v4011_v11 = vld [vmem:[#allocation9 + $0x78] sm:$0xff] }
 0x198   :  { %2082 = vrot.lane.b32.xlu0 %v9289_v24, %s5765_s3  ;;  %5366 = vmatpush3.bf16.msra.mxu0 %v5365_v42  ;;  %v5369_v13 = vpack.c.bf16 %v4011_v11, %v4010_v44 }
 0x199   :  { %2052 = vrot.lane.b32.xlu1 %v9287_v61, %s5765_s3  ;;  %5368 = vmatprep.subr.bf16.mxu0 %v5367_v5  ;;  %v9298_v5 = vmax.f32 %v6184_v47, 0.0 }
 0x19b   :  { %v6315_v41 = vpop.f32.mrb[40].mxu0  ;;  %v6323_v8 = vpop.f32.mrb[40].mxu1 }
 0x19c   :  { %9648 = vst [vmem:[#allocation82_spill] sm:$0xff] %v6315_v41  ;;  %2086 = vrot.lane.b32.xlu0 %v9288_v6, %s5765_s3  ;;  %v6321_v33 = vpop.f32.mrb[41].mxu0  ;;  %9650 = vst [vmem:[#allocation84_spill] sm:$0xff] %v6323_v8  ;;  %v6330_v42 = vpop.f32.mrb[41].mxu1  ;;  %v9292_v6 = vmax.f32 %v6180_v12, 0.0  ;;  %5370 = vmatpush3.bf16.msra.mxu0 %v5369_v13  ;;  %v9315_v12 = vmax.f32 %v6204_v19, 0.0 }
 0x19d   :  { %9649 = vst [vmem:[#allocation83_spill] sm:$0xff] %v6321_v33  ;;  %2056 = vrot.lane.b32.xlu1 %v9290_v2, %s5765_s3  ;;  %v6328_v32 = vpop.f32.mrb[42].mxu0  ;;  %9652 = vst [vmem:[#allocation86_spill] sm:$0xff] %v6330_v42  ;;  %v6334_v61 = vpop.f32.mrb[42].mxu1  ;;  %v9656_v2 = vmax.f32 %v6194_v38, 0.0 }
 0x19e   :  { %9651 = vst [vmem:[#allocation85_spill] sm:$0xff] %v6328_v32  ;;  %v6332_v26 = vpop.f32.mrb[43].mxu0  ;;  %9654 = vst [vmem:[#allocation88_spill] sm:$0xff] %v6334_v61  ;;  %v6337_v24 = vpop.f32.mrb[43].mxu1 }
 0x19f   :  { %9653 = vst [vmem:[#allocation87_spill] sm:$0xff] %v6332_v26  ;;  %9655 = vst [vmem:[#allocation89_spill] sm:$0xff] %v6337_v24 }
 0x1a0   :  { %2114 = vrot.lane.b32.xlu0 %v9656_v2, %s5765_s3 }
 0x1a1   :  { %2084 = vrot.lane.b32.xlu1 %v9292_v6, %s5765_s3  ;;  %v9303_v6 = vmax.f32 %v6213_v31, 0.0 }
 0x1a3   :  { %v6347_v44 = vpop.f32.mrb[44].mxu0  ;;  %v6354_v13 = vpop.f32.mrb[44].mxu1 }
 0x1a4   :  { %9657 = vst [vmem:[#allocation90_spill] sm:$0xff] %v6347_v44  ;;  %2118 = vrot.lane.b32.xlu0 %v9295_v9, %s5765_s3  ;;  %v6352_v11 = vpop.f32.mrb[45].mxu0  ;;  %9659 = vst [vmem:[#allocation92_spill] sm:$0xff] %v6354_v13  ;;  %v6361_v37 = vpop.f32.mrb[45].mxu1  ;;  %v9304_v9 = vmax.f32 %v6197_v40, 0.0 }
 0x1a5   :  { %9658 = vst [vmem:[#allocation91_spill] sm:$0xff] %v6352_v11  ;;  %2088 = vrot.lane.b32.xlu1 %v9298_v5, %s5765_s3  ;;  %v6359_v2 = vpop.f32.mrb[46].mxu0  ;;  %9661 = vst [vmem:[#allocation94_spill] sm:$0xff] %v6361_v37  ;;  %v6366_v38 = vpop.f32.mrb[46].mxu1  ;;  %v9309_v5 = vmax.f32 %v6206_v34, 0.0  ;;  %v9321_v34 = vmax.f32 %v6211_v3, 0.0 }
 0x1a6   :  { %9660 = vst [vmem:[#allocation93_spill] sm:$0xff] %v6359_v2  ;;  %v6364_v30 = vpop.f32.mrb[47].mxu0  ;;  %9663 = vst [vmem:[#allocation96_spill] sm:$0xff] %v6366_v38  ;;  %v6369_v27 = vpop.f32.mrb[47].mxu1  ;;  %v9706_v11 = vmax.f32 %v6323_v8, 0.0 }
 0x1a7   :  { %9662 = vst [vmem:[#allocation95_spill] sm:$0xff] %v6364_v30  ;;  %9664 = vst [vmem:[#allocation97_spill] sm:$0xff] %v6369_v27 }
 0x1a8   :  { %2150 = vrot.lane.b32.xlu0 %v9303_v6, %s5765_s3 }
 0x1a9   :  { %2116 = vrot.lane.b32.xlu1 %v9304_v9, %s5765_s3 }
 0x1ab   :  { %v6379_v47 = vpop.f32.mrb[48].mxu0  ;;  %v6387_v35 = vpop.f32.mrb[48].mxu1 }
 0x1ac   :  { %9665 = vst [vmem:[#allocation98_spill] sm:$0xff] %v6379_v47  ;;  %2178 = vrot.lane.b32.xlu0 %v9308_v15, %s5765_s3  ;;  %v6385_v45 = vpop.f32.mrb[49].mxu0  ;;  %9667 = vst [vmem:[#allocation100_spill] sm:$0xff] %v6387_v35  ;;  %v6394_v9 = vpop.f32.mrb[49].mxu1  ;;  %v9673_v15 = vmax.f32 %v6231_v25, 0.0  ;;  %v4035_v35 = vld [vmem:[#allocation9 + $0x138] sm:$0xff] }
 0x1ad   :  { %9666 = vst [vmem:[#allocation99_spill] sm:$0xff] %v6385_v45  ;;  %2120 = vrot.lane.b32.xlu1 %v9309_v5, %s5765_s3  ;;  %v6392_v6 = vpop.f32.mrb[50].mxu0  ;;  %9669 = vst [vmem:[#allocation102_spill] sm:$0xff] %v6394_v9  ;;  %v6398_v40 = vpop.f32.mrb[50].mxu1  ;;  %v9319_v5 = vmax.f32 %v6246_v43, 0.0  ;;  %v4029_v45 = vld [vmem:[#allocation9 + $0x108] sm:$0xff] }
 0x1ae   :  { %9668 = vst [vmem:[#allocation101_spill] sm:$0xff] %v6392_v6  ;;  %v6396_v31 = vpop.f32.mrb[51].mxu0  ;;  %9671 = vst [vmem:[#allocation104_spill] sm:$0xff] %v6398_v40  ;;  %v6401_v23 = vpop.f32.mrb[51].mxu1  ;;  %v4047_v9 = vld [vmem:[#allocation9 + $0x198] sm:$0xff] }
 0x1af   :  { %9670 = vst [vmem:[#allocation103_spill] sm:$0xff] %v6396_v31  ;;  %9672 = vst [vmem:[#allocation105_spill] sm:$0xff] %v6401_v23  ;;  %v9747_v40 = vld [vmem:[#allocation19_spill] sm:$0xff] }
 0x1b0   :  { %2182 = vrot.lane.b32.xlu0 %v9673_v15, %s5765_s3 }
 0x1b1   :  { %2146 = vrot.lane.b32.xlu1 %v9315_v12, %s5765_s3 }
 0x1b3   :  { %v6411_v4 = vpop.f32.mrb[52].mxu0  ;;  %v6419_v25 = vpop.f32.mrb[52].mxu1 }
 0x1b4   :  { %9674 = vst [vmem:[#allocation106_spill] sm:$0xff] %v6411_v4  ;;  %2214 = vrot.lane.b32.xlu0 %v9319_v5, %s5765_s3  ;;  %v6417_v59 = vpop.f32.mrb[53].mxu0  ;;  %9676 = vst [vmem:[#allocation108_spill] sm:$0xff] %v6419_v25  ;;  %v6426_v12 = vpop.f32.mrb[53].mxu1  ;;  %v9331_v5 = vmax.f32 %v6263_v18, 0.0 }
 0x1b5   :  { %9675 = vst [vmem:[#allocation107_spill] sm:$0xff] %v6417_v59  ;;  %2148 = vrot.lane.b32.xlu1 %v9321_v34, %s5765_s3  ;;  %v6424_v15 = vpop.f32.mrb[54].mxu0  ;;  %9678 = vst [vmem:[#allocation110_spill] sm:$0xff] %v6426_v12  ;;  %v6430_v57 = vpop.f32.mrb[54].mxu1  ;;  %v9333_v34 = vmax.f32 %v6229_v48, 0.0  ;;  %v9736_v12 = vld [vmem:[#allocation21_spill] sm:$0xff] }
 0x1b6   :  { %9677 = vst [vmem:[#allocation109_spill] sm:$0xff] %v6424_v15  ;;  %v6428_v19 = vpop.f32.mrb[55].mxu0  ;;  %9680 = vst [vmem:[#allocation112_spill] sm:$0xff] %v6430_v57  ;;  %v6433_v43 = vpop.f32.mrb[55].mxu1 }
 0x1b7   :  { %9679 = vst [vmem:[#allocation111_spill] sm:$0xff] %v6428_v19  ;;  %9681 = vst [vmem:[#allocation113_spill] sm:$0xff] %v6433_v43  ;;  %v4076_v43 = vld [vmem:[#allocation9 + $0x280] sm:$0xff] }
 0x1b8   :  { %2242 = vrot.lane.b32.xlu0 %v9682_v55, %s5765_s3 }
 0x1b9   :  { %2152 = vrot.lane.b32.xlu1 %v9326_v0, %s5765_s3  ;;  %v9337_v0 = vmax.f32 %v6278_v29, 0.0 }
 0x1bb   :  { %v6443_v3 = vpop.f32.mrb[56].mxu0  ;;  %v6450_v54 = vpop.f32.mrb[56].mxu1 }
 0x1bc   :  { %9683 = vst [vmem:[#allocation114_spill] sm:$0xff] %v6443_v3  ;;  %2246 = vrot.lane.b32.xlu0 %v9331_v5, %s5765_s3  ;;  %v6448_v49 = vpop.f32.mrb[57].mxu0  ;;  %9685 = vst [vmem:[#allocation116_spill] sm:$0xff] %v6450_v54  ;;  %v6455_v17 = vpop.f32.mrb[57].mxu1  ;;  %v9336_v3 = vmax.f32 %v6239_v50, 0.0 }
 0x1bd   :  { %9684 = vst [vmem:[#allocation115_spill] sm:$0xff] %v6448_v49  ;;  %2180 = vrot.lane.b32.xlu1 %v9333_v34, %s5765_s3  ;;  %v1508_v55 = vpop.f32.mrb[58].mxu0  ;;  %9686 = vst [vmem:[#allocation117_spill] sm:$0xff] %v6455_v17  ;;  %v1589_v5 = vpop.f32.mrb[58].mxu1  ;;  %v9341_v49 = vmax.f32 %v6290_v7, 0.0  ;;  %v4045_v7 = vld [vmem:[#allocation9 + $0x188] sm:$0xff] }
 0x1be   :  { %v6458_v10 = vpop.permute.xlu0 %2046  ;;  %v1509_v1 = vpop.f32.mrb[59].mxu0 }
 0x1bf   :  { %v6461_v18 = vpop.permute.xlu1 %2048  ;;  %v1590_v34 = vpop.f32.mrb[59].mxu1  ;;  %v9343_v1 = vmax.f32 %v6237_v56, 0.0 }
 0x1c0   :  { %9687 = vst [vmem:[#allocation118_spill] sm:$0xff] %v6461_v18  ;;  %2278 = vrot.lane.b32.xlu0 %v9337_v0, %s5765_s3  ;;  %v2333_v24 = vsel %vm2330_vm2, %v6458_v10, %v6461_v18  ;;  %v9711_v18 = vmax.f32 %v6009_v39, 0.0  ;;  %v9716_v39 = vmax.f32 %v6012_v28, 0.0  ;;  %v9721_v28 = vmax.f32 %v6017_v62, 0.0  ;;  %v4048_v62 = vld [vmem:[#allocation9 + $0x1a0] sm:$0xff] }
 0x1c1   :  { %2184 = vrot.lane.b32.xlu1 %v9336_v3, %s5765_s3 }
 0x1c2   :  { %v6470_v55 = vpop.permute.xlu0 %2042 }
 0x1c3   :  { %v6473_v48 = vpop.permute.xlu1 %2078 }
 0x1c4   :  { %2306 = vrot.lane.b32.xlu0 %v9341_v49, %s5765_s3  ;;  %v6479_v5 = vpop.f32.mrb[60].mxu0  ;;  %v6486_v3 = vpop.f32.mrb[60].mxu1  ;;  %v9695_v49 = vmax.f32 %v6244_v60, 0.0  ;;  %v4028_v60 = vld [vmem:[#allocation9 + $0x100] sm:$0xff] }
 0x1c5   :  { %9688 = vst [vmem:[#allocation119_spill] sm:$0xff] %v6479_v5  ;;  %2210 = vrot.lane.b32.xlu1 %v9343_v1, %s5765_s3  ;;  %v6484_v34 = vpop.f32.mrb[61].mxu0  ;;  %9690 = vst [vmem:[#allocation121_spill] sm:$0xff] %v6486_v3  ;;  %v9693_v1 = vmax.f32 %v6295_v14, 0.0  ;;  %v6500_v56 = vpop.f32.mrb[61].mxu1  ;;  %v5373_v31 = vpack.c.bf16 %v4029_v45, %v4028_v60  ;;  %v9748_v5 = vmax.f32 %v9747_v40, 0.0 }
 0x1c6   :  { %9689 = vst [vmem:[#allocation120_spill] sm:$0xff] %v6484_v34  ;;  %v6488_v0 = vpop.permute.xlu0 %2044  ;;  %v6490_v50 = vpop.f32.mrb[62].mxu0  ;;  %9694 = vst [vmem:[#allocation124_spill] sm:$0xff] %v6500_v56  ;;  %v9700_v34 = vmax.f32 %v6248_v58, 0.0  ;;  %v3459_v40 = vld [vmem:[#allocation8] sm:$0xff] }
 0x1c7   :  { %9691 = vst [vmem:[#allocation122_spill] sm:$0xff] %v6490_v50  ;;  %v2075_v29 = vpop.permute.xlu1 %2074  ;;  %v6493_v54 = vpop.f32.mrb[63].mxu0 }
 0x1c8   :  { %9692 = vst [vmem:[#allocation123_spill] sm:$0xff] %v6493_v54  ;;  %2310 = vrot.lane.b32.xlu0 %v9693_v1, %s5765_s3  ;;  %v6509_v54 = vpop.f32.mrb[62].mxu1  ;;  %v9698_v1 = vmax.f32 %v6315_v41, 0.0 }
 0x1c9   :  { %2212 = vrot.lane.b32.xlu1 %v9695_v49, %s5765_s3  ;;  %9696 = vst [vmem:[#allocation125_spill] sm:$0xff] %v6509_v54  ;;  %v6515_v50 = vpop.f32.mrb[63].mxu1  ;;  %v4044_v49 = vld [vmem:[#allocation9 + $0x180] sm:$0xff] }
 0x1ca   :  { %v2107_v56 = vpop.permute.xlu0 %2106  ;;  %9697 = vst [vmem:[#allocation126_spill] sm:$0xff] %v6515_v50 }
 0x1cb   :  { %v2077_v54 = vpop.permute.xlu1 %2076 }
 0x1cc   :  { %2058 = vrot.lane.b32.xlu0 %v9698_v1, %s5765_s3  ;;  %v6528_v17 = vpop.f32.mrb[64].mxu0  ;;  %v6539_v3 = vpop.f32.mrb[64].mxu1  ;;  %v5371_v1 = vpack.c.bf16 %v4045_v7, %v4044_v49  ;;  %v2346_v37 = vsel %vm2330_vm2, %v2075_v29, %v2077_v54  ;;  %v2331_v7 = vsel %vm2330_vm2, %v6470_v55, %v6488_v0  ;;  %v6594_v29 = vmax.f32 %v9711_v18, %v2333_v24  ;;  %v9741_v4 = vld [vmem:[#allocation121_spill] sm:$0xff] }
 0x1cd   :  { %9699 = vst [vmem:[#allocation127_spill] sm:$0xff] %v6528_v17  ;;  %2216 = vrot.lane.b32.xlu1 %v9700_v34, %s5765_s3  ;;  %v6537_v41 = vpop.f32.mrb[65].mxu0  ;;  %9702 = vst [vmem:[#allocation129_spill] sm:$0xff] %v6539_v3  ;;  %v6562_v42 = vpop.f32.mrb[65].mxu1  ;;  %v9708_v34 = vmax.f32 %v6261_v22, 0.0  ;;  %v6612_v18 = vmax.f32 %v9716_v39, %v2331_v7  ;;  %v4031_v22 = vld [vmem:[#allocation9 + $0x118] sm:$0xff] }
 0x1ce   :  { %9701 = vst [vmem:[#allocation128_spill] sm:$0xff] %v6537_v41  ;;  %v6541_v14 = vpop.permute.xlu0 %2108  ;;  %v6546_v58 = vpop.f32.mrb[66].mxu0  ;;  %9707 = vst [vmem:[#allocation133_spill] sm:$0xff] %v6562_v42  ;;  %5372 = vmatprep.subr.bf16.mxu1 %v5371_v1  ;;  %v9713_v1 = vmax.f32 %v6032_v46, 0.0  ;;  %v9718_v46 = vmax.f32 %v6271_v53, 0.0 }
 0x1cf   :  { %9703 = vst [vmem:[#allocation130_spill] sm:$0xff] %v6546_v58  ;;  %v6548_v30 = vpop.permute.xlu1 %2080  ;;  %v6554_v26 = vpop.f32.mrb[67].mxu0  ;;  %v2361_v49 = vsel %vm2330_vm2, %v2107_v56, %v6541_v14  ;;  %v4046_v56 = vld [vmem:[#allocation9 + $0x190] sm:$0xff]  ;;  %5374 = vmatpush3.bf16.msra.mxu1 %v5373_v31  ;;  %v2899_v55 = vrot.slane %v6612_v18, 1 }
 0x1d0   :  { %9704 = vst [vmem:[#allocation131_spill] sm:$0xff] %v6548_v30  ;;  %9705 = vst [vmem:[#allocation132_spill] sm:$0xff] %v6554_v26  ;;  %2062 = vrot.lane.b32.xlu0 %v9706_v11, %s5765_s3  ;;  %v2347_v11 = vsel %vm2330_vm2, %v2077_v54, %v6473_v48  ;;  %v6574_v33 = vpop.f32.mrb[66].mxu1  ;;  %v9712_v54 = vmax.f32 %v6025_v21, 0.0  ;;  %v9717_v21 = vmax.f32 %v6044_v51, 0.0  ;;  %v2348_v51 = vsel %vm2330_vm2, %v6473_v48, %v6548_v30  ;;  %v4030_v48 = vld [vmem:[#allocation9 + $0x110] sm:$0xff] }
 0x1d1   :  { %2244 = vrot.lane.b32.xlu1 %v9708_v34, %s5765_s3  ;;  %9709 = vst [vmem:[#allocation134_spill] sm:$0xff] %v6574_v33  ;;  %v6585_v23 = vpop.f32.mrb[67].mxu1  ;;  %v2332_v34 = vsel %vm2330_vm2, %v6488_v0, %v6458_v10  ;;  %v6602_v25 = vmax.f32 %v9713_v1, %v2347_v11  ;;  %v9714_v0 = vmax.f32 %v6328_v32, 0.0  ;;  %v9732_v10 = vld [vmem:[#allocation17_spill] sm:$0xff]  ;;  %v4032_v32 = vld [vmem:[#allocation9 + $0x120] sm:$0xff] }
 0x1d2   :  { %v6581_v8 = vpop.permute.xlu0 %2142  ;;  %9710 = vst [vmem:[#allocation135_spill] sm:$0xff] %v6585_v23  ;;  %v6598_v59 = vmax.f32 %v9712_v54, %v2346_v37  ;;  %v6616_v37 = vmax.f32 %v9717_v21, %v2361_v49  ;;  %v6629_v7 = vmax.f32 %v9721_v28, %v2332_v34  ;;  %v5375_v21 = vpack.c.bf16 %v4047_v9, %v4046_v56  ;;  %v4049_v28 = vld [vmem:[#allocation9 + $0x1a8] sm:$0xff]  ;;  %v3461_v23 = vld [vmem:[#allocation8 + $0x10] sm:$0xff]  ;;  %v3491_v33 = vld [vmem:[#allocation8 + $0x100] sm:$0xff] }
 0x1d3   :  { %v2111_v27 = vpop.permute.xlu1 %2110  ;;  %v9733_v31 = vmax.f32 %v9732_v10, 0.0  ;;  %v9734_v9 = vmax.f32 %v6269_v52, 0.0  ;;  %v9737_v34 = vmax.f32 %v9736_v12, 0.0  ;;  %v5379_v12 = vpack.c.bf16 %v4049_v28, %v4048_v62 }
 0x1d4   :  { %2090 = vrot.lane.b32.xlu0 %v9714_v0, %s5765_s3  ;;  %v6608_v45 = vpop.f32.mrb[68].mxu0  ;;  %v6625_v54 = vpop.f32.mrb[68].mxu1  ;;  %v2900_v53 = vrot.slane %v6598_v59, 1  ;;  %5376 = vmatprep.subr.bf16.mxu1 %v5375_v21  ;;  %v4077_v21 = vld [vmem:[#allocation9 + $0x288] sm:$0xff]  ;;  %v2902_v19 = vrot.slane %v6629_v7, 1  ;;  %v9746_v62 = vrot.slane %v6616_v37, 1 }
 0x1d5   :  { %9715 = vst [vmem:[#allocation136_spill] sm:$0xff] %v6608_v45  ;;  %2248 = vrot.lane.b32.xlu1 %v9718_v46, %s5765_s3  ;;  %v6623_v11 = vpop.f32.mrb[69].mxu0  ;;  %9720 = vst [vmem:[#allocation138_spill] sm:$0xff] %v6625_v54  ;;  %v2362_v46 = vsel %vm2330_vm2, %v6541_v14, %v2111_v27  ;;  %v9730_v14 = vmax.f32 %v6334_v61, 0.0  ;;  %v6654_v56 = vpop.f32.mrb[69].mxu1  ;;  %v6660_v0 = vmax.f32 %v9733_v31, %v2348_v51  ;;  %v4033_v61 = vld [vmem:[#allocation9 + $0x128] sm:$0xff] }
 0x1d6   :  { %9719 = vst [vmem:[#allocation137_spill] sm:$0xff] %v6623_v11  ;;  %v6634_v49 = vpop.permute.xlu0 %2144  ;;  %v6637_v39 = vpop.f32.mrb[70].mxu0  ;;  %9731 = vst [vmem:[#allocation143_spill] sm:$0xff] %v6654_v56  ;;  %v6671_v1 = vmax.f32 %v9737_v34, %v2362_v46  ;;  %v4050_v46 = vld [vmem:[#allocation9 + $0x1b0] sm:$0xff]  ;;  %v4051_v34 = vld [vmem:[#allocation9 + $0x1b8] sm:$0xff]  ;;  %v2901_v6 = vsel %vm2898_vm3, %v2899_v55, %v2900_v53  ;;  %v5403_v15 = vpack.c.bf16 %v4077_v21, %v4076_v43  ;;  %v9764_v17 = vrot.slane %v6602_v25, 1 }
 0x1d7   :  { %9722 = vst [vmem:[#allocation139_spill] sm:$0xff] %v6634_v49  ;;  %9724 = vst [vmem:[#allocation140_spill] sm:$0xff] %v6637_v39  ;;  %v6641_v24 = vpop.permute.xlu1 %2112  ;;  %v6646_v60 = vpop.f32.mrb[71].mxu0  ;;  %v2948_v28 = vsel %vm2898_vm3, %v2900_v53, %v9746_v62  ;;  %v2378_v53 = vsel %vm2330_vm2, %v6581_v8, %v6634_v49  ;;  %v5383_v62 = vpack.c.bf16 %v4051_v34, %v4050_v46  ;;  %v9756_v46 = vmax.f32 %v6354_v13, 0.0  ;;  %v4052_v55 = vld [vmem:[#allocation9 + $0x1c0] sm:$0xff]  ;;  %v4053_v43 = vld [vmem:[#allocation9 + $0x1c8] sm:$0xff] }
 0x1d8   :  { %9725 = vst [vmem:[#allocation141_spill] sm:$0xff] %v6641_v24  ;;  %9729 = vst [vmem:[#allocation142_spill] sm:$0xff] %v6646_v60  ;;  %2094 = vrot.lane.b32.xlu0 %v9730_v14, %s5765_s3  ;;  %v6666_v14 = vpop.f32.mrb[70].mxu1  ;;  %v2363_v10 = vsel %vm2330_vm2, %v2111_v27, %v6641_v24  ;;  %v9742_v27 = vrot.slane %v6602_v25, 1  ;;  %5404 = vmatprep.subr.bf16.mxu0 %v5403_v15  ;;  %v3331_v15 = vmax.f32 %v6598_v59, %v2948_v28  ;;  %v3475_v13 = vld [vmem:[#allocation8 + $0x80] sm:$0xff]  ;;  %v4058_v54 = vld [vmem:[#allocation9 + $0x1f0] sm:$0xff] }
 0x1d9   :  { %2274 = vrot.lane.b32.xlu1 %v9734_v9, %s5765_s3  ;;  %9735 = vst [vmem:[#allocation17_spill] sm:$0xff] %v6666_v14  ;;  %v6677_v31 = vpop.f32.mrb[71].mxu1  ;;  %v5377_v9 = vpack.c.bf16 %v4031_v22, %v4030_v48  ;;  %v9743_v22 = vmax.f32 %v6347_v44, 0.0  ;;  %v6698_v57 = vmax.f32 %v9748_v5, %v2363_v10  ;;  %v3315_v48 = vmax.f32 %v6612_v18, %v2901_v6  ;;  %v3460_v44 = vld [vmem:[#allocation8 + $0x8] sm:$0xff]  ;;  %v9787_v56 = vld [vmem:[#allocation83_spill] sm:$0xff] }
 0x1da   :  { %v6675_v51 = vpop.permute.xlu0 %2170  ;;  %9738 = vst [vmem:[#allocation21_spill] sm:$0xff] %v6677_v31  ;;  %v2904_v24 = vsel %vm2898_vm3, %v2902_v19, %v9742_v27  ;;  %v9749_v19 = vmax.f32 %v6276_v20, 0.0  ;;  %v9758_v41 = vrot.slane %v6660_v0, 1  ;;  %v9759_v6 = vrot.slane %v6594_v29, 1  ;;  %v9832_v39 = vld [vmem:[#allocation91_spill] sm:$0xff] }
 0x1db   :  { %v2139_v52 = vpop.permute.xlu1 %2138  ;;  %5378 = vmatpush3.bf16.msra.mxu1 %v5377_v9  ;;  %v3316_v5 = vmax.f32 %v6629_v7, %v2904_v24  ;;  %v9760_v24 = vld [vmem:[#allocation22_spill] sm:$0xff]  ;;  %v2951_v28 = vrot.slane %v6698_v57, 1  ;;  %v9763_v3 = vrot.slane %v6671_v1, 1  ;;  %v9833_v45 = vmax.f32 %v9832_v39, 0.0 }
 0x1dc   :  { %2122 = vrot.lane.b32.xlu0 %v9743_v22, %s5765_s3  ;;  %v6690_v30 = vpop.f32.mrb[72].mxu0  ;;  %5380 = vmatprep.subr.bf16.mxu1 %v5379_v12  ;;  %v5381_v22 = vpack.c.bf16 %v4033_v61, %v4032_v32  ;;  %v6705_v9 = vpop.f32.mrb[72].mxu1  ;;  %v9754_v61 = vld [vmem:[#allocation125_spill] sm:$0xff]  ;;  %v2907_v18 = vsel %vm2898_vm3, %v9759_v6, %v9758_v41  ;;  %v9761_v59 = vmax.f32 %v9760_v24, 0.0  ;;  %v9767_v24 = vmax.f32 %v6359_v2, 0.0 }
 0x1dd   :  { %9745 = vst [vmem:[#allocation144_spill] sm:$0xff] %v6690_v30  ;;  %2276 = vrot.lane.b32.xlu1 %v9749_v19, %s5765_s3  ;;  %v6703_v27 = vpop.f32.mrb[73].mxu0  ;;  %9751 = vst [vmem:[#allocation145_spill] sm:$0xff] %v6705_v9  ;;  %v4034_v19 = vld [vmem:[#allocation9 + $0x130] sm:$0xff]  ;;  %v6729_v32 = vpop.f32.mrb[73].mxu1  ;;  %v2950_v50 = vsel %vm2898_vm3, %v9764_v17, %v9763_v3  ;;  %v5387_v3 = vpack.c.bf16 %v4053_v43, %v4052_v55  ;;  %v3603_v17 = vmul.f32 %v3459_v40, %v3315_v48  ;;  %v3476_v40 = vld [vmem:[#allocation8 + $0x88] sm:$0xff] }
 0x1de   :  { %9750 = vst [vmem:[#allocation19_spill] sm:$0xff] %v6703_v27  ;;  %v6711_v21 = vpop.permute.xlu0 %2172  ;;  %v6714_v10 = vpop.f32.mrb[74].mxu0  ;;  %9757 = vst [vmem:[#allocation148_spill] sm:$0xff] %v6729_v32  ;;  %v6738_v7 = vmax.f32 %v9761_v59, %v2378_v53  ;;  %v5385_v34 = vpack.c.bf16 %v4035_v35, %v4034_v19  ;;  %v6761_v49 = vmul.f32 %v3460_v44, %v3316_v5  ;;  %v4036_v19 = vld [vmem:[#allocation9 + $0x140] sm:$0xff]  ;;  %v4037_v53 = vld [vmem:[#allocation9 + $0x148] sm:$0xff]  ;;  %v9769_v48 = vrot.slane %v6660_v0, 1 }
 0x1df   :  { %9753 = vst [vmem:[#allocation146_spill] sm:$0xff] %v6714_v10  ;;  %v2141_v12 = vpop.permute.xlu1 %2140  ;;  %v6720_v20 = vpop.f32.mrb[75].mxu0  ;;  %5382 = vmatpush3.bf16.msra.mxu1 %v5381_v22  ;;  %v3317_v6 = vmax.f32 %v6594_v29, %v2907_v18  ;;  %v3332_v55 = vmax.f32 %v6602_v25, %v2950_v50  ;;  %v9772_v5 = vld [vmem:[#allocation23_spill] sm:$0xff]  ;;  %v5389_v50 = vpack.c.bf16 %v4037_v53, %v4036_v19  ;;  %v3477_v25 = vld [vmem:[#allocation8 + $0x90] sm:$0xff] }
 0x1e0   :  { %9755 = vst [vmem:[#allocation147_spill] sm:$0xff] %v6720_v20  ;;  %2126 = vrot.lane.b32.xlu0 %v9756_v46, %s5765_s3  ;;  %v9762_v46 = vmax.f32 %v6280_v63, 0.0  ;;  %5384 = vmatprep.subr.bf16.mxu1 %v5383_v62  ;;  %v6754_v59 = vpop.f32.mrb[74].mxu1  ;;  %v2376_v35 = vsel %vm2330_vm2, %v2139_v52, %v2141_v12  ;;  %v2377_v62 = vsel %vm2330_vm2, %v2141_v12, %v6581_v8  ;;  %v9770_v8 = vmax.f32 %v6293_v36, 0.0  ;;  %v4039_v19 = vld [vmem:[#allocation9 + $0x158] sm:$0xff]  ;;  %v9823_v20 = vld [vmem:[#allocation37_spill] sm:$0xff] }
 0x1e1   :  { %9765 = vst [vmem:[#allocation22_spill] sm:$0xff] %v6754_v59  ;;  %v6759_v63 = vpop.f32.mrb[75].mxu1  ;;  %v2952_v29 = vsel %vm2898_vm3, %v9769_v48, %v2951_v28  ;;  %v9773_v12 = vmax.f32 %v9772_v5, 0.0  ;;  %v2391_v48 = vsel %vm2330_vm2, %v6675_v51, %v6711_v21  ;;  %v3605_v2 = vmul.f32 %v3461_v23, %v3317_v6  ;;  %v4038_v6 = vld [vmem:[#allocation9 + $0x150] sm:$0xff] }
 0x1e2   :  { %2280 = vrot.lane.b32.xlu1 %v9762_v46, %s5765_s3  ;;  %v6749_v41 = vpop.permute.xlu0 %2206  ;;  %9766 = vst [vmem:[#allocation149_spill] sm:$0xff] %v6759_v63  ;;  %v3619_v46 = vmul.f32 %v3475_v13, %v3331_v15  ;;  %v9778_v5 = vrot.slane %v6738_v7, 1  ;;  %v9783_v51 = vld [vmem:[#allocation29_spill] sm:$0xff]  ;;  %v9824_v32 = vmax.f32 %v9823_v20, 0.0 }
 0x1e3   :  { %v2175_v22 = vpop.permute.xlu1 %2174  ;;  %5386 = vmatpush3.bf16.msra.mxu1 %v5385_v34  ;;  %v6783_v13 = vmax.f32 %v9773_v12, %v2376_v35  ;;  %v9775_v34 = vld [vmem:[#allocation25_spill] sm:$0xff] }
 0x1e4   :  { %2154 = vrot.lane.b32.xlu0 %v9767_v24, %s5765_s3  ;;  %v6769_v52 = vpop.f32.mrb[76].mxu0  ;;  %5388 = vmatprep.subr.bf16.mxu1 %v5387_v3  ;;  %v2392_v3 = vsel %vm2330_vm2, %v6711_v21, %v2175_v22  ;;  %v9777_v24 = vmax.f32 %v6366_v38, 0.0  ;;  %v2984_v53 = vsel %vm2898_vm3, %v2951_v28, %v9778_v5  ;;  %v6810_v23 = vadd.f32 %v3619_v46, %v3603_v17  ;;  %v6823_v17 = vld [vmem:[#allocation9 + $0x200] sm:$0xff]  ;;  %v6825_v5 = vld [vmem:[#allocation9 + $0x208] sm:$0xff] }
 0x1e5   :  { %9768 = vst [vmem:[#allocation150_spill] sm:$0xff] %v6769_v52  ;;  %v6779_v43 = vpop.f32.mrb[77].mxu0  ;;  %v9784_v21 = vmax.f32 %v9783_v51, 0.0  ;;  %v4056_v28 = vld [vmem:[#allocation9 + $0x1e0] sm:$0xff]  ;;  %v4057_v38 = vld [vmem:[#allocation9 + $0x1e8] sm:$0xff]  ;;  %v3349_v36 = vmax.f32 %v6698_v57, %v2984_v53  ;;  %v5393_v51 = vpack.c.bf16 %v4039_v19, %v4038_v6  ;;  %v9788_v57 = vmax.f32 %v9787_v56, 0.0 }
 0x1e6   :  { %2308 = vrot.lane.b32.xlu1 %v9770_v8, %s5765_s3  ;;  %9771 = vst [vmem:[#allocation151_spill] sm:$0xff] %v6779_v43  ;;  %v6785_v15 = vpop.permute.xlu0 %2208  ;;  %v1670_v18 = vpop.f32.mrb[78].mxu0  ;;  %v9776_v8 = vmax.f32 %v9775_v34, 0.0  ;;  %v4055_v34 = vld [vmem:[#allocation9 + $0x1d8] sm:$0xff] }
 0x1e7   :  { %9774 = vst [vmem:[#allocation23_spill] sm:$0xff] %v6785_v15  ;;  %v6797_v35 = vpop.permute.xlu1 %2176  ;;  %v1671_v12 = vpop.f32.mrb[79].mxu0  ;;  %v3333_v18 = vmax.f32 %v6660_v0, %v2952_v29  ;;  %v9779_v0 = vmax.f32 %v6300_v16, 0.0  ;;  %5390 = vmatpush3.bf16.msra.mxu1 %v5389_v50  ;;  %v9780_v29 = vld [vmem:[#allocation27_spill] sm:$0xff]  ;;  %v2408_v14 = vsel %vm2330_vm2, %v6749_v41, %v6785_v15 }
 0x1e8   :  { %v6795_v44 = vmax.f32 %v9776_v8, %v2377_v62  ;;  %2158 = vrot.lane.b32.xlu0 %v9777_v24, %s5765_s3  ;;  %v4054_v62 = vld [vmem:[#allocation9 + $0x1d0] sm:$0xff]  ;;  %v3620_v8 = vmul.f32 %v3476_v40, %v3332_v55  ;;  %v9781_v24 = vmax.f32 %v9780_v29, 0.0  ;;  %v2979_v55 = vrot.slane %v6783_v13, 1 }
 0x1e9   :  { %v6832_v29 = vmax.f32 %v9784_v21, %v2392_v3  ;;  %v5391_v16 = vpack.c.bf16 %v4055_v34, %v4054_v62  ;;  %v3621_v31 = vmul.f32 %v3477_v25, %v3333_v18  ;;  %v9786_v3 = vmax.f32 %v6379_v47, 0.0  ;;  %v4040_v21 = vld [vmem:[#allocation9 + $0x160] sm:$0xff]  ;;  %v3493_v34 = vld [vmem:[#allocation8 + $0x110] sm:$0xff] }
 0x1ea   :  { %2312 = vrot.lane.b32.xlu1 %v9779_v0, %s5765_s3  ;;  %v6818_v12 = vmax.f32 %v9781_v24, %v2391_v48  ;;  %v2235_v40 = vpop.permute.xlu0 %2234  ;;  %v6827_v0 = vpop.f32.mrb[76].mxu1  ;;  %v2981_v50 = vrot.slane %v6795_v44, 1  ;;  %v2393_v48 = vsel %vm2330_vm2, %v2175_v22, %v6797_v35  ;;  %v4041_v22 = vld [vmem:[#allocation9 + $0x168] sm:$0xff]  ;;  %v6846_v62 = vadd.f32 %v3620_v8, %v6761_v49  ;;  %v9790_v8 = vld [vmem:[#allocation26_spill] sm:$0xff] }
 0x1eb   :  { %9782 = vst [vmem:[#allocation25_spill] sm:$0xff] %v6827_v0  ;;  %v2203_v24 = vpop.permute.xlu1 %2202  ;;  %v6836_v46 = vpop.f32.mrb[77].mxu1  ;;  %5392 = vmatprep.subr.bf16.mxu1 %v5391_v16  ;;  %v5395_v25 = vpack.c.bf16 %v4057_v38, %v4056_v28  ;;  %v9792_v18 = vrot.slane %v6671_v1, 1  ;;  %v9795_v38 = vld [vmem:[#allocation100_spill] sm:$0xff]  ;;  %v4043_v16 = vld [vmem:[#allocation9 + $0x178] sm:$0xff] }
 0x1ec   :  { %9785 = vst [vmem:[#allocation27_spill] sm:$0xff] %v6836_v46  ;;  %2186 = vrot.lane.b32.xlu0 %v9786_v3, %s5765_s3  ;;  %v1751_v60 = vpop.f32.mrb[78].mxu1  ;;  %v9791_v3 = vmax.f32 %v9790_v8, 0.0  ;;  %5394 = vmatpush3.bf16.msra.mxu1 %v5393_v51  ;;  %v4059_v8 = vld [vmem:[#allocation9 + $0x1f8] sm:$0xff]  ;;  %v9796_v28 = vmax.f32 %v9795_v38, 0.0  ;;  %v3492_v51 = vld [vmem:[#allocation8 + $0x108] sm:$0xff] }
 0x1ed   :  { %v1752_v6 = vpop.f32.mrb[79].mxu1  ;;  %v9789_v60 = vrot.slane %v6616_v37, 1  ;;  %v2982_v53 = vsel %vm2898_vm3, %v9792_v18, %v2981_v50  ;;  %v4042_v18 = vld [vmem:[#allocation9 + $0x170] sm:$0xff]  ;;  %5396 = vmatprep.subr.bf16.mxu1 %v5395_v25  ;;  %v9802_v25 = vrot.slane %v6832_v29, 1 }
 0x1ee   :  { %2060 = vrot.lane.b32.xlu1 %v9788_v57, %s5765_s3  ;;  %v6861_v47 = vmax.f32 %v9791_v3, %v2393_v48  ;;  %v6863_v57 = vpop.permute.xlu0 %2236  ;;  %v9793_v6 = vld [vmem:[#allocation30_spill] sm:$0xff]  ;;  %v3637_v48 = vmul.f32 %v3493_v34, %v3349_v36  ;;  %v3777_v3 = vadd.f32 %v3621_v31, %v3605_v2 }
 0x1ef   :  { %v2980_v49 = vsel %vm2898_vm3, %v9789_v60, %v2979_v55  ;;  %v9794_v19 = vmax.f32 %v9793_v6, 0.0  ;;  %v2205_v27 = vpop.permute.xlu1 %2204  ;;  %v5397_v60 = vpack.c.bf16 %v4041_v22, %v4040_v21  ;;  %v2421_v21 = vsel %vm2330_vm2, %v2235_v40, %v6863_v57  ;;  %v9797_v22 = vld [vmem:[#allocation31_spill] sm:$0xff]  ;;  %v9799_v2 = vld [vmem:[#allocation86_spill] sm:$0xff] }
 0x1f0   :  { %v2406_v11 = vsel %vm2330_vm2, %v2203_v24, %v2205_v27  ;;  %2190 = vrot.lane.b32.xlu0 %v9796_v28, %s5765_s3  ;;  %v9800_v31 = vmax.f32 %v9799_v2, 0.0  ;;  %v6889_v34 = vld [vmem:[#allocation9 + $0x290] sm:$0xff]  ;;  %v9801_v6 = vrot.slane %v6818_v12, 1  ;;  %v3015_v40 = vrot.slane %v6861_v47, 1  ;;  %v9803_v2 = vld [vmem:[#allocation35_spill] sm:$0xff] }
 0x1f1   :  { %v6871_v56 = vmax.f32 %v9794_v19, %v2408_v14  ;;  %v3347_v14 = vmax.f32 %v6616_v37, %v2980_v49  ;;  %v9798_v19 = vmax.f32 %v9797_v22, 0.0  ;;  %v3348_v49 = vmax.f32 %v6671_v1, %v2982_v53  ;;  %v6900_v22 = vld [vmem:[#allocation9 + $0x210] sm:$0xff]  ;;  %5398 = vmatpush3.bf16.msra.mxu1 %v5397_v60 }
 0x1f2   :  { %2064 = vrot.lane.b32.xlu1 %v9800_v31, %s5765_s3  ;;  %v3012_v37 = vsel %vm2898_vm3, %v2979_v55, %v9801_v6  ;;  %v6896_v28 = vpop.permute.xlu0 %2270  ;;  %v5399_v31 = vpack.c.bf16 %v4059_v8, %v4058_v54  ;;  %v3014_v24 = vsel %vm2898_vm3, %v2981_v50, %v9802_v25  ;;  %v2407_v1 = vsel %vm2330_vm2, %v2205_v27, %v6749_v41  ;;  %v9805_v54 = vld [vmem:[#allocation101_spill] sm:$0xff]  ;;  %v9807_v27 = vld [vmem:[#allocation87_spill] sm:$0xff] }
 0x1f3   :  { %v6883_v36 = vmax.f32 %v9798_v19, %v2406_v11  ;;  %v6898_v11 = vld [vmem:[#allocation9 + $0x298] sm:$0xff]  ;;  %v9452_v55 = vrot.slane %v6871_v56, 1  ;;  %v2239_v53 = vpop.permute.xlu1 %2238  ;;  %v5401_v6 = vpack.c.bf16 %v4043_v16, %v4042_v18  ;;  %v9804_v38 = vmax.f32 %v9803_v2, 0.0  ;;  %v3508_v18 = vld [vmem:[#allocation8 + $0x188] sm:$0xff] }
 0x1f4   :  { %v6902_v19 = vld [vmem:[#allocation9 + $0x218] sm:$0xff]  ;;  %v9806_v60 = vmax.f32 %v9805_v54, 0.0  ;;  %5400 = vmatprep.subr.bf16.mxu1 %v5399_v31  ;;  %v3635_v25 = vmul.f32 %v3491_v33, %v3347_v14  ;;  %v9808_v41 = vmax.f32 %v9807_v27, 0.0  ;;  %v3364_v2 = vmax.f32 %v6795_v44, %v3014_v24  ;;  %v9810_v14 = vld [vmem:[#allocation33_spill] sm:$0xff] }
 0x1f5   :  { %v6912_v9 = vmax.f32 %v9804_v38, %v2421_v21  ;;  %v3043_v42 = vrot.slane %v6883_v36, 1  ;;  %v3363_v21 = vmax.f32 %v6783_v13, %v3012_v37  ;;  %v9811_v31 = vmax.f32 %v9810_v14, 0.0  ;;  %5402 = vmatpush3.bf16.msra.mxu1 %v5401_v6  ;;  %v3507_v38 = vld [vmem:[#allocation8 + $0x180] sm:$0xff]  ;;  %v3509_v37 = vld [vmem:[#allocation8 + $0x190] sm:$0xff]  ;;  %v6960_v14 = vld [vmem:[#allocation9 + $0x2a8] sm:$0xff] }
 0x1f6   :  { %2218 = vrot.lane.b32.xlu0 %v9806_v60, %s5765_s3  ;;  %2092 = vrot.lane.b32.xlu1 %v9808_v41, %s5765_s3  ;;  %v9809_v60 = vrot.slane %v6738_v7, 1  ;;  %v6937_v41 = vpop.permute.xlu0 %2272  ;;  %v6939_v8 = vadd.f32 %v3777_v3, %v3637_v48  ;;  %v3636_v16 = vmul.f32 %v3492_v51, %v3348_v49  ;;  %v3048_v44 = vsel %vm2898_vm3, %v3015_v40, %v9452_v55  ;;  %v9814_v51 = vld [vmem:[#allocation104_spill] sm:$0xff]  ;;  %v6978_v27 = vld [vmem:[#allocation9 + $0x2b0] sm:$0xff] }
 0x1f7   :  { %v6935_v50 = vmax.f32 %v9811_v31, %v2407_v1  ;;  %9812 = vst [vmem:[#allocation29_spill] sm:$0xff] %v6937_v41  ;;  %v6944_v13 = vpop.permute.xlu1 %2240  ;;  %v2422_v48 = vsel %vm2330_vm2, %v6863_v57, %v2239_v53  ;;  %v9815_v49 = vmax.f32 %v9814_v51, 0.0  ;;  %v3748_v31 = vadd.f32 %v6810_v23, %v3635_v25  ;;  %v9816_v57 = vld [vmem:[#allocation34_spill] sm:$0xff]  ;;  %v6976_v54 = vld [vmem:[#allocation9 + $0x228] sm:$0xff]  ;;  %9820 = vst [vmem:[#allocation26_spill] sm:$0xff] %v6978_v27 }
 0x1f8   :  { %v3016_v33 = vsel %vm2898_vm3, %v9809_v60, %v3015_v40  ;;  %v9813_v60 = vrot.slane %v6818_v12, 1  ;;  %v2423_v3 = vsel %vm2330_vm2, %v2239_v53, %v6944_v13  ;;  %v6958_v40 = vld [vmem:[#allocation9 + $0x2a0] sm:$0xff]  ;;  %v9817_v55 = vmax.f32 %v9816_v57, 0.0  ;;  %v9818_v53 = vld [vmem:[#allocation89_spill] sm:$0xff]  ;;  %v6982_v57 = vld [vmem:[#allocation9 + $0x2b8] sm:$0xff] }
 0x1f9   :  { %v3365_v24 = vmax.f32 %v6738_v7, %v3016_v33  ;;  %v9819_v51 = vmax.f32 %v9818_v53, 0.0  ;;  %v3651_v23 = vmul.f32 %v3507_v38, %v3363_v21  ;;  %v3652_v7 = vmul.f32 %v3508_v18, %v3364_v2  ;;  %v3525_v53 = vld [vmem:[#allocation8 + $0x210] sm:$0xff]  ;;  %v6996_v21 = vld [vmem:[#allocation9 + $0x2c0] sm:$0xff]  ;;  %v6998_v2 = vld [vmem:[#allocation9 + $0x2c8] sm:$0xff] }
 0x1fa   :  { %v3044_v6 = vsel %vm2898_vm3, %v9813_v60, %v3043_v42  ;;  %2222 = vrot.lane.b32.xlu0 %v9815_v49, %s5765_s3  ;;  %v2438_v60 = vsel %vm2330_vm2, %v6896_v28, %v6937_v41  ;;  %v6969_v1 = vmax.f32 %v9817_v55, %v2423_v3  ;;  %v6974_v49 = vld [vmem:[#allocation9 + $0x220] sm:$0xff]  ;;  %v3381_v25 = vmax.f32 %v6861_v47, %v3048_v44  ;;  %v2299_v63 = vpop.permute.xlu0 %2298  ;;  %v6984_v55 = vld [vmem:[#allocation9 + $0x230] sm:$0xff]  ;;  %v6986_v3 = vld [vmem:[#allocation9 + $0x238] sm:$0xff] }
 0x1fb   :  { %2096 = vrot.lane.b32.xlu1 %v9819_v51, %s5765_s3  ;;  %v3045_v33 = vrot.slane %v6935_v50, 1  ;;  %9821 = vst [vmem:[#allocation30_spill] sm:$0xff] %v6984_v55  ;;  %9822 = vst [vmem:[#allocation31_spill] sm:$0xff] %v6986_v3  ;;  %v3763_v51 = vadd.f32 %v6846_v62, %v3636_v16  ;;  %v3379_v59 = vmax.f32 %v6818_v12, %v3044_v6  ;;  %v2267_v18 = vpop.permute.xlu1 %2266  ;;  %v3523_v44 = vld [vmem:[#allocation8 + $0x200] sm:$0xff]  ;;  %v9827_v41 = vrot.slane %v6912_v9, 1  ;;  %v9828_v16 = vld [vmem:[#allocation38_spill] sm:$0xff] }
 0x1fc   :  { %v6992_v38 = vmax.f32 %v9824_v32, %v2422_v48  ;;  %9825 = vst [vmem:[#allocation35_spill] sm:$0xff] %v6996_v21  ;;  %9826 = vst [vmem:[#allocation33_spill] sm:$0xff] %v6998_v2  ;;  %v9829_v10 = vmax.f32 %v9828_v16, 0.0  ;;  %v3079_v20 = vrot.slane %v6969_v1, 1  ;;  %v9830_v32 = vld [vmem:[#allocation106_spill] sm:$0xff]  ;;  %v3749_v47 = vadd.f32 %v3748_v31, %v3651_v23  ;;  %v7033_v31 = vld [vmem:[#allocation9 + $0x248] sm:$0xff] }
 0x1fd   :  { %v3076_v62 = vsel %vm2898_vm3, %v3043_v42, %v9827_v41  ;;  %v9831_v6 = vmax.f32 %v9830_v32, 0.0  ;;  %v3653_v30 = vmul.f32 %v3509_v37, %v3365_v24  ;;  %v7020_v41 = vadd.f32 %v3763_v51, %v3652_v7  ;;  %9836 = vst [vmem:[#allocation37_spill] sm:$0xff] %v7033_v31  ;;  %v7038_v51 = vld [vmem:[#allocation9 + $0x2d0] sm:$0xff]  ;;  %v9840_v32 = vld [vmem:[#allocation43_spill] sm:$0xff] }
 0x1fe   :  { %v7005_v12 = vmax.f32 %v9829_v10, %v2438_v60  ;;  %v7022_v60 = vmul.f32 %v3525_v53, %v3381_v25  ;;  %v9834_v16 = vrot.slane %v6832_v29, 1  ;;  %v2301_v24 = vpop.permute.xlu0 %2300  ;;  %v3395_v23 = vmax.f32 %v6883_v36, %v3076_v62  ;;  %9837 = vst [vmem:[#allocation38_spill] sm:$0xff] %v7038_v51  ;;  %v9842_v36 = vld [vmem:[#allocation108_spill] sm:$0xff]  ;;  %v9844_v42 = vld [vmem:[#allocation39_spill] sm:$0xff] }
 0x1ff   :  { %2250 = vrot.lane.b32.xlu0 %v9831_v6, %s5765_s3  ;;  %2124 = vrot.lane.b32.xlu1 %v9833_v45, %s5765_s3  ;;  %v7031_v45 = vld [vmem:[#allocation9 + $0x240] sm:$0xff]  ;;  %v3667_v10 = vmul.f32 %v3523_v44, %v3379_v59  ;;  %v3077_v7 = vrot.slane %v6992_v38, 1  ;;  %v2451_v53 = vsel %vm2330_vm2, %v2299_v63, %v2301_v24  ;;  %v2269_v25 = vpop.permute.xlu1 %2268  ;;  %v9839_v37 = vrot.slane %v6871_v56, 1 }
 0x200   :  { %v7027_v6 = vsel %vm2898_vm3, %v9834_v16, %v3045_v33  ;;  %9835 = vst [vmem:[#allocation34_spill] sm:$0xff] %v7031_v45  ;;  %v7040_v16 = vld [vmem:[#allocation9 + $0x2d8] sm:$0xff]  ;;  %v9841_v39 = vmax.f32 %v9840_v32, 0.0  ;;  %v2436_v59 = vsel %vm2330_vm2, %v2267_v18, %v2269_v25  ;;  %v9843_v44 = vmax.f32 %v9842_v36, 0.0  ;;  %v3539_v62 = vld [vmem:[#allocation8 + $0x280] sm:$0xff]  ;;  %v3524_v45 = vld [vmem:[#allocation8 + $0x208] sm:$0xff] }
 0x201   :  { %9838 = vst [vmem:[#allocation152_spill] sm:$0xff] %v7040_v16  ;;  %v3080_v48 = vsel %vm2898_vm3, %v9839_v37, %v3079_v20  ;;  %v3779_v63 = vadd.f32 %v6939_v8, %v3653_v30  ;;  %v2437_v21 = vsel %vm2330_vm2, %v2269_v25, %v6896_v28  ;;  %v9845_v2 = vmax.f32 %v9844_v42, 0.0  ;;  %v9846_v37 = vld [vmem:[#allocation94_spill] sm:$0xff]  ;;  %v3555_v36 = vld [vmem:[#allocation8 + $0x300] sm:$0xff] }
 0x202   :  { %v2738_v15 = vmax.f32 %v9841_v39, %v2451_v53  ;;  %v9847_v55 = vmax.f32 %v9846_v37, 0.0  ;;  %v3380_v18 = vmax.f32 %v6832_v29, %v7027_v6  ;;  %v9848_v53 = vld [vmem:[#allocation41_spill] sm:$0xff]  ;;  %v3078_v42 = vsel %vm2898_vm3, %v3045_v33, %v3077_v7  ;;  %v7076_v29 = vld [vmem:[#allocation9 + $0x258] sm:$0xff]  ;;  %v3571_v27 = vld [vmem:[#allocation8 + $0x380] sm:$0xff] }
 0x203   :  { %2254 = vrot.lane.b32.xlu0 %v9843_v44, %s5765_s3  ;;  %v2722_v46 = vmax.f32 %v9845_v2, %v2436_v59  ;;  %v9849_v30 = vmax.f32 %v9848_v53, 0.0  ;;  %v7068_v44 = vpop.permute.xlu0 %2050  ;;  %v3750_v2 = vadd.f32 %v3749_v47, %v3667_v10  ;;  %v2303_v59 = vpop.permute.xlu1 %2302  ;;  %v7074_v39 = vld [vmem:[#allocation9 + $0x250] sm:$0xff]  ;;  %v3683_v6 = vmul.f32 %v3539_v62, %v3395_v23  ;;  %v3587_v10 = vld [vmem:[#allocation8 + $0x400] sm:$0x7f] }
 0x204   :  { %2128 = vrot.lane.b32.xlu1 %v9847_v55, %s5765_s3  ;;  %v3139_v32 = vrot.slane %v2738_v15, 1  ;;  %v3397_v55 = vmax.f32 %v6871_v56, %v3080_v48  ;;  %9850 = vst [vmem:[#allocation43_spill] sm:$0xff] %v7074_v39  ;;  %v3541_v53 = vld [vmem:[#allocation8 + $0x290] sm:$0xff]  ;;  %v4108_v56 = vld [vmem:[#allocation9 + $0x380] sm:$0xff]  ;;  %v4109_v48 = vld [vmem:[#allocation9 + $0x388] sm:$0xff]  ;;  %v9854_v51 = vrot.slane %v6912_v9, 1  ;;  %v2452_v16 = vsel %vm2330_vm2, %v2301_v24, %v2303_v59 }
 0x205   :  { %v7066_v8 = vmax.f32 %v9849_v30, %v2437_v21  ;;  %v3107_v25 = vrot.slane %v2722_v46, 1  ;;  %v9851_v21 = vrot.slane %v7005_v12, 1  ;;  %v9852_v47 = vld [vmem:[#allocation109_spill] sm:$0xff]  ;;  %v3751_v26 = vadd.f32 %v3750_v2, %v3683_v6  ;;  %v9859_v2 = vld [vmem:[#allocation112_spill] sm:$0xff] }
 0x206   :  { %v3443_v37 = vmax.f32 %v2738_v15, %v3139_v32  ;;  %v9853_v33 = vmax.f32 %v9852_v47, 0.0  ;;  %v9855_v15 = vld [vmem:[#allocation95_spill] sm:$0xff]  ;;  %v9860_v6 = vmax.f32 %v9859_v2, 0.0 }
 0x207   :  { %v3112_v30 = vsel %vm2898_vm3, %v3079_v20, %v9851_v21  ;;  %v3109_v28 = vrot.slane %v7066_v8, 1  ;;  %v3108_v23 = vsel %vm2898_vm3, %v9854_v51, %v3107_v25  ;;  %v3140_v62 = vsel %vm2898_vm3, %v3107_v25, %v3139_v32  ;;  %v7095_v3 = vpop.permute.xlu0 %2054  ;;  %v3540_v32 = vld [vmem:[#allocation8 + $0x288] sm:$0xff]  ;;  %v7151_v51 = vld [vmem:[#allocation9 + $0x2f8] sm:$0xff] }
 0x208   :  { %2282 = vrot.lane.b32.xlu0 %v9853_v33, %s5765_s3  ;;  %v9856_v20 = vmax.f32 %v9855_v15, 0.0  ;;  %v5435_v21 = vpack.c.bf16 %v4109_v48, %v4108_v56  ;;  %v3396_v33 = vmax.f32 %v6935_v50, %v3078_v42  ;;  %v3411_v47 = vmax.f32 %v6912_v9, %v3108_v23  ;;  %v9857_v15 = vld [vmem:[#allocation45_spill] sm:$0xff]  ;;  %v7102_v48 = vpop.permute.xlu1 %2304 }
 0x209   :  { %v3427_v31 = vmax.f32 %v2722_v46, %v3140_v62  ;;  %v3413_v24 = vmax.f32 %v6969_v1, %v3112_v30  ;;  %v3685_v25 = vmul.f32 %v3541_v53, %v3397_v55  ;;  %v3731_v50 = vmul.f32 %v3587_v10, %v3443_v37  ;;  %v3557_v53 = vld [vmem:[#allocation8 + $0x310] sm:$0xff] }
 0x20a   :  { %2156 = vrot.lane.b32.xlu1 %v9856_v20, %s5765_s3  ;;  %v9858_v20 = vmax.f32 %v9857_v15, 0.0  ;;  %5436 = vmatprep.subr.bf16.mxu1 %v5435_v21  ;;  %v3110_v9 = vsel %vm2898_vm3, %v3077_v7, %v3109_v28  ;;  %v3699_v46 = vmul.f32 %v3555_v36, %v3411_v47  ;;  %v2453_v42 = vsel %vm2330_vm2, %v2303_v59, %v7102_v48  ;;  %v9863_v37 = vld [vmem:[#allocation97_spill] sm:$0xff]  ;;  %v9865_v59 = vld [vmem:[#allocation118_spill] sm:$0xff] }
 0x20b   :  { %v3780_v1 = vadd.f32 %v3779_v63, %v7022_v60  ;;  %v3668_v55 = vmul.f32 %v3524_v45, %v3380_v18  ;;  %v9864_v10 = vmax.f32 %v9863_v37, 0.0  ;;  %v3684_v7 = vmul.f32 %v3540_v32, %v3396_v33  ;;  %v7119_v21 = vpop.permute.xlu0 %2082  ;;  %v3556_v60 = vld [vmem:[#allocation8 + $0x308] sm:$0xff]  ;;  %v3573_v18 = vld [vmem:[#allocation8 + $0x390] sm:$0xff] }
 0x20c   :  { %v2739_v56 = vmax.f32 %v9858_v20, %v2452_v16  ;;  %2286 = vrot.lane.b32.xlu0 %v9860_v6, %s5765_s3  ;;  %v9861_v16 = vld [vmem:[#allocation42_spill] sm:$0xff]  ;;  %v3715_v36 = vmul.f32 %v3571_v27, %v3427_v31  ;;  %v3752_v47 = vadd.f32 %v3751_v26, %v3699_v46  ;;  %v2334_v15 = vsel %vm2330_vm2, %v9865_v59, %v7068_v44  ;;  %v9866_v6 = vld [vmem:[#allocation131_spill] sm:$0xff]  ;;  %v2053_v27 = vpop.permute.xlu1 %2052 }
 0x20d   :  { %v9862_v23 = vmax.f32 %v9861_v16, 0.0  ;;  %v3412_v45 = vmax.f32 %v6992_v38, %v3110_v9  ;;  %v3589_v20 = vld [vmem:[#allocation8 + $0x410] sm:$0x7f]  ;;  %v2349_v33 = vsel %vm2330_vm2, %v9866_v6, %v7119_v21  ;;  %v3701_v26 = vmul.f32 %v3557_v53, %v3413_v24  ;;  %v7130_v38 = vld [vmem:[#allocation9 + $0x2e0] sm:$0xff]  ;;  %v7147_v6 = vld [vmem:[#allocation9 + $0x268] sm:$0xff]  ;;  %9877 = vst [vmem:[#allocation42_spill] sm:$0xff] %v7151_v51 }
 0x20e   :  { %v3141_v30 = vrot.slane %v2739_v56, 1  ;;  %2160 = vrot.lane.b32.xlu1 %v9864_v10, %s5765_s3  ;;  %v3781_v31 = vadd.f32 %v3780_v1, %v3685_v25  ;;  %v3754_v32 = vsel %vm2898_vm3, %v3731_v50, 0.0  ;;  %v3753_v46 = vadd.f32 %v3752_v47, %v3715_v36  ;;  %v9867_v16 = vld [vmem:[#allocation114_spill] sm:$0xff]  ;;  %v7134_v9 = vld [vmem:[#allocation9 + $0x260] sm:$0xff]  ;;  %9875 = vst [vmem:[#allocation41_spill] sm:$0xff] %v7147_v6 }
 0x20f   :  { %v2740_v62 = vmax.f32 %v9862_v23, %v2453_v42  ;;  %v9868_v23 = vmax.f32 %v9867_v16, 0.0  ;;  %9869 = vst [vmem:[#allocation39_spill] sm:$0xff] %v7134_v9  ;;  %v9870_v59 = vrot.slane %v7005_v12, 1  ;;  %v9871_v1 = vld [vmem:[#allocation18_spill] sm:$0xff]  ;;  %v9873_v36 = vld [vmem:[#allocation99_spill] sm:$0xff]  ;;  %v9931_v6 = vld [vmem:[#allocation56_spill] sm:$0xff] }
 0x210   :  { %v3142_v63 = vsel %vm2898_vm3, %v3109_v28, %v3141_v30  ;;  %v7132_v28 = vld [vmem:[#allocation9 + $0x2e8] sm:$0xff]  ;;  %v9872_v50 = vmax.f32 %v9871_v1, 0.0  ;;  %v9874_v47 = vmax.f32 %v9873_v36, 0.0  ;;  %v3765_v1 = vadd.f32 %v7020_v41, %v3668_v55  ;;  %v7159_v36 = vpop.permute.xlu1 %2056 }
 0x211   :  { %v3143_v42 = vrot.slane %v2740_v62, 1  ;;  %2314 = vrot.lane.b32.xlu0 %v9868_v23, %s5765_s3  ;;  %v3428_v10 = vmax.f32 %v7066_v8, %v3142_v63  ;;  %v7149_v23 = vld [vmem:[#allocation9 + $0x2f0] sm:$0xff]  ;;  %v3755_v8 = vadd.f32 %v3754_v32, %v3753_v46  ;;  %v9878_v63 = vld [vmem:[#allocation16_spill] sm:$0xff]  ;;  %v7165_v46 = vld [vmem:[#allocation9 + $0x278] sm:$0xff]  ;;  %v2335_v55 = vsel %vm2330_vm2, %v7068_v44, %v2053_v27 }
 0x212   :  { %v7142_v53 = vmax.f32 %v9872_v50, %v2349_v33  ;;  %2188 = vrot.lane.b32.xlu1 %v9874_v47, %s5765_s3  ;;  %9876 = vst [vmem:[#allocation45_spill] sm:$0xff] %v7149_v23  ;;  %v9879_v37 = vmax.f32 %v9878_v63, 0.0  ;;  %v2087_v33 = vpop.permute.xlu0 %2086  ;;  %v3700_v50 = vmul.f32 %v3556_v60, %v3412_v45  ;;  %v3588_v47 = vld [vmem:[#allocation8 + $0x408] sm:$0x7f]  ;;  %v7163_v32 = vld [vmem:[#allocation9 + $0x270] sm:$0xff]  ;;  %9881 = vst [vmem:[#allocation131_spill] sm:$0xff] %v7165_v46 }
 0x213   :  { %v3144_v24 = vsel %vm2898_vm3, %v9870_v59, %v3143_v42  ;;  %v3445_v25 = vmax.f32 %v2740_v62, %v3143_v42  ;;  %v3444_v62 = vmax.f32 %v2739_v56, %v3141_v30  ;;  %v3572_v59 = vld [vmem:[#allocation8 + $0x388] sm:$0xff]  ;;  %9880 = vst [vmem:[#allocation118_spill] sm:$0xff] %v7163_v32  ;;  %v9884_v45 = vld [vmem:[#allocation102_spill] sm:$0xff]  ;;  %v7197_v44 = vld [vmem:[#allocation9 + $0x300] sm:$0xff]  ;;  %v2337_v32 = vsel %vm2330_vm2, %v7095_v3, %v7159_v36 }
 0x214   :  { %v7155_v16 = vmax.f32 %v9879_v37, %v2334_v15  ;;  %v3429_v42 = vmax.f32 %v7005_v12, %v3144_v24  ;;  %v3782_v37 = vadd.f32 %v3781_v31, %v3701_v26  ;;  %v9882_v12 = vld [vmem:[#allocation116_spill] sm:$0xff]  ;;  %v3756_v15 = vrot.slane %v3755_v8, 4  ;;  %v9886_v41 = vld [vmem:[#allocation141_spill] sm:$0xff]  ;;  %9891 = vst [vmem:[#allocation18_spill] sm:$0xff] %v7197_v44  ;;  %v9906_v46 = vld [vmem:[#allocation51_spill] sm:$0xff] }
 0x215   :  { %v3733_v2 = vmul.f32 %v3589_v20, %v3445_v25  ;;  %v9883_v30 = vmax.f32 %v9882_v12, 0.0  ;;  %v2909_v60 = vrot.slane %v7142_v53, 1  ;;  %v9885_v20 = vmax.f32 %v9884_v45, 0.0  ;;  %v2085_v45 = vpop.permute.xlu1 %2084  ;;  %v9903_v12 = vld [vmem:[#allocation47_spill] sm:$0xff]  ;;  %v7278_v44 = vld [vmem:[#allocation9 + $0x3a8] sm:$0xff] }
 0x216   :  { %v3717_v56 = vmul.f32 %v3573_v18, %v3429_v42  ;;  %v3716_v24 = vmul.f32 %v3572_v59, %v3428_v10  ;;  %v3766_v26 = vadd.f32 %v3765_v1, %v3684_v7  ;;  %v2908_v18 = vrot.slane %v7155_v16, 1  ;;  %v2115_v63 = vpop.permute.xlu0 %2114  ;;  %9919 = vst [vmem:[#allocation51_spill] sm:$0xff] %v7278_v44 }
 0x217   :  { %2318 = vrot.lane.b32.xlu0 %v9883_v30, %s5765_s3  ;;  %2192 = vrot.lane.b32.xlu1 %v9885_v20, %s5765_s3  ;;  %v3732_v31 = vmul.f32 %v3588_v47, %v3444_v62  ;;  %v3784_v30 = vsel %vm2898_vm3, %v3733_v2, 0.0  ;;  %v2364_v39 = vsel %vm2330_vm2, %v9886_v41, %v2115_v63  ;;  %v2336_v7 = vsel %vm2330_vm2, %v2053_v27, %v7095_v3  ;;  %v9887_v62 = vld [vmem:[#allocation20_spill] sm:$0xff]  ;;  %v9889_v2 = vld [vmem:[#allocation119_spill] sm:$0xff] }
 0x218   :  { %v3783_v25 = vadd.f32 %v3782_v37, %v3717_v56  ;;  %v3767_v20 = vadd.f32 %v3766_v26, %v3700_v50  ;;  %v9888_v59 = vmax.f32 %v9887_v62, 0.0  ;;  %v2350_v47 = vsel %vm2330_vm2, %v7119_v21, %v2085_v45  ;;  %v7199_v56 = vld [vmem:[#allocation9 + $0x308] sm:$0xff]  ;;  %v9893_v26 = vld [vmem:[#allocation103_spill] sm:$0xff] }
 0x219   :  { %v9890_v37 = vmax.f32 %v9889_v2, 0.0  ;;  %9892 = vst [vmem:[#allocation16_spill] sm:$0xff] %v7199_v56  ;;  %v3757_v50 = vadd.f32 %v3756_v15, %v3755_v8  ;;  %v2910_v41 = vsel %vm2898_vm3, %v2908_v18, %v2909_v60  ;;  %v2351_v27 = vsel %vm2330_vm2, %v2085_v45, %v2087_v33  ;;  %v7214_v15 = vld [vmem:[#allocation9 + $0x398] sm:$0xff]  ;;  %v7216_v45 = vld [vmem:[#allocation9 + $0x310] sm:$0xff] }
 0x21a   :  { %v3785_v10 = vadd.f32 %v3784_v30, %v3783_v25  ;;  %v7190_v1 = vmax.f32 %v9888_v59, %v2364_v39  ;;  %v9894_v39 = vmax.f32 %v9893_v26, 0.0  ;;  %v3768_v25 = vadd.f32 %v3767_v20, %v3716_v24  ;;  %v7206_v30 = vld [vmem:[#allocation9 + $0x390] sm:$0xff]  ;;  %v2119_v8 = vpop.permute.xlu0 %2118  ;;  %9898 = vst [vmem:[#allocation20_spill] sm:$0xff] %v7214_v15  ;;  %v7218_v18 = vld [vmem:[#allocation9 + $0x318] sm:$0xff]  ;;  %v7228_v59 = vpop.permute.xlu1 %2088 }
 0x21b   :  { %2066 = vrot.lane.b32.xlu0 %v9890_v37, %s5765_s3  ;;  %9895 = vst [vmem:[#allocation141_spill] sm:$0xff] %v7206_v30  ;;  %v3769_v21 = vsel %vm2898_vm3, %v3732_v31, 0.0  ;;  %v9896_v37 = vld [vmem:[#allocation49_spill] sm:$0xff]  ;;  %9900 = vst [vmem:[#allocation153_spill] sm:$0xff] %v7218_v18  ;;  %v9904_v31 = vmax.f32 %v9903_v12, 0.0  ;;  %v2352_v12 = vsel %vm2330_vm2, %v2087_v33, %v7228_v59  ;;  %v9914_v30 = vld [vmem:[#allocation48_spill] sm:$0xff] }
 0x21c   :  { %2220 = vrot.lane.b32.xlu1 %v9894_v39, %s5765_s3  ;;  %v3786_v62 = vrot.slane %v3785_v10, 4  ;;  %v9897_v42 = vmax.f32 %v9896_v37, 0.0  ;;  %9899 = vst [vmem:[#allocation49_spill] sm:$0xff] %v7216_v45  ;;  %v9901_v39 = vld [vmem:[#allocation46_spill] sm:$0xff]  ;;  %v3770_v37 = vadd.f32 %v3769_v21, %v3768_v25  ;;  %v9909_v21 = vld [vmem:[#allocation105_spill] sm:$0xff]  ;;  %v9911_v33 = vrot.slane %v7190_v1, 1 }
 0x21d   :  { %v9902_v24 = vmax.f32 %v9901_v39, 0.0  ;;  %v7226_v26 = vmax.f32 %v9904_v31, %v2336_v7  ;;  %9905 = vst [vmem:[#allocation46_spill] sm:$0xff] %v7228_v59  ;;  %v9907_v39 = vmax.f32 %v9906_v46, 0.0  ;;  %v9908_v7 = vmax.f32 %v9741_v4, 0.0  ;;  %v3462_v25 = vld [vmem:[#allocation8 + $0x18] sm:$0xff]  ;;  %v7268_v45 = vld [vmem:[#allocation9 + $0x3a0] sm:$0xff] }
 0x21e   :  { %v7212_v2 = vmax.f32 %v9897_v42, %v2350_v47  ;;  %v3318_v47 = vmax.f32 %v7155_v16, %v2910_v41  ;;  %v3771_v16 = vrot.slane %v3770_v37, 4  ;;  %v3758_v41 = vrot.slane %v3757_v50, 2  ;;  %9916 = vst [vmem:[#allocation47_spill] sm:$0xff] %v7268_v45 }
 0x21f   :  { %v7222_v20 = vmax.f32 %v9902_v24, %v2335_v55  ;;  %v7238_v55 = vmax.f32 %v9907_v39, %v2351_v27  ;;  %2070 = vrot.lane.b32.xlu0 %v9908_v7, %s5765_s3  ;;  %v9910_v24 = vmax.f32 %v9909_v21, 0.0  ;;  %v3787_v27 = vadd.f32 %v3786_v62, %v3785_v10  ;;  %v9912_v7 = vld [vmem:[#allocation52_spill] sm:$0xff]  ;;  %v2117_v10 = vpop.permute.xlu1 %2116 }
 0x220   :  { %v2954_v31 = vsel %vm2898_vm3, %v2909_v60, %v9911_v33  ;;  %v2912_v39 = vrot.slane %v7212_v2, 1  ;;  %v9913_v42 = vmax.f32 %v9912_v7, 0.0  ;;  %v2914_v3 = vrot.slane %v7226_v26, 1  ;;  %v9917_v7 = vld [vmem:[#allocation122_spill] sm:$0xff] }
 0x221   :  { %2224 = vrot.lane.b32.xlu1 %v9910_v24, %s5765_s3  ;;  %v7260_v24 = vpop.permute.xlu0 %2150  ;;  %v2911_v21 = vrot.slane %v7222_v20, 1  ;;  %v9915_v15 = vmax.f32 %v9914_v30, 0.0  ;;  %v3772_v62 = vadd.f32 %v3771_v16, %v3770_v37  ;;  %v7270_v60 = vmul.f32 %v3462_v25, %v3318_v47  ;;  %v7282_v30 = vld [vmem:[#allocation9 + $0x328] sm:$0xff]  ;;  %v9922_v37 = vld [vmem:[#allocation54_spill] sm:$0xff]  ;;  %v9924_v16 = vld [vmem:[#allocation55_spill] sm:$0xff] }
 0x222   :  { %v7258_v4 = vmax.f32 %v9913_v42, %v2352_v12  ;;  %v2915_v33 = vrot.slane %v7238_v55, 1  ;;  %v2365_v42 = vsel %vm2330_vm2, %v2115_v63, %v2117_v10  ;;  %v2366_v12 = vsel %vm2330_vm2, %v2117_v10, %v2119_v8  ;;  %9921 = vst [vmem:[#allocation48_spill] sm:$0xff] %v7282_v30  ;;  %v9926_v10 = vld [vmem:[#allocation107_spill] sm:$0xff] }
 0x223   :  { %v7266_v46 = vmax.f32 %v9915_v15, %v2337_v32  ;;  %v9918_v18 = vmax.f32 %v9917_v7, 0.0  ;;  %v7280_v32 = vld [vmem:[#allocation9 + $0x320] sm:$0xff]  ;;  %v3334_v15 = vmax.f32 %v7142_v53, %v2954_v31  ;;  %v9923_v47 = vmax.f32 %v9922_v37, 0.0  ;;  %v7300_v31 = vld [vmem:[#allocation9 + $0x3b0] sm:$0xff]  ;;  %v3478_v37 = vld [vmem:[#allocation8 + $0x98] sm:$0xff] }
 0x224   :  { %9920 = vst [vmem:[#allocation52_spill] sm:$0xff] %v7280_v32  ;;  %v9925_v63 = vmax.f32 %v9924_v16, 0.0  ;;  %v9927_v7 = vmax.f32 %v9926_v10, 0.0  ;;  %v3788_v59 = vrot.slane %v3787_v27, 2  ;;  %v2913_v23 = vsel %vm2898_vm3, %v2911_v21, %v2912_v39  ;;  %9928 = vst [vmem:[#allocation54_spill] sm:$0xff] %v7300_v31  ;;  %v7306_v16 = vpop.permute.xlu1 %2120  ;;  %v9933_v21 = vld [vmem:[#allocation110_spill] sm:$0xff] }
 0x225   :  { %2098 = vrot.lane.b32.xlu0 %v9918_v18, %s5765_s3  ;;  %v7287_v25 = vmax.f32 %v9923_v47, %v2365_v42  ;;  %v3759_v18 = vadd.f32 %v3758_v41, %v3757_v50  ;;  %v3773_v9 = vrot.slane %v3772_v62, 2  ;;  %v7298_v53 = vpop.permute.xlu0 %2178  ;;  %v7302_v42 = vld [vmem:[#allocation9 + $0x3b8] sm:$0xff]  ;;  %v2917_v41 = vrot.slane %v7266_v46, 1 }
 0x226   :  { %v7291_v56 = vmax.f32 %v9925_v63, %v2366_v12  ;;  %2252 = vrot.lane.b32.xlu1 %v9927_v7, %s5765_s3  ;;  %9929 = vst [vmem:[#allocation55_spill] sm:$0xff] %v7302_v42  ;;  %v2916_v7 = vsel %vm2898_vm3, %v2914_v3, %v2915_v33  ;;  %v2367_v51 = vsel %vm2330_vm2, %v2119_v8, %v7306_v16  ;;  %v9930_v12 = vmax.f32 %v9754_v61, 0.0  ;;  %v7329_v3 = vld [vmem:[#allocation9 + $0x330] sm:$0xff]  ;;  %v7331_v8 = vld [vmem:[#allocation9 + $0x338] sm:$0xff] }
 0x227   :  { %v3774_v63 = vadd.f32 %v3773_v9, %v3772_v62  ;;  %v3319_v47 = vmax.f32 %v7222_v20, %v2913_v23  ;;  %v3760_v10 = vrot.slane %v3759_v18, 1  ;;  %v9932_v50 = vmax.f32 %v9931_v6, 0.0  ;;  %9935 = vst [vmem:[#allocation56_spill] sm:$0xff] %v7329_v3  ;;  %9936 = vst [vmem:[#allocation154_spill] sm:$0xff] %v7331_v8  ;;  %v9949_v8 = vld [vmem:[#allocation28_spill] sm:$0xff] }
 0x228   :  { %v9934_v32 = vmax.f32 %v9933_v21, 0.0  ;;  %v3622_v62 = vmul.f32 %v3478_v37, %v3334_v15  ;;  %v9937_v23 = vrot.slane %v7258_v4, 1  ;;  %v3320_v21 = vmax.f32 %v7226_v26, %v2916_v7  ;;  %v2147_v37 = vpop.permute.xlu1 %2146 }
 0x229   :  { %2102 = vrot.lane.b32.xlu0 %v9930_v12, %s5765_s3  ;;  %v7322_v45 = vmax.f32 %v9932_v50, %v2367_v51  ;;  %v3463_v12 = vld [vmem:[#allocation8 + $0x20] sm:$0xff]  ;;  %v3775_v6 = vrot.slane %v3774_v63, 1  ;;  %v7336_v51 = vpop.permute.xlu0 %2182  ;;  %v3789_v50 = vadd.f32 %v3788_v59, %v3787_v27  ;;  %v9939_v61 = vrot.slane %v7291_v56, 1  ;;  %v9941_v27 = vld [vmem:[#allocation126_spill] sm:$0xff] }
 0x22a   :  { %2256 = vrot.lane.b32.xlu1 %v9934_v32, %s5765_s3  ;;  %v2919_v20 = vsel %vm2898_vm3, %v2917_v41, %v9937_v23  ;;  %v9938_v32 = vrot.slane %v7287_v25, 1  ;;  %v2394_v15 = vsel %vm2330_vm2, %v6797_v35, %v7298_v53  ;;  %v3464_v41 = vld [vmem:[#allocation8 + $0x28] sm:$0xff]  ;;  %v9940_v59 = vld [vmem:[#allocation139_spill] sm:$0xff]  ;;  %v9942_v7 = vmax.f32 %v9941_v27, 0.0 }
 0x22b   :  { %v2958_v31 = vsel %vm2898_vm3, %v2915_v33, %v9939_v61  ;;  %v3776_v23 = vadd.f32 %v3775_v6, %v3774_v63  ;;  %v2379_v26 = vsel %vm2330_vm2, %v9940_v59, %v2147_v37  ;;  %v7356_v61 = vld [vmem:[#allocation9 + $0x3c0] sm:$0xff]  ;;  %v7358_v33 = vld [vmem:[#allocation9 + $0x3c8] sm:$0xff]  ;;  %v7360_v35 = vmul.f32 %v3463_v12, %v3319_v47 }
 0x22c   :  { %v2956_v9 = vsel %vm2898_vm3, %v2912_v39, %v9938_v32  ;;  %9943 = vst [vmem:[#allocation139_spill] sm:$0xff] %v7356_v61  ;;  %9944 = vst [vmem:[#allocation155_spill] sm:$0xff] %v7358_v33  ;;  %v3321_v63 = vmax.f32 %v7266_v46, %v2919_v20  ;;  %v3761_v6 = vadd.f32 %v3760_v10, %v3759_v18  ;;  %v9945_v32 = vld [vmem:[#allocation24_spill] sm:$0xff]  ;;  %v9947_v59 = vld [vmem:[#allocation111_spill] sm:$0xff]  ;;  %v9950_v47 = vmax.f32 %v9949_v8, 0.0 }
 0x22d   :  { %2104 = vrot.lane.b32.xlu0 %v9942_v7, %s5765_s3  ;;  %v9946_v42 = vmax.f32 %v9945_v32, 0.0  ;;  %v9948_v27 = vmax.f32 %v9947_v59, 0.0  ;;  %v3465_v7 = vld [vmem:[#allocation8 + $0x30] sm:$0xff]  ;;  %v3335_v39 = vmax.f32 %v7212_v2, %v2956_v9  ;;  %v3336_v3 = vmax.f32 %v7238_v55, %v2958_v31  ;;  %4324 = vmatprep.mubr.f32.mxu0 %v3776_v23  ;;  %v7376_v46 = vpop.permute.xlu0 %2214  ;;  %v3480_v20 = vld [vmem:[#allocation8 + $0xa8] sm:$0xff]  ;;  %v2149_v2 = vpop.permute.xlu1 %2148  ;;  %v7384_v31 = vld [vmem:[#allocation9 + $0x340] sm:$0xff] }
 0x22e   :  { %v7374_v12 = vmax.f32 %v9950_v47, %v2394_v15  ;;  %v3790_v10 = vrot.slane %v3789_v50, 1  ;;  %v3608_v18 = vmul.f32 %v3464_v41, %v3320_v21  ;;  %4325 = vmatmul.mubr.f32.vlgmr.msra.gmra.mrb[80].mxu0 %v3761_v6  ;;  %9951 = vst [vmem:[#allocation24_spill] sm:$0xff] %v7384_v31  ;;  %v9952_v9 = vrot.slane %v7322_v45, 1  ;;  %v7401_v32 = vld [vmem:[#allocation9 + $0x348] sm:$0xff]  ;;  %v7403_v47 = vld [vmem:[#allocation9 + $0x3d0] sm:$0xff]  ;;  %v9963_v23 = vld [vmem:[#allocation59_spill] sm:$0xff] }
 0x22f   :  { %v7365_v30 = vmax.f32 %v9946_v42, %v2379_v26  ;;  %2284 = vrot.lane.b32.xlu1 %v9948_v27, %s5765_s3  ;;  %v3479_v42 = vld [vmem:[#allocation8 + $0xa0] sm:$0xff]  ;;  %v7379_v26 = vadd.f32 %v3622_v62, %v7270_v60  ;;  %v9953_v8 = vrot.slane %v7258_v4, 1  ;;  %v2380_v15 = vsel %vm2330_vm2, %v2147_v37, %v2149_v2  ;;  %9957 = vst [vmem:[#allocation28_spill] sm:$0xff] %v7401_v32  ;;  %v9961_v55 = vld [vmem:[#allocation57_spill] sm:$0xff] }
 0x230   :  { %v2381_v60 = vsel %vm2330_vm2, %v2149_v2, %v7260_v24  ;;  %v9954_v62 = vld [vmem:[#allocation127_spill] sm:$0xff]  ;;  %v9956_v6 = vpack.c.bf16 %v6825_v5, %v6823_v17  ;;  %9958 = vst [vmem:[#allocation156_spill] sm:$0xff] %v7403_v47  ;;  %v7407_v37 = vmul.f32 %v3465_v7, %v3321_v63  ;;  %v9960_v2 = vrot.slane %v7190_v1, 1  ;;  %v9965_v5 = vld [vmem:[#allocation113_spill] sm:$0xff] }
 0x231   :  { %v2985_v27 = vrot.slane %v7365_v30, 1  ;;  %v2960_v21 = vsel %vm2898_vm3, %v9953_v8, %v9952_v9  ;;  %v9955_v41 = vmax.f32 %v9954_v62, 0.0  ;;  %v7405_v9 = vld [vmem:[#allocation9 + $0x3d8] sm:$0xff]  ;;  %v9964_v59 = vmax.f32 %v9963_v23, 0.0  ;;  %v7423_v61 = vld [vmem:[#allocation9 + $0x350] sm:$0xff]  ;;  %v7428_v44 = vpop.permute.xlu0 %2242  ;;  %v7439_v23 = vld [vmem:[#allocation9 + $0x360] sm:$0xff] }
 0x232   :  { %5406 = vmatpush3.bf16.msra.mxu0 %v9956_v6  ;;  %9959 = vst [vmem:[#allocation157_spill] sm:$0xff] %v7405_v9  ;;  %v9966_v6 = vmax.f32 %v9965_v5, 0.0  ;;  %9967 = vst [vmem:[#allocation57_spill] sm:$0xff] %v7423_v61  ;;  %v7425_v63 = vld [vmem:[#allocation9 + $0x358] sm:$0xff]  ;;  %v3623_v7 = vmul.f32 %v3479_v42, %v3335_v39  ;;  %v3624_v33 = vmul.f32 %v3480_v20, %v3336_v3  ;;  %v7443_v39 = vpop.permute.xlu1 %2152  ;;  %v3481_v20 = vld [vmem:[#allocation8 + $0xb0] sm:$0xff] }
 0x233   :  { %2130 = vrot.lane.b32.xlu0 %v9955_v41, %s5765_s3  ;;  %v2986_v8 = vsel %vm2898_vm3, %v9960_v2, %v2985_v27  ;;  %v9962_v41 = vmax.f32 %v9961_v55, 0.0  ;;  %v7418_v17 = vmax.f32 %v9964_v59, %v2381_v60  ;;  %9968 = vst [vmem:[#allocation59_spill] sm:$0xff] %v7425_v63  ;;  %v9969_v55 = vpack.c.bf16 %v6898_v11, %v6889_v34  ;;  %v7437_v60 = vld [vmem:[#allocation9 + $0x3e8] sm:$0xff]  ;;  %v7465_v3 = vld [vmem:[#allocation9 + $0x370] sm:$0xff]  ;;  %v7467_v2 = vld [vmem:[#allocation9 + $0x378] sm:$0xff] }
 0x234   :  { %2288 = vrot.lane.b32.xlu1 %v9966_v6, %s5765_s3  ;;  %v7433_v59 = vadd.f32 %v3790_v10, %v3789_v50  ;;  %9971 = vst [vmem:[#allocation159_spill] sm:$0xff] %v7437_v60  ;;  %9972 = vst [vmem:[#allocation160_spill] sm:$0xff] %v7439_v23  ;;  %v7449_v11 = vld [vmem:[#allocation9 + $0x368] sm:$0xff]  ;;  %v7451_v50 = vld [vmem:[#allocation9 + $0x3f0] sm:$0xff]  ;;  %v3350_v6 = vmax.f32 %v7190_v1, %v2986_v8  ;;  %v9980_v1 = vrot.slane %v7374_v12, 1 }
 0x235   :  { %v7414_v62 = vmax.f32 %v9962_v41, %v2380_v15  ;;  %5408 = vmatprep.subr.bf16.mxu0 %v9969_v55  ;;  %v7435_v15 = vld [vmem:[#allocation9 + $0x3e0] sm:$0xff]  ;;  %v3337_v41 = vmax.f32 %v7258_v4, %v2960_v21  ;;  %9973 = vst [vmem:[#allocation161_spill] sm:$0xff] %v7449_v11  ;;  %9974 = vst [vmem:[#allocation162_spill] sm:$0xff] %v7451_v50  ;;  %v7453_v10 = vld [vmem:[#allocation9 + $0x3f8] sm:$0xff]  ;;  %v2382_v21 = vsel %vm2330_vm2, %v7260_v24, %v7443_v39 }
 0x236   :  { %9970 = vst [vmem:[#allocation158_spill] sm:$0xff] %v7435_v15  ;;  %9975 = vst [vmem:[#allocation163_spill] sm:$0xff] %v7453_v10  ;;  %v9976_v55 = vld [vmem:[#allocation129_spill] sm:$0xff]  ;;  %v3494_v5 = vld [vmem:[#allocation8 + $0x118] sm:$0xff]  ;;  %v7472_v8 = vsel %vm2898_vm3, %v2985_v27, %v9980_v1  ;;  %v9985_v61 = vpack.c.bf16 %v6902_v19, %v6900_v22  ;;  %v7488_v27 = vadd.f32 %v3623_v7, %v7360_v35  ;;  %v9988_v35 = vrot.slane %v7287_v25, 1  ;;  %v2181_v7 = vpop.permute.xlu1 %2180 }
 0x237   :  { %v9977_v42 = vmax.f32 %v9976_v55, 0.0  ;;  %9978 = vst [vmem:[#allocation164_spill] sm:$0xff] %v7465_v3  ;;  %9979 = vst [vmem:[#allocation165_spill] sm:$0xff] %v7467_v2  ;;  %v9981_v4 = vld [vmem:[#allocation60_spill] sm:$0xff]  ;;  %v9983_v55 = vld [vmem:[#allocation115_spill] sm:$0xff]  ;;  %v7490_v1 = vadd.f32 %v3624_v33, %v3608_v18  ;;  %v3625_v19 = vmul.f32 %v3481_v20, %v3337_v41  ;;  %v9990_v41 = vrot.slane %v7291_v56, 1 }
 0x238   :  { %v9982_v47 = vmax.f32 %v9981_v4, 0.0  ;;  %5410 = vmatpush3.bf16.msra.mxu0 %v9985_v61  ;;  %v9986_v4 = vpack.c.bf16 %v6960_v14, %v6958_v40  ;;  %v9987_v61 = vrot.slane %v7414_v62, 1  ;;  %v3366_v14 = vmax.f32 %v7365_v30, %v7472_v8  ;;  %v7523_v40 = vld [vmem:[#allocation9 + $0x488] sm:$0xff]  ;;  %v9993_v8 = vld [vmem:[#allocation62_spill] sm:$0xff]  ;;  %v10010_v2 = vld [vmem:[#allocation31_spill] sm:$0xff] }
 0x239   :  { %2134 = vrot.lane.b32.xlu0 %v9977_v42, %s5765_s3  ;;  %v9984_v42 = vmax.f32 %v9983_v55, 0.0  ;;  %v2395_v22 = vsel %vm2330_vm2, %v7298_v53, %v2181_v7  ;;  %v9992_v30 = vrot.slane %v7322_v45, 1  ;;  %v9994_v53 = vmax.f32 %v9993_v8, 0.0  ;;  %v3495_v55 = vld [vmem:[#allocation8 + $0x120] sm:$0xff]  ;;  %v7597_v10 = vld [vmem:[#allocation9 + $0x410] sm:$0xff] }
 0x23a   :  { %v7476_v24 = vmax.f32 %v9982_v47, %v2382_v21  ;;  %v7492_v47 = vpop.permute.xlu0 %2246  ;;  %5412 = vmatprep.subr.bf16.mxu0 %v9986_v4  ;;  %v2988_v33 = vsel %vm2898_vm3, %v9988_v35, %v9987_v61  ;;  %v9989_v4 = vrot.slane %v7418_v17, 1  ;;  %v9991_v61 = vmax.f32 %v6546_v58, 0.0  ;;  %v7521_v35 = vld [vmem:[#allocation9 + $0x480] sm:$0xff]  ;;  %v3497_v21 = vld [vmem:[#allocation8 + $0x130] sm:$0xff]  ;;  %10014 = vst [vmem:[#allocation60_spill] sm:$0xff] %v7597_v10 }
 0x23b   :  { %2316 = vrot.lane.b32.xlu1 %v9984_v42, %s5765_s3  ;;  %v3638_v42 = vmul.f32 %v3494_v5, %v3350_v6  ;;  %v2396_v6 = vsel %vm2330_vm2, %v2181_v7, %v7336_v51  ;;  %v9997_v63 = vpack.c.bf16 %v6976_v54, %v6974_v49  ;;  %v7543_v58 = vld [vmem:[#allocation9 + $0x400] sm:$0xff]  ;;  %v3351_v7 = vmax.f32 %v7287_v25, %v2988_v33  ;;  %v10000_v49 = vld [vmem:[#allocation26_spill] sm:$0xff]  ;;  %v10035_v11 = vld [vmem:[#allocation37_spill] sm:$0xff] }
 0x23c   :  { %v9513_v18 = vrot.slane %v7476_v24, 1  ;;  %v2990_v20 = vsel %vm2898_vm3, %v9990_v41, %v9989_v4  ;;  %v7534_v4 = vmax.f32 %v9994_v53, %v2395_v22  ;;  %v9995_v41 = vld [vmem:[#allocation117_spill] sm:$0xff]  ;;  %v2424_v22 = vsel %vm2330_vm2, %v6944_v13, %v7428_v44  ;;  %v9998_v53 = vld [vmem:[#allocation63_spill] sm:$0xff]  ;;  %v7564_v13 = vpop.permute.xlu1 %2184  ;;  %v10008_v3 = vld [vmem:[#allocation120_spill] sm:$0xff] }
 0x23d   :  { %2162 = vrot.lane.b32.xlu0 %v9991_v61, %s5765_s3  ;;  %v9996_v61 = vmax.f32 %v9995_v41, 0.0  ;;  %5414 = vmatpush3.bf16.msra.mxu0 %v9997_v63  ;;  %v10001_v63 = vpack.c.bf16 %v6982_v57, %v10000_v49  ;;  %v3837_v34 = vadd.f32 %v3625_v19, %v7407_v37  ;;  %v3352_v25 = vmax.f32 %v7291_v56, %v2990_v20  ;;  %v10002_v56 = vld [vmem:[#allocation132_spill] sm:$0xff]  ;;  %v10013_v50 = vld [vmem:[#allocation27_spill] sm:$0xff] }
 0x23e   :  { %v2992_v5 = vsel %vm2898_vm3, %v9992_v30, %v9513_v18  ;;  %v7545_v30 = vld [vmem:[#allocation9 + $0x408] sm:$0xff]  ;;  %v3510_v18 = vld [vmem:[#allocation8 + $0x198] sm:$0xff]  ;;  %v7556_v54 = vpop.permute.xlu0 %2278  ;;  %v2397_v37 = vsel %vm2330_vm2, %v7336_v51, %v7564_v13  ;;  %v10003_v19 = vmax.f32 %v10002_v56, 0.0  ;;  %v3793_v49 = vadd.f32 %v7379_v26, %v3638_v42 }
 0x23f   :  { %2320 = vrot.lane.b32.xlu1 %v9996_v61, %s5765_s3  ;;  %v3353_v8 = vmax.f32 %v7322_v45, %v2992_v5  ;;  %v9999_v61 = vmax.f32 %v9998_v53, 0.0  ;;  %5416 = vmatprep.subr.bf16.mxu0 %v10001_v63  ;;  %v7568_v5 = vld [vmem:[#allocation9 + $0x490] sm:$0xff]  ;;  %v3496_v53 = vld [vmem:[#allocation8 + $0x128] sm:$0xff]  ;;  %v10009_v51 = vmax.f32 %v10008_v3, 0.0  ;;  %v7599_v26 = vld [vmem:[#allocation9 + $0x418] sm:$0xff]  ;;  %v3654_v42 = vmul.f32 %v3510_v18, %v3366_v14 }
 0x240   :  { %v10004_v63 = vld [vmem:[#allocation36_spill] sm:$0xff]  ;;  %v10011_v56 = vld [vmem:[#allocation30_spill] sm:$0xff]  ;;  %v10050_v31 = vld [vmem:[#allocation67_spill] sm:$0xff] }
 0x241   :  { %v7554_v41 = vmax.f32 %v9999_v61, %v2396_v6  ;;  %v7570_v6 = vld [vmem:[#allocation9 + $0x498] sm:$0xff]  ;;  %v3641_v61 = vmul.f32 %v3497_v21, %v3353_v8  ;;  %2164 = vrot.lane.b32.xlu0 %v10003_v19, %s5765_s3  ;;  %v10005_v45 = vmax.f32 %v10004_v63, 0.0  ;;  %v10006_v21 = vld [vmem:[#allocation64_spill] sm:$0xff]  ;;  %v10012_v19 = vpack.c.bf16 %v10010_v2, %v10011_v56 }
 0x242   :  { %v10007_v8 = vmax.f32 %v10006_v21, 0.0  ;;  %v7601_v63 = vpop.permute.xlu0 %2306  ;;  %v10016_v21 = vld [vmem:[#allocation35_spill] sm:$0xff]  ;;  %v3640_v2 = vmul.f32 %v3496_v53, %v3352_v25  ;;  %v10018_v56 = vrot.slane %v7534_v4, 1  ;;  %v10022_v25 = vld [vmem:[#allocation44_spill] sm:$0xff]  ;;  %v7637_v3 = vadd.f32 %v3793_v49, %v3654_v42  ;;  %v10036_v49 = vld [vmem:[#allocation34_spill] sm:$0xff] }
 0x243   :  { %v7584_v33 = vmax.f32 %v10005_v45, %v2424_v22  ;;  %2068 = vrot.lane.b32.xlu1 %v10009_v51, %s5765_s3  ;;  %5418 = vmatpush3.bf16.msra.mxu0 %v10012_v19  ;;  %v3639_v22 = vmul.f32 %v3495_v55, %v3351_v7  ;;  %v3838_v45 = vadd.f32 %v3837_v34, %v3641_v61  ;;  %v10019_v19 = vrot.slane %v7414_v62, 1  ;;  %v2211_v55 = vpop.permute.xlu1 %2210  ;;  %v7633_v51 = vld [vmem:[#allocation9 + $0x4a0] sm:$0xff]  ;;  %v7635_v18 = vld [vmem:[#allocation9 + $0x4a8] sm:$0xff] }
 0x244   :  { %v7588_v57 = vmax.f32 %v10007_v8, %v2397_v37  ;;  %v10015_v37 = vld [vmem:[#allocation33_spill] sm:$0xff]  ;;  %v2454_v34 = vsel %vm2330_vm2, %v7102_v48, %v7601_v63  ;;  %v10020_v14 = vrot.slane %v7554_v41, 1  ;;  %v10021_v7 = vrot.slane %v7418_v17, 1  ;;  %10027 = vst [vmem:[#allocation62_spill] sm:$0xff] %v7633_v51  ;;  %10028 = vst [vmem:[#allocation63_spill] sm:$0xff] %v7635_v18  ;;  %v10033_v48 = vld [vmem:[#allocation124_spill] sm:$0xff] }
 0x245   :  { %v10017_v8 = vpack.c.bf16 %v10015_v37, %v10016_v21  ;;  %v3020_v20 = vsel %vm2898_vm3, %v10019_v19, %v10018_v56  ;;  %v10023_v53 = vmax.f32 %v10022_v25, 0.0  ;;  %v10024_v21 = vld [vmem:[#allocation23_spill] sm:$0xff]  ;;  %v10025_v56 = vld [vmem:[#allocation136_spill] sm:$0xff]  ;;  %v10030_v25 = vrot.slane %v7476_v24, 1  ;;  %v7703_v18 = vld [vmem:[#allocation9 + $0x430] sm:$0xff] }
 0x246   :  { %v3022_v61 = vsel %vm2898_vm3, %v10021_v7, %v10020_v14  ;;  %v10026_v19 = vmax.f32 %v10025_v56, 0.0  ;;  %v10029_v7 = vrot.slane %v7588_v57, 1  ;;  %v10034_v23 = vmax.f32 %v10033_v48, 0.0  ;;  %v3511_v48 = vld [vmem:[#allocation8 + $0x1a0] sm:$0xff]  ;;  %v7701_v51 = vld [vmem:[#allocation9 + $0x4b8] sm:$0xff]  ;;  %10055 = vst [vmem:[#allocation30_spill] sm:$0xff] %v7703_v18 }
 0x247   :  { %5420 = vmatprep.subr.bf16.mxu0 %v10017_v8  ;;  %v7624_v37 = vmax.f32 %v10023_v53, %v2454_v34  ;;  %v2409_v8 = vsel %vm2330_vm2, %v10024_v21, %v2211_v55  ;;  %v3513_v34 = vld [vmem:[#allocation8 + $0x1b0] sm:$0xff]  ;;  %v10031_v21 = vld [vmem:[#allocation32_spill] sm:$0xff]  ;;  %v10037_v42 = vpack.c.bf16 %v10035_v11, %v10036_v49  ;;  %v3808_v14 = vadd.f32 %v7488_v27, %v3639_v22  ;;  %v2213_v27 = vpop.permute.xlu1 %2212 }
 0x248   :  { %2194 = vrot.lane.b32.xlu0 %v10026_v19, %s5765_s3  ;;  %v3024_v53 = vsel %vm2898_vm3, %v10030_v25, %v10029_v7  ;;  %v10032_v19 = vmax.f32 %v10031_v21, 0.0  ;;  %2072 = vrot.lane.b32.xlu1 %v10034_v23, %s5765_s3  ;;  %v3367_v15 = vmax.f32 %v7414_v62, %v3020_v20  ;;  %v7659_v25 = vpop.permute.xlu0 %2310  ;;  %v10039_v21 = vld [vmem:[#allocation38_spill] sm:$0xff]  ;;  %v3823_v23 = vadd.f32 %v7490_v1, %v3640_v2  ;;  %v7671_v20 = vld [vmem:[#allocation9 + $0x428] sm:$0xff] }
 0x249   :  { %5422 = vmatpush3.bf16.msra.mxu0 %v10037_v42  ;;  %v3369_v60 = vmax.f32 %v7476_v24, %v3024_v53  ;;  %v9522_v7 = vrot.slane %v7624_v37, 1  ;;  %v3368_v11 = vmax.f32 %v7418_v17, %v3022_v61  ;;  %v7669_v24 = vld [vmem:[#allocation9 + $0x420] sm:$0xff]  ;;  %10042 = vst [vmem:[#allocation36_spill] sm:$0xff] %v7671_v20  ;;  %v3512_v22 = vld [vmem:[#allocation8 + $0x1a8] sm:$0xff]  ;;  %v3590_v42 = vld [vmem:[#allocation8 + $0x418] sm:$0x7f]  ;;  %v2410_v2 = vsel %vm2330_vm2, %v2211_v55, %v2213_v27 }
 0x24a   :  { %v7647_v56 = vmax.f32 %v10032_v19, %v2409_v8  ;;  %v10038_v8 = vld [vmem:[#allocation152_spill] sm:$0xff]  ;;  %10041 = vst [vmem:[#allocation26_spill] sm:$0xff] %v7669_v24  ;;  %v2411_v17 = vsel %vm2330_vm2, %v2213_v27, %v7376_v46  ;;  %v10051_v27 = vmax.f32 %v10050_v31, 0.0  ;;  %10054 = vst [vmem:[#allocation31_spill] sm:$0xff] %v7701_v51  ;;  %v3655_v10 = vmul.f32 %v3511_v48, %v3367_v15  ;;  %v10057_v31 = vld [vmem:[#allocation43_spill] sm:$0xff] }
 0x24b   :  { %v10040_v19 = vpack.c.bf16 %v10038_v8, %v10039_v21  ;;  %v3657_v53 = vmul.f32 %v3513_v34, %v3369_v60  ;;  %v3446_v1 = vmax.f32 %v7624_v37, %v9522_v7  ;;  %v10043_v61 = vld [vmem:[#allocation140_spill] sm:$0xff]  ;;  %v7682_v21 = vld [vmem:[#allocation9 + $0x4b0] sm:$0xff]  ;;  %v10047_v34 = vrot.slane %v7584_v33, 1 }
 0x24c   :  { %v3049_v49 = vrot.slane %v7647_v56, 1  ;;  %v10044_v8 = vmax.f32 %v10043_v61, 0.0  ;;  %10045 = vst [vmem:[#allocation64_spill] sm:$0xff] %v7682_v21  ;;  %v10048_v7 = vld [vmem:[#allocation65_spill] sm:$0xff]  ;;  %v7696_v32 = vmax.f32 %v10051_v27, %v2411_v17  ;;  %v10058_v17 = vpack.c.bf16 %v7076_v29, %v10057_v31  ;;  %v7727_v29 = vld [vmem:[#allocation9 + $0x4c0] sm:$0xff] }
 0x24d   :  { %5424 = vmatprep.subr.bf16.mxu0 %v10040_v19  ;;  %v10046_v19 = vrot.slane %v7374_v12, 1  ;;  %v10049_v9 = vmax.f32 %v10048_v7, 0.0  ;;  %v3526_v7 = vld [vmem:[#allocation8 + $0x218] sm:$0xff]  ;;  %10060 = vst [vmem:[#allocation35_spill] sm:$0xff] %v7727_v29  ;;  %v7729_v48 = vld [vmem:[#allocation9 + $0x4c8] sm:$0xff]  ;;  %v3527_v21 = vld [vmem:[#allocation8 + $0x220] sm:$0xff] }
 0x24e   :  { %2226 = vrot.lane.b32.xlu0 %v10044_v8, %s5765_s3  ;;  %v3082_v62 = vsel %vm2898_vm3, %v3049_v49, %v10047_v34  ;;  %v10052_v8 = vld [vmem:[#allocation123_spill] sm:$0xff]  ;;  %5426 = vmatpush3.bf16.msra.mxu0 %v10058_v17  ;;  %v3656_v34 = vmul.f32 %v3512_v22, %v3368_v11  ;;  %10061 = vst [vmem:[#allocation44_spill] sm:$0xff] %v7729_v48  ;;  %v10062_v22 = vld [vmem:[#allocation144_spill] sm:$0xff] }
 0x24f   :  { %v3050_v60 = vsel %vm2898_vm3, %v10046_v19, %v3049_v49  ;;  %v7692_v55 = vmax.f32 %v10049_v9, %v2410_v2  ;;  %v10053_v61 = vmax.f32 %v10052_v8, 0.0  ;;  %v7705_v19 = vld [vmem:[#allocation9 + $0x438] sm:$0xff]  ;;  %v7707_v49 = vadd.f32 %v3838_v45, %v3657_v53  ;;  %v7710_v2 = vpop.permute.xlu0 %2058  ;;  %v7722_v45 = vpop.permute.xlu1 %2216  ;;  %v7739_v17 = vld [vmem:[#allocation9 + $0x440] sm:$0xff] }
 0x250   :  { %10056 = vst [vmem:[#allocation33_spill] sm:$0xff] %v7705_v19  ;;  %v3382_v9 = vmax.f32 %v7374_v12, %v3050_v60  ;;  %v9531_v8 = vrot.slane %v7696_v32, 1  ;;  %v2338_v15 = vsel %vm2330_vm2, %v7159_v36, %v7710_v2  ;;  %v10059_v12 = vpack.c.bf16 %v7132_v28, %v7130_v38  ;;  %10064 = vst [vmem:[#allocation23_spill] sm:$0xff] %v7739_v17  ;;  %v7741_v38 = vld [vmem:[#allocation9 + $0x448] sm:$0xff]  ;;  %v3542_v28 = vld [vmem:[#allocation8 + $0x298] sm:$0xff] }
 0x251   :  { %2100 = vrot.lane.b32.xlu1 %v10053_v61, %s5765_s3  ;;  %v9529_v27 = vrot.slane %v7692_v55, 1  ;;  %v3734_v53 = vmul.f32 %v3590_v42, %v3446_v1  ;;  %v3398_v11 = vmax.f32 %v7647_v56, %v3082_v62  ;;  %v10063_v60 = vmax.f32 %v10062_v22, 0.0  ;;  %10065 = vst [vmem:[#allocation32_spill] sm:$0xff] %v7741_v38  ;;  %v10068_v31 = vld [vmem:[#allocation128_spill] sm:$0xff] }
 0x252   :  { %5428 = vmatprep.subr.bf16.mxu0 %v10059_v12  ;;  %v3670_v12 = vmul.f32 %v3526_v7, %v3382_v9  ;;  %v10066_v56 = vrot.slane %v7534_v4, 1  ;;  %v10067_v42 = vrot.slane %v7554_v41, 1  ;;  %v10069_v36 = vmax.f32 %v10068_v31, 0.0  ;;  %v7759_v7 = vld [vmem:[#allocation9 + $0x4d0] sm:$0xff]  ;;  %v7761_v9 = vld [vmem:[#allocation9 + $0x4d8] sm:$0xff]  ;;  %v3544_v38 = vld [vmem:[#allocation8 + $0x2a8] sm:$0xff] }
 0x253   :  { %2258 = vrot.lane.b32.xlu0 %v10063_v60, %s5765_s3  ;;  %v2412_v60 = vsel %vm2330_vm2, %v7376_v46, %v7722_v45  ;;  %10070 = vst [vmem:[#allocation37_spill] sm:$0xff] %v7759_v7  ;;  %10071 = vst [vmem:[#allocation34_spill] sm:$0xff] %v7761_v9  ;;  %v7763_v61 = vadd.f32 %v3808_v14, %v3655_v10  ;;  %v10075_v46 = vld [vmem:[#allocation39_spill] sm:$0xff]  ;;  %v3824_v31 = vadd.f32 %v3823_v23, %v3656_v34  ;;  %v10077_v14 = vld [vmem:[#allocation68_spill] sm:$0xff] }
 0x254   :  { %v3052_v62 = vsel %vm2898_vm3, %v10066_v56, %v9529_v27  ;;  %v3054_v1 = vsel %vm2898_vm3, %v10067_v42, %v9531_v8  ;;  %v10072_v27 = vld [vmem:[#allocation50_spill] sm:$0xff]  ;;  %v7770_v42 = vpop.permute.xlu0 %2062  ;;  %v10074_v8 = vld [vmem:[#allocation41_spill] sm:$0xff]  ;;  %v10078_v51 = vmax.f32 %v10077_v14, 0.0  ;;  %v7792_v23 = vsel %vm2898_vm3, %v3734_v53, 0.0 }
 0x255   :  { %2132 = vrot.lane.b32.xlu1 %v10069_v36, %s5765_s3  ;;  %v3383_v56 = vmax.f32 %v7534_v4, %v3052_v62  ;;  %v10073_v22 = vmax.f32 %v10072_v27, 0.0  ;;  %v10076_v19 = vpack.c.bf16 %v10074_v8, %v10075_v46  ;;  %v3384_v10 = vmax.f32 %v7554_v41, %v3054_v1  ;;  %v2245_v27 = vpop.permute.xlu1 %2244  ;;  %v7789_v46 = vld [vmem:[#allocation9 + $0x458] sm:$0xff]  ;;  %v3528_v34 = vld [vmem:[#allocation8 + $0x228] sm:$0xff] }
 0x256   :  { %v7780_v4 = vmax.f32 %v10078_v51, %v2412_v60  ;;  %10083 = vst [vmem:[#allocation38_spill] sm:$0xff] %v7789_v46  ;;  %v3686_v41 = vmul.f32 %v3542_v28, %v3398_v11  ;;  %v2425_v51 = vsel %vm2330_vm2, %v7428_v44, %v2245_v27  ;;  %v10084_v1 = vld [vmem:[#allocation146_spill] sm:$0xff]  ;;  %v2426_v53 = vsel %vm2330_vm2, %v2245_v27, %v7492_v47  ;;  %v10088_v44 = vld [vmem:[#allocation133_spill] sm:$0xff] }
 0x257   :  { %v7768_v18 = vmax.f32 %v10073_v22, %v2338_v15  ;;  %5430 = vmatpush3.bf16.msra.mxu0 %v10076_v19  ;;  %v10079_v15 = vld [vmem:[#allocation42_spill] sm:$0xff]  ;;  %v10080_v22 = vld [vmem:[#allocation45_spill] sm:$0xff]  ;;  %v10085_v60 = vmax.f32 %v10084_v1, 0.0  ;;  %v10089_v8 = vmax.f32 %v10088_v44, 0.0  ;;  %v3671_v36 = vmul.f32 %v3527_v21, %v3383_v56  ;;  %v10090_v1 = vld [vmem:[#allocation71_spill] sm:$0xff] }
 0x258   :  { %v10081_v62 = vpack.c.bf16 %v10079_v15, %v10080_v22  ;;  %v7787_v19 = vld [vmem:[#allocation9 + $0x450] sm:$0xff]  ;;  %v3795_v15 = vadd.f32 %v7637_v3, %v3670_v12  ;;  %v3055_v22 = vrot.slane %v7780_v4, 1  ;;  %v10091_v14 = vmax.f32 %v10090_v1, 0.0  ;;  %v7817_v3 = vpop.permute.xlu0 %2090  ;;  %v10092_v12 = vld [vmem:[#allocation131_spill] sm:$0xff] }
 0x259   :  { %10082 = vst [vmem:[#allocation152_spill] sm:$0xff] %v7787_v19  ;;  %2290 = vrot.lane.b32.xlu0 %v10085_v60, %s5765_s3  ;;  %2136 = vrot.lane.b32.xlu1 %v10089_v8, %s5765_s3  ;;  %v2920_v60 = vrot.slane %v7768_v18, 1  ;;  %v10093_v9 = vld [vmem:[#allocation118_spill] sm:$0xff]  ;;  %v3672_v21 = vmul.f32 %v3528_v34, %v3384_v10  ;;  %v10097_v8 = vrot.slane %v7588_v57, 1  ;;  %v10100_v34 = vld [vmem:[#allocation53_spill] sm:$0xff] }
 0x25a   :  { %5432 = vmatprep.subr.bf16.mxu0 %v10081_v62  ;;  %v10086_v62 = vld [vmem:[#allocation70_spill] sm:$0xff]  ;;  %v7815_v7 = vmax.f32 %v10091_v14, %v2426_v53  ;;  %v10094_v27 = vpack.c.bf16 %v10092_v12, %v10093_v9  ;;  %v7835_v12 = vpop.permute.xlu1 %2248  ;;  %v10101_v44 = vmax.f32 %v10100_v34, 0.0  ;;  %v7852_v14 = vld [vmem:[#allocation9 + $0x460] sm:$0xff] }
 0x25b   :  { %v10087_v11 = vmax.f32 %v10086_v62, 0.0  ;;  %v7824_v62 = vld [vmem:[#allocation9 + $0x4e0] sm:$0xff]  ;;  %v3529_v56 = vld [vmem:[#allocation8 + $0x230] sm:$0xff]  ;;  %v3056_v1 = vsel %vm2898_vm3, %v10097_v8, %v3055_v22  ;;  %v2427_v8 = vsel %vm2330_vm2, %v7492_v47, %v7835_v12  ;;  %10103 = vst [vmem:[#allocation43_spill] sm:$0xff] %v7852_v14 }
 0x25c   :  { %5434 = vmatpush3.bf16.msra.mxu0 %v10094_v27  ;;  %10095 = vst [vmem:[#allocation65_spill] sm:$0xff] %v7824_v62  ;;  %v10098_v53 = vld [vmem:[#allocation46_spill] sm:$0xff]  ;;  %v10099_v27 = vpack.c.bf16 %v7523_v40, %v7521_v35  ;;  %v7854_v40 = vadd.f32 %v3795_v15, %v3686_v41  ;;  %v3543_v35 = vld [vmem:[#allocation8 + $0x2a0] sm:$0xff]  ;;  %v7870_v41 = vld [vmem:[#allocation9 + $0x468] sm:$0xff] }
 0x25d   :  { %v7807_v28 = vmax.f32 %v10087_v11, %v2425_v51  ;;  %v7826_v11 = vld [vmem:[#allocation9 + $0x4e8] sm:$0xff]  ;;  %v2353_v9 = vsel %vm2330_vm2, %v10098_v53, %v7817_v3  ;;  %v3385_v51 = vmax.f32 %v7588_v57, %v3056_v1  ;;  %v10102_v53 = vmax.f32 %v6769_v52, 0.0  ;;  %v10108_v47 = vld [vmem:[#allocation134_spill] sm:$0xff]  ;;  %v7872_v15 = vld [vmem:[#allocation9 + $0x580] sm:$0xff] }
 0x25e   :  { %10096 = vst [vmem:[#allocation67_spill] sm:$0xff] %v7826_v11  ;;  %5468 = vmatprep.subr.bf16.mxu0 %v10099_v27  ;;  %v7844_v19 = vmax.f32 %v10101_v44, %v2353_v9  ;;  %v10105_v1 = vrot.slane %v7692_v55, 1  ;;  %v10106_v9 = vld [vmem:[#allocation72_spill] sm:$0xff]  ;;  %v10109_v10 = vmax.f32 %v10108_v47, 0.0  ;;  %v7887_v47 = vld [vmem:[#allocation9 + $0x4f8] sm:$0xff] }
 0x25f   :  { %2322 = vrot.lane.b32.xlu0 %v10102_v53, %s5765_s3  ;;  %v10104_v57 = vrot.slane %v7807_v28, 1  ;;  %v10107_v27 = vmax.f32 %v10106_v9, 0.0  ;;  %v7874_v52 = vld [vmem:[#allocation9 + $0x588] sm:$0xff]  ;;  %v3673_v46 = vmul.f32 %v3529_v56, %v3385_v51  ;;  %v7885_v53 = vld [vmem:[#allocation9 + $0x4f0] sm:$0xff]  ;;  %10113 = vst [vmem:[#allocation41_spill] sm:$0xff] %v7887_v47  ;;  %v7889_v62 = vld [vmem:[#allocation9 + $0x500] sm:$0xff]  ;;  %v3810_v51 = vadd.f32 %v7763_v61, %v3671_v36 }
 0x260   :  { %2166 = vrot.lane.b32.xlu1 %v10109_v10, %s5765_s3  ;;  %10112 = vst [vmem:[#allocation50_spill] sm:$0xff] %v7885_v53  ;;  %10114 = vst [vmem:[#allocation39_spill] sm:$0xff] %v7889_v62  ;;  %v3825_v56 = vadd.f32 %v3824_v31, %v3672_v21  ;;  %v10118_v29 = vrot.slane %v7844_v19, 1  ;;  %v10119_v61 = vld [vmem:[#allocation29_spill] sm:$0xff] }
 0x261   :  { %v3084_v44 = vsel %vm2898_vm3, %v10105_v1, %v10104_v57  ;;  %v7863_v34 = vmax.f32 %v10107_v27, %v2427_v8  ;;  %v10110_v57 = vrot.slane %v7815_v7, 1  ;;  %v10111_v1 = vrot.slane %v7696_v32, 1  ;;  %v7883_v27 = vpop.permute.xlu0 %2094  ;;  %v3561_v53 = vld [vmem:[#allocation8 + $0x330] sm:$0xff] }
 0x262   :  { %v3399_v9 = vmax.f32 %v7692_v55, %v3084_v44  ;;  %v7896_v55 = vld [vmem:[#allocation9 + $0x470] sm:$0xff]  ;;  %v7898_v44 = vld [vmem:[#allocation9 + $0x478] sm:$0xff]  ;;  %v3840_v10 = vadd.f32 %v7707_v49, %v3673_v46  ;;  %v2922_v48 = vsel %vm2898_vm3, %v2920_v60, %v10118_v29  ;;  %v10122_v46 = vld [vmem:[#allocation40_spill] sm:$0xff] }
 0x263   :  { %v3086_v8 = vsel %vm2898_vm3, %v10111_v1, %v10110_v57  ;;  %v9549_v17 = vrot.slane %v7863_v34, 1  ;;  %v2275_v57 = vpop.permute.xlu1 %2274  ;;  %v7894_v1 = vld [vmem:[#allocation9 + $0x508] sm:$0xff]  ;;  %10116 = vst [vmem:[#allocation42_spill] sm:$0xff] %v7896_v55  ;;  %10117 = vst [vmem:[#allocation45_spill] sm:$0xff] %v7898_v44  ;;  %v10123_v24 = vmax.f32 %v10122_v46, 0.0  ;;  %v3322_v46 = vmax.f32 %v7768_v18, %v2922_v48  ;;  %v7947_v48 = vld [vmem:[#allocation9 + $0x590] sm:$0xff] }
 0x264   :  { %v3400_v11 = vmax.f32 %v7696_v32, %v3086_v8  ;;  %10115 = vst [vmem:[#allocation68_spill] sm:$0xff] %v7894_v1  ;;  %v2439_v31 = vsel %vm2330_vm2, %v10119_v61, %v2275_v57  ;;  %v10120_v32 = vld [vmem:[#allocation135_spill] sm:$0xff]  ;;  %v3545_v8 = vld [vmem:[#allocation8 + $0x2b0] sm:$0xff]  ;;  %v3687_v21 = vmul.f32 %v3543_v35, %v3399_v9  ;;  %10130 = vst [vmem:[#allocation70_spill] sm:$0xff] %v7947_v48 }
 0x265   :  { %v10121_v36 = vmax.f32 %v10120_v32, 0.0  ;;  %v3088_v49 = vsel %vm2898_vm3, %v3055_v22, %v9549_v17  ;;  %v7916_v20 = vmax.f32 %v10123_v24, %v2439_v31  ;;  %v10124_v29 = vld [vmem:[#allocation137_spill] sm:$0xff]  ;;  %v7926_v14 = vpop.permute.xlu0 %2122  ;;  %v10136_v17 = vld [vmem:[#allocation75_spill] sm:$0xff] }
 0x266   :  { %v10125_v60 = vmax.f32 %v10124_v29, 0.0  ;;  %v3401_v32 = vmax.f32 %v7780_v4, %v3088_v49  ;;  %v3688_v31 = vmul.f32 %v3544_v38, %v3400_v11  ;;  %v10126_v4 = vld [vmem:[#allocation58_spill] sm:$0xff]  ;;  %v10138_v29 = vld [vmem:[#allocation143_spill] sm:$0xff]  ;;  %v7968_v1 = vadd.f32 %v3810_v51, %v3687_v21  ;;  %v8020_v48 = vld [vmem:[#allocation9 + $0x5a8] sm:$0xff] }
 0x267   :  { %2168 = vrot.lane.b32.xlu0 %v10121_v36, %s5765_s3  ;;  %v2368_v36 = vsel %vm2330_vm2, %v7306_v16, %v7926_v14  ;;  %v2277_v35 = vpop.permute.xlu1 %2276  ;;  %v10127_v49 = vmax.f32 %v10126_v4, 0.0  ;;  %v10128_v38 = vld [vmem:[#allocation138_spill] sm:$0xff]  ;;  %v10134_v4 = vld [vmem:[#allocation73_spill] sm:$0xff]  ;;  %v10139_v62 = vmax.f32 %v10138_v29, 0.0  ;;  %10152 = vst [vmem:[#allocation53_spill] sm:$0xff] %v8020_v48 }
 0x268   :  { %2196 = vrot.lane.b32.xlu1 %v10125_v60, %s5765_s3  ;;  %v3113_v60 = vrot.slane %v7916_v20, 1  ;;  %v3689_v9 = vmul.f32 %v3545_v8, %v3401_v32  ;;  %v2440_v22 = vsel %vm2330_vm2, %v2275_v57, %v2277_v35  ;;  %v2441_v24 = vsel %vm2330_vm2, %v2277_v35, %v7556_v54  ;;  %v7949_v11 = vld [vmem:[#allocation9 + $0x598] sm:$0xff]  ;;  %v10149_v29 = vld [vmem:[#allocation17_spill] sm:$0xff] }
 0x269   :  { %v7939_v61 = vmax.f32 %v10127_v49, %v2368_v36  ;;  %v10129_v18 = vmax.f32 %v10128_v38, 0.0  ;;  %10131 = vst [vmem:[#allocation71_spill] sm:$0xff] %v7949_v11  ;;  %v3558_v16 = vld [vmem:[#allocation8 + $0x318] sm:$0xff]  ;;  %v10132_v32 = vrot.slane %v7584_v33, 1  ;;  %v10133_v36 = vrot.slane %v7624_v37, 1 }
 0x26a   :  { %v10135_v49 = vmax.f32 %v10134_v4, 0.0  ;;  %v10137_v38 = vmax.f32 %v10136_v17, 0.0  ;;  %v7970_v55 = vadd.f32 %v3840_v10, %v3689_v9  ;;  %v3574_v17 = vld [vmem:[#allocation8 + $0x398] sm:$0xff] }
 0x26b   :  { %2198 = vrot.lane.b32.xlu0 %v10129_v18, %s5765_s3  ;;  %v3114_v8 = vsel %vm2898_vm3, %v10132_v32, %v3113_v60  ;;  %v3146_v57 = vsel %vm2898_vm3, %v3113_v60, %v10133_v36  ;;  %v9553_v60 = vrot.slane %v7939_v61, 1  ;;  %v7974_v32 = vpop.permute.xlu0 %2126  ;;  %v3466_v36 = vld [vmem:[#allocation8 + $0x38] sm:$0xff]  ;;  %v7980_v4 = vpop.permute.xlu1 %2280 }
 0x26c   :  { %v7959_v35 = vmax.f32 %v10135_v49, %v2440_v22  ;;  %v7963_v18 = vmax.f32 %v10137_v38, %v2441_v24  ;;  %2200 = vrot.lane.b32.xlu1 %v10139_v62, %s5765_s3  ;;  %v3414_v37 = vmax.f32 %v7584_v33, %v3114_v8  ;;  %v7976_v22 = vadd.f32 %v3825_v56, %v3688_v31  ;;  %v3482_v51 = vld [vmem:[#allocation8 + $0xb8] sm:$0xff]  ;;  %v7996_v49 = vld [vmem:[#allocation9 + $0x510] sm:$0xff] }
 0x26d   :  { %v3430_v10 = vmax.f32 %v7916_v20, %v3146_v57  ;;  %v10140_v56 = vrot.slane %v7844_v19, 1  ;;  %v2442_v31 = vsel %vm2330_vm2, %v7556_v54, %v7980_v4  ;;  %v10141_v9 = vld [vmem:[#allocation142_spill] sm:$0xff]  ;;  %10143 = vst [vmem:[#allocation131_spill] sm:$0xff] %v7996_v49  ;;  %v10145_v57 = vrot.slane %v7807_v28, 1 }
 0x26e   :  { %v9556_v24 = vrot.slane %v7959_v35, 1  ;;  %v9558_v38 = vrot.slane %v7963_v18, 1  ;;  %v3702_v33 = vmul.f32 %v3558_v16, %v3414_v37  ;;  %v10142_v8 = vmax.f32 %v10141_v9, 0.0  ;;  %v7998_v62 = vld [vmem:[#allocation9 + $0x518] sm:$0xff]  ;;  %v3559_v16 = vld [vmem:[#allocation8 + $0x320] sm:$0xff] }
 0x26f   :  { %v2962_v21 = vsel %vm2898_vm3, %v10140_v56, %v9553_v60  ;;  %10144 = vst [vmem:[#allocation118_spill] sm:$0xff] %v7998_v62  ;;  %v10146_v54 = vrot.slane %v7815_v7, 1  ;;  %v3610_v11 = vmul.f32 %v3466_v36, %v3322_v46  ;;  %v2309_v36 = vpop.permute.xlu1 %2308 }
 0x270   :  { %2228 = vrot.lane.b32.xlu0 %v10142_v8, %s5765_s3  ;;  %v3338_v20 = vmax.f32 %v7844_v19, %v2962_v21  ;;  %v3116_v37 = vsel %vm2898_vm3, %v10145_v57, %v9556_v24  ;;  %v10147_v8 = vld [vmem:[#allocation76_spill] sm:$0xff]  ;;  %v10150_v19 = vmax.f32 %v10149_v29, 0.0  ;;  %v3797_v57 = vadd.f32 %v7854_v40, %v3702_v33  ;;  %v10153_v33 = vld [vmem:[#allocation61_spill] sm:$0xff] }
 0x271   :  { %v3118_v56 = vsel %vm2898_vm3, %v10146_v54, %v9558_v38  ;;  %v10148_v60 = vmax.f32 %v10147_v8, 0.0  ;;  %v8018_v21 = vld [vmem:[#allocation9 + $0x5a0] sm:$0xff]  ;;  %v3415_v24 = vmax.f32 %v7807_v28, %v3116_v37  ;;  %v8025_v54 = vpop.permute.xlu0 %2154  ;;  %v3560_v38 = vld [vmem:[#allocation8 + $0x328] sm:$0xff]  ;;  %v3718_v40 = vmul.f32 %v3574_v17, %v3430_v10 }
 0x272   :  { %2230 = vrot.lane.b32.xlu1 %v10150_v19, %s5765_s3  ;;  %10151 = vst [vmem:[#allocation46_spill] sm:$0xff] %v8018_v21  ;;  %v3416_v44 = vmax.f32 %v7815_v7, %v3118_v56  ;;  %v8027_v8 = vld [vmem:[#allocation9 + $0x520] sm:$0xff]  ;;  %v2383_v46 = vsel %vm2330_vm2, %v7443_v39, %v8025_v54  ;;  %v10154_v37 = vmax.f32 %v10153_v33, 0.0  ;;  %v10155_v29 = vld [vmem:[#allocation21_spill] sm:$0xff]  ;;  %v8048_v39 = vld [vmem:[#allocation9 + $0x5b8] sm:$0xff]  ;;  %v10158_v17 = vrot.slane %v7863_v34, 1 }
 0x273   :  { %v8013_v9 = vmax.f32 %v10148_v60, %v2442_v31  ;;  %v8029_v60 = vld [vmem:[#allocation9 + $0x528] sm:$0xff]  ;;  %v3626_v31 = vmul.f32 %v3482_v51, %v3338_v20  ;;  %v3703_v7 = vmul.f32 %v3559_v16, %v3415_v24  ;;  %v10156_v51 = vmax.f32 %v10155_v29, 0.0  ;;  %v8046_v19 = vld [vmem:[#allocation9 + $0x5b0] sm:$0xff] }
 0x274   :  { %v8039_v56 = vmax.f32 %v10154_v37, %v2383_v46  ;;  %v2455_v10 = vsel %vm2330_vm2, %v7601_v63, %v2309_v36  ;;  %v2456_v16 = vsel %vm2330_vm2, %v2309_v36, %v7659_v25  ;;  %v10159_v46 = vld [vmem:[#allocation19_spill] sm:$0xff]  ;;  %v3704_v20 = vmul.f32 %v3560_v38, %v3416_v44  ;;  %v10161_v63 = vld [vmem:[#allocation78_spill] sm:$0xff] }
 0x275   :  { %2232 = vrot.lane.b32.xlu0 %v10156_v51, %s5765_s3  ;;  %v10157_v28 = vrot.slane %v8013_v9, 1  ;;  %v10160_v33 = vmax.f32 %v10159_v46, 0.0  ;;  %v3798_v51 = vadd.f32 %v3797_v57, %v3718_v40  ;;  %v10162_v48 = vmax.f32 %v10161_v63, 0.0  ;;  %v10163_v36 = vld [vmem:[#allocation79_spill] sm:$0xff]  ;;  %v8072_v46 = vpop.permute.xlu1 %2312  ;;  %v8076_v57 = vld [vmem:[#allocation9 + $0x530] sm:$0xff] }
 0x276   :  { %v9565_v21 = vrot.slane %v8039_v56, 1  ;;  %v10164_v62 = vmax.f32 %v10163_v36, 0.0  ;;  %10165 = vst [vmem:[#allocation72_spill] sm:$0xff] %v8076_v57  ;;  %v8078_v44 = vld [vmem:[#allocation9 + $0x538] sm:$0xff]  ;;  %v10168_v40 = vld [vmem:[#allocation145_spill] sm:$0xff] }
 0x277   :  { %v3120_v24 = vsel %vm2898_vm3, %v10158_v17, %v10157_v28  ;;  %2260 = vrot.lane.b32.xlu1 %v10160_v33, %s5765_s3  ;;  %v8066_v28 = vpop.permute.xlu0 %2158  ;;  %v3852_v17 = vadd.f32 %v3626_v31, %v3610_v11  ;;  %v2742_v49 = vmax.f32 %v10162_v48, %v2455_v10  ;;  %10166 = vst [vmem:[#allocation29_spill] sm:$0xff] %v8078_v44  ;;  %v3498_v38 = vld [vmem:[#allocation8 + $0x138] sm:$0xff]  ;;  %v10167_v11 = vrot.slane %v7939_v61, 1  ;;  %v10172_v33 = vld [vmem:[#allocation148_spill] sm:$0xff] }
 0x278   :  { %v3417_v29 = vmax.f32 %v7863_v34, %v3120_v24  ;;  %v2743_v47 = vmax.f32 %v10164_v62, %v2456_v16  ;;  %v3812_v31 = vadd.f32 %v7968_v1, %v3703_v7  ;;  %v2457_v62 = vsel %vm2330_vm2, %v7659_v25, %v8072_v46  ;;  %v10170_v16 = vld [vmem:[#allocation80_spill] sm:$0xff] }
 0x279   :  { %v2994_v48 = vsel %vm2898_vm3, %v10167_v11, %v9565_v21  ;;  %v10169_v24 = vmax.f32 %v10168_v40, 0.0  ;;  %v10171_v63 = vmax.f32 %v10170_v16, 0.0  ;;  %v10173_v11 = vmax.f32 %v10172_v33, 0.0  ;;  %v3591_v1 = vld [vmem:[#allocation8 + $0x420] sm:$0x7f]  ;;  %v8120_v57 = vld [vmem:[#allocation9 + $0x5c8] sm:$0xff] }
 0x27a   :  { %v3705_v34 = vmul.f32 %v3561_v53, %v3417_v29  ;;  %v3354_v10 = vmax.f32 %v7939_v61, %v2994_v48  ;;  %v3147_v53 = vrot.slane %v2742_v49, 1  ;;  %v3149_v29 = vrot.slane %v2743_v47, 1  ;;  %v3575_v16 = vld [vmem:[#allocation8 + $0x3a0] sm:$0xff]  ;;  %10179 = vst [vmem:[#allocation58_spill] sm:$0xff] %v8120_v57  ;;  %v3468_v57 = vld [vmem:[#allocation8 + $0x48] sm:$0xff] }
 0x27b   :  { %2262 = vrot.lane.b32.xlu0 %v10169_v24, %s5765_s3  ;;  %v2744_v36 = vmax.f32 %v10171_v63, %v2457_v62  ;;  %2264 = vrot.lane.b32.xlu1 %v10173_v11, %s5765_s3  ;;  %v3827_v7 = vadd.f32 %v7976_v22, %v3704_v20  ;;  %v8100_v37 = vpop.permute.xlu0 %2186  ;;  %v8103_v24 = vadd.f32 %v7792_v23, %v3798_v51  ;;  %v3576_v62 = vld [vmem:[#allocation8 + $0x3a8] sm:$0xff]  ;;  %v10174_v21 = vrot.slane %v7959_v35, 1  ;;  %v8118_v40 = vld [vmem:[#allocation9 + $0x5c0] sm:$0xff] }
 0x27c   :  { %v3842_v25 = vadd.f32 %v7970_v55, %v3705_v34  ;;  %v3642_v48 = vmul.f32 %v3498_v38, %v3354_v10  ;;  %v3592_v63 = vld [vmem:[#allocation8 + $0x428] sm:$0x7f]  ;;  %v10175_v22 = vrot.slane %v7963_v18, 1  ;;  %v3447_v20 = vmax.f32 %v2742_v49, %v3147_v53  ;;  %v2061_v34 = vpop.permute.xlu1 %2060  ;;  %v10176_v38 = vld [vmem:[#allocation147_spill] sm:$0xff]  ;;  %10178 = vst [vmem:[#allocation40_spill] sm:$0xff] %v8118_v40 }
 0x27d   :  { %v3148_v11 = vsel %vm2898_vm3, %v10174_v21, %v3147_v53  ;;  %v3448_v33 = vmax.f32 %v2743_v47, %v3149_v29  ;;  %v3151_v61 = vrot.slane %v2744_v36, 1  ;;  %v10177_v10 = vmax.f32 %v10176_v38, 0.0  ;;  %v10180_v47 = vld [vmem:[#allocation22_spill] sm:$0xff] }
 0x27e   :  { %v3150_v55 = vsel %vm2898_vm3, %v10175_v22, %v3149_v29  ;;  %v3431_v23 = vmax.f32 %v7959_v35, %v3148_v11  ;;  %v3853_v21 = vadd.f32 %v3852_v17, %v3642_v48  ;;  %v3735_v44 = vmul.f32 %v3591_v1, %v3447_v20  ;;  %v3577_v22 = vld [vmem:[#allocation8 + $0x3b0] sm:$0xff] }
 0x27f   :  { %v3432_v51 = vmax.f32 %v7963_v18, %v3150_v55  ;;  %2292 = vrot.lane.b32.xlu0 %v10177_v10, %s5765_s3  ;;  %v2398_v49 = vsel %vm2330_vm2, %v7564_v13, %v8100_v37  ;;  %v2339_v35 = vsel %vm2330_vm2, %v7710_v2, %v2061_v34  ;;  %v10181_v18 = vmax.f32 %v10180_v47, 0.0  ;;  %v3593_v55 = vld [vmem:[#allocation8 + $0x430] sm:$0x7f]  ;;  %v8133_v1 = vpop.permute.xlu0 %2190 }
 0x280   :  { %v3719_v53 = vmul.f32 %v3575_v16, %v3431_v23  ;;  %v3736_v11 = vmul.f32 %v3592_v63, %v3448_v33  ;;  %v10182_v10 = vrot.slane %v8013_v9, 1  ;;  %v3449_v48 = vmax.f32 %v2744_v36, %v3151_v61  ;;  %v10183_v20 = vld [vmem:[#allocation66_spill] sm:$0xff]  ;;  %v8140_v47 = vpop.permute.xlu1 %2064 }
 0x281   :  { %2294 = vrot.lane.b32.xlu1 %v10181_v18, %s5765_s3  ;;  %v3720_v29 = vmul.f32 %v3576_v62, %v3432_v51  ;;  %v10184_v2 = vmax.f32 %v10183_v20, 0.0  ;;  %v3814_v62 = vsel %vm2898_vm3, %v3735_v44, 0.0  ;;  %v2340_v23 = vsel %vm2330_vm2, %v2061_v34, %v7770_v42  ;;  %v10185_v51 = vld [vmem:[#allocation149_spill] sm:$0xff]  ;;  %v10187_v18 = vld [vmem:[#allocation82_spill] sm:$0xff]  ;;  %v10191_v20 = vld [vmem:[#allocation83_spill] sm:$0xff] }
 0x282   :  { %v3152_v17 = vsel %vm2898_vm3, %v10182_v10, %v3151_v61  ;;  %v3813_v16 = vadd.f32 %v3812_v31, %v3719_v53  ;;  %v3737_v61 = vmul.f32 %v3593_v55, %v3449_v48  ;;  %v10188_v10 = vmax.f32 %v10187_v18, 0.0  ;;  %v10193_v18 = vld [vmem:[#allocation84_spill] sm:$0xff] }
 0x283   :  { %v3433_v13 = vmax.f32 %v8013_v9, %v3152_v17  ;;  %v8138_v38 = vmax.f32 %v10184_v2, %v2398_v49  ;;  %v3828_v63 = vadd.f32 %v3827_v7, %v3720_v29  ;;  %v10186_v9 = vmax.f32 %v10185_v51, 0.0  ;;  %v8162_v53 = vpop.permute.xlu0 %2218 }
 0x284   :  { %v8153_v17 = vmax.f32 %v10188_v10, %v2339_v35  ;;  %v10189_v31 = vmax.f32 %v6779_v43, 0.0  ;;  %v3815_v44 = vadd.f32 %v3814_v62, %v3813_v16  ;;  %v3829_v7 = vsel %vm2898_vm3, %v3736_v11, 0.0  ;;  %v2093_v11 = vpop.permute.xlu1 %2092 }
 0x285   :  { %2296 = vrot.lane.b32.xlu0 %v10186_v9, %s5765_s3  ;;  %v3721_v36 = vmul.f32 %v3577_v22, %v3433_v13  ;;  %v3025_v49 = vrot.slane %v8138_v38, 1  ;;  %v2341_v34 = vsel %vm2330_vm2, %v7770_v42, %v8140_v47  ;;  %v3801_v29 = vrot.slane %v8103_v24, 4  ;;  %v3514_v13 = vld [vmem:[#allocation8 + $0x1b8] sm:$0xff] }
 0x286   :  { %2324 = vrot.lane.b32.xlu1 %v10189_v31, %s5765_s3  ;;  %v3830_v22 = vadd.f32 %v3829_v7, %v3828_v63  ;;  %v10190_v35 = vrot.slane %v8039_v56, 1  ;;  %v10192_v2 = vmax.f32 %v10191_v20, 0.0  ;;  %v3844_v62 = vsel %vm2898_vm3, %v3737_v61, 0.0  ;;  %v10199_v20 = vld [vmem:[#allocation85_spill] sm:$0xff] }
 0x287   :  { %v3843_v55 = vadd.f32 %v3842_v25, %v3721_v36  ;;  %v2923_v9 = vrot.slane %v8153_v17, 1  ;;  %v10194_v10 = vmax.f32 %v10193_v18, 0.0  ;;  %v10195_v25 = vmax.f32 %v6827_v0, 0.0  ;;  %v10201_v18 = vld [vmem:[#allocation87_spill] sm:$0xff] }
 0x288   :  { %v3026_v48 = vsel %vm2898_vm3, %v10190_v35, %v3025_v49  ;;  %v8170_v16 = vmax.f32 %v10192_v2, %v2340_v23  ;;  %v2413_v23 = vsel %vm2330_vm2, %v7722_v45, %v8162_v53  ;;  %v2354_v61 = vsel %vm2330_vm2, %v7817_v3, %v2093_v11  ;;  %v10197_v35 = vld [vmem:[#allocation69_spill] sm:$0xff]  ;;  %v8202_v45 = vpop.permute.xlu0 %2222 }
 0x289   :  { %v3370_v42 = vmax.f32 %v8039_v56, %v3026_v48  ;;  %v8177_v63 = vmax.f32 %v10194_v10, %v2341_v34  ;;  %2326 = vrot.lane.b32.xlu0 %v10195_v25, %s5765_s3  ;;  %v8182_v36 = vadd.f32 %v3844_v62, %v3843_v55  ;;  %v2355_v56 = vsel %vm2330_vm2, %v2093_v11, %v7883_v27 }
 0x28a   :  { %v10196_v31 = vmax.f32 %v10013_v50, 0.0  ;;  %v3816_v7 = vrot.slane %v3815_v44, 4  ;;  %v10198_v48 = vmax.f32 %v10197_v35, 0.0  ;;  %v10200_v2 = vmax.f32 %v10199_v20, 0.0 }
 0x28b   :  { %v3658_v34 = vmul.f32 %v3514_v13, %v3370_v42  ;;  %v2926_v3 = vrot.slane %v8170_v16, 1  ;;  %v10202_v11 = vmax.f32 %v10201_v18, 0.0  ;;  %v3802_v25 = vadd.f32 %v3801_v29, %v8103_v24  ;;  %v3530_v29 = vld [vmem:[#allocation8 + $0x238] sm:$0xff] }
 0x28c   :  { %2328 = vrot.lane.b32.xlu1 %v10196_v31, %s5765_s3  ;;  %v8196_v55 = vmax.f32 %v10198_v48, %v2413_v23  ;;  %v8200_v62 = vmax.f32 %v10200_v2, %v2354_v61  ;;  %v8210_v31 = vpop.permute.xlu1 %2096  ;;  %v3831_v13 = vrot.slane %v3830_v22, 4  ;;  %v2929_v48 = vrot.slane %v8177_v63, 1  ;;  %v10203_v2 = vld [vmem:[#allocation88_spill] sm:$0xff] }
 0x28d   :  { %v8207_v10 = vmax.f32 %v10202_v11, %v2355_v56  ;;  %v3854_v42 = vadd.f32 %v3853_v21, %v3658_v34  ;;  %v2356_v61 = vsel %vm2330_vm2, %v7883_v27, %v8210_v31  ;;  %v3803_v56 = vrot.slane %v3802_v25, 2  ;;  %v8225_v11 = vpop.permute.xlu0 %2250 }
 0x28e   :  { %v3057_v23 = vrot.slane %v8196_v55, 1  ;;  %v2924_v35 = vrot.slane %v8200_v62, 1  ;;  %v10204_v18 = vmax.f32 %v10203_v2, 0.0  ;;  %v3832_v33 = vadd.f32 %v3831_v13, %v3830_v22  ;;  %v8230_v2 = vld [vmem:[#allocation9 + $0x540] sm:$0xff] }
 0x28f   :  { %v2927_v20 = vrot.slane %v8207_v10, 1  ;;  %v3817_v50 = vadd.f32 %v3816_v7, %v3815_v44  ;;  %v3804_v51 = vadd.f32 %v3803_v56, %v3802_v25  ;;  %10205 = vst [vmem:[#allocation73_spill] sm:$0xff] %v8230_v2  ;;  %v2428_v44 = vsel %vm2330_vm2, %v7835_v12, %v8225_v11  ;;  %v3467_v56 = vld [vmem:[#allocation8 + $0x40] sm:$0xff] }
 0x290   :  { %v8221_v24 = vmax.f32 %v10204_v18, %v2356_v61  ;;  %v3058_v21 = vsel %vm2898_vm3, %v3025_v49, %v3057_v23  ;;  %v2925_v34 = vsel %vm2898_vm3, %v2923_v9, %v2924_v35  ;;  %v2125_v40 = vpop.permute.xlu1 %2124  ;;  %v8232_v61 = vld [vmem:[#allocation9 + $0x548] sm:$0xff]  ;;  %v3846_v22 = vrot.slane %v8182_v36, 4 }
 0x291   :  { %v3386_v27 = vmax.f32 %v8138_v38, %v3058_v21  ;;  %v2928_v0 = vsel %vm2898_vm3, %v2926_v3, %v2927_v20  ;;  %v3323_v43 = vmax.f32 %v8153_v17, %v2925_v34  ;;  %v2369_v38 = vsel %vm2330_vm2, %v7926_v14, %v2125_v40  ;;  %v10206_v3 = vld [vmem:[#allocation74_spill] sm:$0xff]  ;;  %v8257_v21 = vpop.permute.xlu0 %2254 }
 0x292   :  { %v3324_v49 = vmax.f32 %v8170_v16, %v2928_v0  ;;  %v9572_v9 = vrot.slane %v8221_v24, 1  ;;  %v3805_v7 = vrot.slane %v3804_v51, 1  ;;  %v10207_v25 = vmax.f32 %v10206_v3, 0.0  ;;  %v10208_v16 = vld [vmem:[#allocation90_spill] sm:$0xff] }
 0x293   :  { %v3674_v17 = vmul.f32 %v3530_v29, %v3386_v27  ;;  %v2370_v12 = vsel %vm2330_vm2, %v2125_v40, %v7974_v32  ;;  %v10209_v18 = vmax.f32 %v10208_v16, 0.0  ;;  %v10210_v40 = vld [vmem:[#allocation91_spill] sm:$0xff]  ;;  %v3611_v29 = vmul.f32 %v3467_v56, %v3323_v43 }
 0x294   :  { %v8244_v13 = vmax.f32 %v10207_v25, %v2428_v44  ;;  %v8249_v0 = vsel %vm2898_vm3, %v2929_v48, %v9572_v9  ;;  %v3806_v27 = vadd.f32 %v3805_v7, %v3804_v51  ;;  %v8266_v3 = vpop.permute.xlu1 %2128  ;;  %v10211_v25 = vmax.f32 %v10210_v40, 0.0  ;;  %v3483_v7 = vld [vmem:[#allocation8 + $0xc0] sm:$0xff] }
 0x295   :  { %v8255_v14 = vmax.f32 %v10209_v18, %v2369_v38  ;;  %v8261_v34 = vadd.f32 %v3854_v42, %v3674_v17  ;;  %v3325_v44 = vmax.f32 %v8177_v63, %v8249_v0  ;;  %v3833_v18 = vrot.slane %v3832_v33, 2 }
 0x296   :  { %v3089_v48 = vrot.slane %v8244_v13, 1  ;;  %v8270_v16 = vmax.f32 %v10211_v25, %v2370_v12  ;;  %v3818_v9 = vrot.slane %v3817_v50, 2  ;;  %4394 = vmatprep.mubr.f32.mxu1 %v3806_v27  ;;  %v2371_v63 = vsel %vm2330_vm2, %v7974_v32, %v8266_v3  ;;  %v3546_v12 = vld [vmem:[#allocation8 + $0x2b8] sm:$0xff]  ;;  %v10214_v25 = vld [vmem:[#allocation16_spill] sm:$0xff] }
 0x297   :  { %v9574_v38 = vrot.slane %v8255_v14, 1  ;;  %v8278_v42 = vadd.f32 %v3846_v22, %v8182_v36  ;;  %4395 = vmatmul.mubr.f32.vlgmr.msra.gmra.mrb[80].mxu1 %v7433_v59  ;;  %v3834_v56 = vadd.f32 %v3833_v18, %v3832_v33  ;;  %v10212_v36 = vld [vmem:[#allocation92_spill] sm:$0xff]  ;;  %v3612_v33 = vmul.f32 %v3468_v57, %v3324_v49 }
 0x298   :  { %v3090_v51 = vsel %vm2898_vm3, %v3057_v23, %v3089_v48  ;;  %v9576_v43 = vrot.slane %v8270_v16, 1  ;;  %v8286_v23 = vpop.permute.xlu0 %2282  ;;  %v3819_v27 = vadd.f32 %v3818_v9, %v3817_v50  ;;  %v10213_v22 = vmax.f32 %v10212_v36, 0.0  ;;  %v3484_v18 = vld [vmem:[#allocation8 + $0xc8] sm:$0xff] }
 0x299   :  { %v3402_v17 = vmax.f32 %v8196_v55, %v3090_v51  ;;  %v2964_v0 = vsel %vm2898_vm3, %v2924_v35, %v9574_v38  ;;  %v2443_v59 = vsel %vm2330_vm2, %v7980_v4, %v8286_v23  ;;  %v2157_v55 = vpop.permute.xlu1 %2156  ;;  %v10215_v35 = vld [vmem:[#allocation18_spill] sm:$0xff]  ;;  %v3835_v50 = vrot.slane %v3834_v56, 1  ;;  %v10217_v9 = vld [vmem:[#allocation77_spill] sm:$0xff]  ;;  %v10219_v36 = vld [vmem:[#allocation20_spill] sm:$0xff] }
 0x29a   :  { %v3339_v32 = vmax.f32 %v8200_v62, %v2964_v0  ;;  %v8291_v40 = vmax.f32 %v10213_v22, %v2371_v63  ;;  %v10216_v51 = vpack.c.bf16 %v10214_v25, %v10215_v35  ;;  %v2966_v62 = vsel %vm2898_vm3, %v2927_v20, %v9576_v43  ;;  %v10220_v22 = vld [vmem:[#allocation141_spill] sm:$0xff] }
 0x29b   :  { %v10218_v0 = vmax.f32 %v10217_v9, 0.0  ;;  %v10221_v38 = vpack.c.bf16 %v10219_v36, %v10220_v22  ;;  %v3340_v4 = vmax.f32 %v8207_v10, %v2966_v62  ;;  %v3820_v25 = vrot.slane %v3819_v27, 1 }
 0x29c   :  { %5438 = vmatpush3.bf16.msra.mxu1 %v10216_v51  ;;  %v3627_v2 = vmul.f32 %v3483_v7, %v3339_v32  ;;  %v2967_v57 = vrot.slane %v8291_v40, 1  ;;  %v3690_v49 = vmul.f32 %v3546_v12, %v3402_v17  ;;  %v3836_v35 = vadd.f32 %v3835_v50, %v3834_v56  ;;  %v8314_v9 = vpop.permute.xlu0 %2286  ;;  %v10223_v17 = vld [vmem:[#allocation153_spill] sm:$0xff] }
 0x29d   :  { %v8304_v63 = vmax.f32 %v10218_v0, %v2443_v59  ;;  %5440 = vmatprep.subr.bf16.mxu1 %v10221_v38  ;;  %v2384_v20 = vsel %vm2330_vm2, %v8025_v54, %v2157_v55  ;;  %v3469_v59 = vld [vmem:[#allocation8 + $0x50] sm:$0xff]  ;;  %v3628_v0 = vmul.f32 %v3484_v18, %v3340_v4  ;;  %v3821_v36 = vadd.f32 %v3820_v25, %v3819_v27  ;;  %v8319_v32 = vpop.permute.xlu1 %2160  ;;  %v10228_v4 = vld [vmem:[#allocation95_spill] sm:$0xff] }
 0x29e   :  { %v3867_v43 = vadd.f32 %v3627_v2, %v3611_v29  ;;  %v3485_v38 = vld [vmem:[#allocation8 + $0xd0] sm:$0xff]  ;;  %v10222_v10 = vrot.slane %v8221_v24, 1  ;;  %4464 = vmatprep.mubr.f32.mxu0 %v3836_v35  ;;  %v2385_v2 = vsel %vm2330_vm2, %v2157_v55, %v8066_v28  ;;  %v10229_v25 = vmax.f32 %v10228_v4, 0.0 }
 0x29f   :  { %v3121_v51 = vrot.slane %v8304_v63, 1  ;;  %v10224_v56 = vld [vmem:[#allocation49_spill] sm:$0xff]  ;;  %v3882_v50 = vadd.f32 %v3628_v0, %v3612_v33  ;;  %4465 = vmatmul.mubr.f32.vlgmr.msra.gmra.mrb[82].mxu0 %v3821_v36  ;;  %v10233_v0 = vld [vmem:[#allocation47_spill] sm:$0xff] }
 0x2a0   :  { %v2968_v7 = vsel %vm2898_vm3, %v10222_v10, %v2967_v57  ;;  %v10225_v12 = vpack.c.bf16 %v10223_v17, %v10224_v56  ;;  %v10226_v29 = vld [vmem:[#allocation93_spill] sm:$0xff]  ;;  %v8337_v35 = vmax.f32 %v10229_v25, %v2385_v2  ;;  %v10230_v17 = vld [vmem:[#allocation96_spill] sm:$0xff]  ;;  %v8347_v33 = vpop.permute.xlu0 %2314 }
 0x2a1   :  { %v3341_v54 = vmax.f32 %v8221_v24, %v2968_v7  ;;  %v3122_v18 = vsel %vm2898_vm3, %v3089_v48, %v3121_v51  ;;  %v10227_v27 = vmax.f32 %v10226_v29, 0.0  ;;  %v2386_v24 = vsel %vm2330_vm2, %v8066_v28, %v8319_v32  ;;  %v3562_v7 = vld [vmem:[#allocation8 + $0x338] sm:$0xff] }
 0x2a2   :  { %5442 = vmatpush3.bf16.msra.mxu1 %v10225_v12  ;;  %v3418_v22 = vmax.f32 %v8244_v13, %v3122_v18  ;;  %v3613_v48 = vmul.f32 %v3469_v59, %v3325_v44  ;;  %v10232_v13 = vld [vmem:[#allocation51_spill] sm:$0xff]  ;;  %v10235_v12 = vpack.c.bf16 %v7545_v30, %v7543_v58  ;;  %v3856_v28 = vadd.f32 %v8261_v34, %v3690_v49  ;;  %v10237_v18 = vld [vmem:[#allocation52_spill] sm:$0xff] }
 0x2a3   :  { %v8332_v62 = vmax.f32 %v10227_v27, %v2384_v20  ;;  %v3629_v10 = vmul.f32 %v3485_v38, %v3341_v54  ;;  %v10231_v20 = vmax.f32 %v10230_v17, 0.0  ;;  %v10234_v36 = vpack.c.bf16 %v10232_v13, %v10233_v0  ;;  %v2189_v38 = vpop.permute.xlu1 %2188  ;;  %v10236_v54 = vld [vmem:[#allocation48_spill] sm:$0xff]  ;;  %v10243_v17 = vld [vmem:[#allocation55_spill] sm:$0xff] }
 0x2a4   :  { %5470 = vmatpush3.bf16.msra.mxu0 %v10235_v12  ;;  %v2997_v44 = vrot.slane %v8337_v35, 1  ;;  %v2458_v59 = vsel %vm2330_vm2, %v8072_v46, %v8347_v33  ;;  %v10238_v2 = vpack.c.bf16 %v10236_v54, %v10237_v18  ;;  %v3848_v29 = vrot.slane %v8278_v42, 2  ;;  %v3499_v30 = vld [vmem:[#allocation8 + $0x140] sm:$0xff]  ;;  %v10241_v46 = vld [vmem:[#allocation81_spill] sm:$0xff] }
 0x2a5   :  { %v2995_v55 = vrot.slane %v8332_v62, 1  ;;  %v8345_v56 = vmax.f32 %v10231_v20, %v2386_v24  ;;  %5444 = vmatprep.subr.bf16.mxu1 %v10234_v36  ;;  %v10239_v27 = vpack.c.bf16 %v7570_v6, %v7568_v5  ;;  %v3897_v58 = vadd.f32 %v3629_v10, %v3613_v48  ;;  %v10244_v20 = vld [vmem:[#allocation54_spill] sm:$0xff]  ;;  %v3500_v36 = vld [vmem:[#allocation8 + $0x148] sm:$0xff] }
 0x2a6   :  { %5446 = vmatpush3.bf16.msra.mxu1 %v10238_v2  ;;  %v10240_v34 = vrot.slane %v8255_v14, 1  ;;  %v10242_v25 = vmax.f32 %v10241_v46, 0.0  ;;  %v10245_v13 = vpack.c.bf16 %v10243_v17, %v10244_v20  ;;  %v3706_v0 = vmul.f32 %v3562_v7, %v3418_v22  ;;  %v3501_v54 = vld [vmem:[#allocation8 + $0x150] sm:$0xff]  ;;  %v8386_v22 = vpop.permute.xlu0 %2318  ;;  %v10247_v7 = vld [vmem:[#allocation60_spill] sm:$0xff] }
 0x2a7   :  { %5472 = vmatprep.subr.bf16.mxu0 %v10239_v27  ;;  %v2999_v4 = vrot.slane %v8345_v56, 1  ;;  %v10246_v5 = vrot.slane %v8270_v16, 1  ;;  %v2399_v10 = vsel %vm2330_vm2, %v8100_v37, %v2189_v38  ;;  %v2400_v2 = vsel %vm2330_vm2, %v2189_v38, %v8133_v1  ;;  %v10249_v37 = vld [vmem:[#allocation98_spill] sm:$0xff]  ;;  %v8400_v20 = vpop.permute.xlu1 %2192 }
 0x2a8   :  { %v2996_v49 = vsel %vm2898_vm3, %v10240_v34, %v2995_v55  ;;  %v2745_v24 = vmax.f32 %v10242_v25, %v2458_v59  ;;  %5448 = vmatprep.subr.bf16.mxu1 %v10245_v13  ;;  %v10248_v27 = vpack.c.bf16 %v7599_v26, %v10247_v7  ;;  %v10250_v46 = vmax.f32 %v10249_v37, 0.0  ;;  %v10251_v25 = vld [vmem:[#allocation99_spill] sm:$0xff]  ;;  %v10253_v38 = vld [vmem:[#allocation154_spill] sm:$0xff]  ;;  %v10254_v13 = vld [vmem:[#allocation56_spill] sm:$0xff] }
 0x2a9   :  { %v2998_v6 = vsel %vm2898_vm3, %v10246_v5, %v2997_v44  ;;  %v3355_v48 = vmax.f32 %v8255_v14, %v2996_v49  ;;  %v3000_v59 = vsel %vm2898_vm3, %v2967_v57, %v2999_v4  ;;  %v3594_v49 = vld [vmem:[#allocation8 + $0x438] sm:$0x7f]  ;;  %v10252_v57 = vmax.f32 %v10251_v25, 0.0 }
 0x2aa   :  { %v3356_v12 = vmax.f32 %v8270_v16, %v2998_v6  ;;  %v3153_v18 = vrot.slane %v2745_v24, 1  ;;  %5474 = vmatpush3.bf16.msra.mxu0 %v10248_v27  ;;  %v3357_v14 = vmax.f32 %v8291_v40, %v3000_v59  ;;  %v8394_v16 = vmax.f32 %v10250_v46, %v2399_v10  ;;  %v3578_v6 = vld [vmem:[#allocation8 + $0x3b8] sm:$0xff] }
 0x2ab   :  { %v3643_v34 = vmul.f32 %v3499_v30, %v3355_v48  ;;  %v8398_v17 = vmax.f32 %v10252_v57, %v2400_v2  ;;  %v10255_v5 = vpack.c.bf16 %v10253_v38, %v10254_v13  ;;  %v2401_v48 = vsel %vm2330_vm2, %v8133_v1, %v8400_v20  ;;  %v10256_v10 = vld [vmem:[#allocation155_spill] sm:$0xff]  ;;  %v10260_v46 = vld [vmem:[#allocation62_spill] sm:$0xff]  ;;  %v10262_v57 = vld [vmem:[#allocation100_spill] sm:$0xff]  ;;  %v8424_v13 = vpop.permute.xlu0 %2066 }
 0x2ac   :  { %v3644_v26 = vmul.f32 %v3500_v36, %v3356_v12  ;;  %v3154_v40 = vsel %vm2898_vm3, %v3121_v51, %v3153_v18  ;;  %v3450_v30 = vmax.f32 %v2745_v24, %v3153_v18  ;;  %v10257_v59 = vld [vmem:[#allocation139_spill] sm:$0xff]  ;;  %v3645_v27 = vmul.f32 %v3501_v54, %v3357_v14  ;;  %v10265_v54 = vld [vmem:[#allocation26_spill] sm:$0xff] }
 0x2ad   :  { %5450 = vmatpush3.bf16.msra.mxu1 %v10255_v5  ;;  %v10258_v2 = vpack.c.bf16 %v10256_v10, %v10257_v59  ;;  %v3868_v7 = vadd.f32 %v3867_v43, %v3643_v34  ;;  %v3434_v37 = vmax.f32 %v8304_v63, %v3154_v40  ;;  %v3027_v36 = vrot.slane %v8394_v16, 1  ;;  %v10259_v12 = vld [vmem:[#allocation63_spill] sm:$0xff]  ;;  %v10264_v43 = vld [vmem:[#allocation36_spill] sm:$0xff] }
 0x2ae   :  { %v10261_v25 = vpack.c.bf16 %v10259_v12, %v10260_v46  ;;  %v3883_v51 = vadd.f32 %v3882_v50, %v3644_v26  ;;  %v3738_v24 = vmul.f32 %v3594_v49, %v3450_v30  ;;  %v3029_v18 = vrot.slane %v8398_v17, 1  ;;  %v3515_v40 = vld [vmem:[#allocation8 + $0x1c0] sm:$0xff]  ;;  %v2221_v50 = vpop.permute.xlu1 %2220  ;;  %v3516_v59 = vld [vmem:[#allocation8 + $0x1c8] sm:$0xff] }
 0x2af   :  { %5452 = vmatprep.subr.bf16.mxu1 %v10258_v2  ;;  %v10263_v1 = vmax.f32 %v10262_v57, 0.0  ;;  %v10266_v34 = vpack.c.bf16 %v10264_v43, %v10265_v54  ;;  %v3898_v63 = vadd.f32 %v3897_v58, %v3645_v27  ;;  %v3857_v14 = vadd.f32 %v3856_v28, %v3706_v0  ;;  %v10267_v49 = vld [vmem:[#allocation28_spill] sm:$0xff]  ;;  %v10270_v58 = vld [vmem:[#allocation157_spill] sm:$0xff] }
 0x2b0   :  { %5476 = vmatprep.subr.bf16.mxu0 %v10261_v25  ;;  %v3722_v5 = vmul.f32 %v3578_v6, %v3434_v37  ;;  %v3028_v10 = vsel %vm2898_vm3, %v2995_v55, %v3027_v36  ;;  %v10268_v26 = vld [vmem:[#allocation24_spill] sm:$0xff]  ;;  %v2342_v28 = vsel %vm2330_vm2, %v8140_v47, %v8424_v13  ;;  %v10273_v55 = vld [vmem:[#allocation31_spill] sm:$0xff]  ;;  %v3859_v25 = vsel %vm2898_vm3, %v3738_v24, 0.0  ;;  %v10276_v54 = vld [vmem:[#allocation101_spill] sm:$0xff] }
 0x2b1   :  { %v8422_v38 = vmax.f32 %v10263_v1, %v2401_v48  ;;  %5478 = vmatpush3.bf16.msra.mxu0 %v10266_v34  ;;  %v10269_v30 = vpack.c.bf16 %v10267_v49, %v10268_v26  ;;  %v3030_v48 = vsel %vm2898_vm3, %v2997_v44, %v3029_v18  ;;  %v3371_v2 = vmax.f32 %v8332_v62, %v3028_v10  ;;  %v10271_v0 = vld [vmem:[#allocation156_spill] sm:$0xff]  ;;  %v3517_v1 = vld [vmem:[#allocation8 + $0x1d0] sm:$0xff]  ;;  %v8456_v49 = vpop.permute.xlu0 %2070 }
 0x2b2   :  { %v10272_v6 = vpack.c.bf16 %v10270_v58, %v10271_v0  ;;  %v10274_v27 = vld [vmem:[#allocation64_spill] sm:$0xff]  ;;  %v3858_v46 = vadd.f32 %v3857_v14, %v3722_v5  ;;  %v3372_v44 = vmax.f32 %v8337_v35, %v3030_v48  ;;  %v2414_v62 = vsel %vm2330_vm2, %v8162_v53, %v2221_v50  ;;  %v10278_v14 = vld [vmem:[#allocation33_spill] sm:$0xff]  ;;  %v10279_v24 = vld [vmem:[#allocation30_spill] sm:$0xff] }
 0x2b3   :  { %5454 = vmatpush3.bf16.msra.mxu1 %v10269_v30  ;;  %v3031_v12 = vrot.slane %v8422_v38, 1  ;;  %v10275_v37 = vpack.c.bf16 %v10273_v55, %v10274_v27  ;;  %v3659_v57 = vmul.f32 %v3515_v40, %v3371_v2  ;;  %v2415_v43 = vsel %vm2330_vm2, %v2221_v50, %v8202_v45  ;;  %v8462_v40 = vpop.permute.xlu1 %2224  ;;  %v10282_v30 = vld [vmem:[#allocation57_spill] sm:$0xff]  ;;  %v10284_v50 = vld [vmem:[#allocation44_spill] sm:$0xff]  ;;  %v10285_v2 = vld [vmem:[#allocation35_spill] sm:$0xff] }
 0x2b4   :  { %5456 = vmatprep.subr.bf16.mxu1 %v10272_v6  ;;  %v10277_v34 = vmax.f32 %v10276_v54, 0.0  ;;  %v10280_v5 = vpack.c.bf16 %v10278_v14, %v10279_v24  ;;  %v3860_v35 = vadd.f32 %v3859_v25, %v3858_v46  ;;  %v3660_v26 = vmul.f32 %v3516_v59, %v3372_v44  ;;  %v10287_v6 = vld [vmem:[#allocation103_spill] sm:$0xff]  ;;  %v10290_v46 = vld [vmem:[#allocation158_spill] sm:$0xff] }
 0x2b5   :  { %5480 = vmatprep.subr.bf16.mxu0 %v10275_v37  ;;  %v3032_v47 = vsel %vm2898_vm3, %v2999_v4, %v3031_v12  ;;  %v10281_v4 = vld [vmem:[#allocation59_spill] sm:$0xff]  ;;  %v10286_v58 = vpack.c.bf16 %v10284_v50, %v10285_v2  ;;  %v3869_v0 = vadd.f32 %v3868_v7, %v3659_v57  ;;  %v10288_v55 = vmax.f32 %v10287_v6, 0.0  ;;  %v10300_v50 = vld [vmem:[#allocation160_spill] sm:$0xff]  ;;  %v10303_v6 = vld [vmem:[#allocation37_spill] sm:$0xff] }
 0x2b6   :  { %v8454_v10 = vmax.f32 %v10277_v34, %v2414_v62  ;;  %5482 = vmatpush3.bf16.msra.mxu0 %v10280_v5  ;;  %v3373_v53 = vmax.f32 %v8345_v56, %v3032_v47  ;;  %v10283_v48 = vpack.c.bf16 %v10281_v4, %v10282_v30  ;;  %v2416_v56 = vsel %vm2330_vm2, %v8202_v45, %v8462_v40  ;;  %v10289_v59 = vld [vmem:[#allocation159_spill] sm:$0xff]  ;;  %v10292_v47 = vld [vmem:[#allocation104_spill] sm:$0xff]  ;;  %v8498_v5 = vpop.permute.xlu0 %2098 }
 0x2b7   :  { %5484 = vmatprep.subr.bf16.mxu0 %v10286_v58  ;;  %v8472_v27 = vmax.f32 %v10288_v55, %v2415_v43  ;;  %v10291_v25 = vpack.c.bf16 %v10289_v59, %v10290_v46  ;;  %v8481_v44 = vadd.f32 %v3883_v51, %v3660_v26  ;;  %v10293_v54 = vmax.f32 %v10292_v47, 0.0  ;;  %v10294_v43 = vld [vmem:[#allocation86_spill] sm:$0xff]  ;;  %v3531_v45 = vld [vmem:[#allocation8 + $0x240] sm:$0xff] }
 0x2b8   :  { %5458 = vmatpush3.bf16.msra.mxu1 %v10283_v48  ;;  %v3059_v37 = vrot.slane %v8454_v10, 1  ;;  %v3661_v62 = vmul.f32 %v3517_v1, %v3373_v53  ;;  %v8490_v57 = vadd.f32 %v3848_v29, %v8278_v42  ;;  %v10295_v34 = vmax.f32 %v10294_v43, 0.0  ;;  %v10296_v26 = vld [vmem:[#allocation32_spill] sm:$0xff]  ;;  %v10297_v53 = vld [vmem:[#allocation23_spill] sm:$0xff]  ;;  %v2253_v48 = vpop.permute.xlu1 %2252  ;;  %v10302_v58 = vld [vmem:[#allocation34_spill] sm:$0xff] }
 0x2b9   :  { %5460 = vmatprep.subr.bf16.mxu1 %v10291_v25  ;;  %v8485_v7 = vmax.f32 %v10293_v54, %v2416_v56  ;;  %v3061_v51 = vrot.slane %v8472_v27, 1  ;;  %v3861_v1 = vrot.slane %v3860_v35, 4  ;;  %v10298_v4 = vpack.c.bf16 %v10296_v26, %v10297_v53  ;;  %v10307_v25 = vld [vmem:[#allocation163_spill] sm:$0xff] }
 0x2ba   :  { %v8494_v14 = vmax.f32 %v10295_v34, %v2342_v28  ;;  %v3060_v24 = vsel %vm2898_vm3, %v3027_v36, %v3059_v37  ;;  %v3899_v30 = vadd.f32 %v3898_v63, %v3661_v62  ;;  %v2357_v28 = vsel %vm2330_vm2, %v8210_v31, %v8498_v5  ;;  %v10299_v36 = vld [vmem:[#allocation161_spill] sm:$0xff]  ;;  %v10308_v62 = vld [vmem:[#allocation162_spill] sm:$0xff] }
 0x2bb   :  { %5486 = vmatpush3.bf16.msra.mxu0 %v10298_v4  ;;  %v3387_v42 = vmax.f32 %v8394_v16, %v3060_v24  ;;  %v3063_v29 = vrot.slane %v8485_v7, 1  ;;  %v10301_v2 = vpack.c.bf16 %v10299_v36, %v10300_v50  ;;  %v10304_v55 = vpack.c.bf16 %v10302_v58, %v10303_v6  ;;  %v10305_v63 = vld [vmem:[#allocation89_spill] sm:$0xff]  ;;  %v10310_v24 = vld [vmem:[#allocation106_spill] sm:$0xff]  ;;  %v10312_v36 = vld [vmem:[#allocation107_spill] sm:$0xff] }
 0x2bc   :  { %v3062_v56 = vsel %vm2898_vm3, %v3029_v18, %v3061_v51  ;;  %v10306_v59 = vmax.f32 %v10305_v63, 0.0  ;;  %v2429_v46 = vsel %vm2330_vm2, %v8225_v11, %v2253_v48  ;;  %v2430_v31 = vsel %vm2330_vm2, %v2253_v48, %v8257_v21  ;;  %v3533_v34 = vld [vmem:[#allocation8 + $0x250] sm:$0xff]  ;;  %v3532_v4 = vld [vmem:[#allocation8 + $0x248] sm:$0xff] }
 0x2bd   :  { %5462 = vmatpush3.bf16.msra.mxu1 %v10301_v2  ;;  %5488 = vmatprep.subr.bf16.mxu0 %v10304_v55  ;;  %v10309_v47 = vpack.c.bf16 %v10307_v25, %v10308_v62  ;;  %v3388_v54 = vmax.f32 %v8398_v17, %v3062_v56  ;;  %v3675_v43 = vmul.f32 %v3531_v45, %v3387_v42  ;;  %v10311_v26 = vmax.f32 %v10310_v24, 0.0  ;;  %v8541_v45 = vpop.permute.xlu0 %2102  ;;  %v10314_v42 = vld [vmem:[#allocation38_spill] sm:$0xff]  ;;  %v10315_v2 = vld [vmem:[#allocation152_spill] sm:$0xff]  ;;  %v8547_v55 = vpop.permute.xlu1 %2256  ;;  %v10317_v56 = vld [vmem:[#allocation165_spill] sm:$0xff] }
 0x2be   :  { %v8517_v16 = vmax.f32 %v10306_v59, %v2357_v28  ;;  %v3064_v18 = vsel %vm2898_vm3, %v3031_v12, %v3063_v29  ;;  %v2932_v11 = vrot.slane %v8494_v14, 1  ;;  %v10313_v50 = vmax.f32 %v10312_v36, 0.0  ;;  %v10318_v63 = vld [vmem:[#allocation164_spill] sm:$0xff]  ;;  %v10321_v25 = vld [vmem:[#allocation65_spill] sm:$0xff]  ;;  %v8572_v36 = vld [vmem:[#allocation9 + $0x558] sm:$0xff] }
 0x2bf   :  { %5464 = vmatprep.subr.bf16.mxu1 %v10309_v47  ;;  %v8532_v53 = vmax.f32 %v10311_v26, %v2429_v46  ;;  %v3389_v28 = vmax.f32 %v8422_v38, %v3064_v18  ;;  %v10316_v12 = vpack.c.bf16 %v10314_v42, %v10315_v2  ;;  %v3870_v58 = vadd.f32 %v3869_v0, %v3675_v43  ;;  %v8556_v47 = vld [vmem:[#allocation9 + $0x5d0] sm:$0xff]  ;;  %v8558_v18 = vld [vmem:[#allocation9 + $0x5d8] sm:$0xff]  ;;  %v10324_v42 = vld [vmem:[#allocation108_spill] sm:$0xff] }
 0x2c0   :  { %v2933_v48 = vrot.slane %v8517_v16, 1  ;;  %v8539_v17 = vmax.f32 %v10313_v50, %v2430_v31  ;;  %v10319_v38 = vpack.c.bf16 %v10317_v56, %v10318_v63  ;;  %v3862_v59 = vadd.f32 %v3861_v1, %v3860_v35  ;;  %v10320_v31 = vld [vmem:[#allocation67_spill] sm:$0xff]  ;;  %v8570_v26 = vld [vmem:[#allocation9 + $0x550] sm:$0xff] }
 0x2c1   :  { %5490 = vmatpush3.bf16.msra.mxu0 %v10316_v12  ;;  %v3091_v6 = vrot.slane %v8532_v53, 1  ;;  %v3850_v46 = vrot.slane %v8490_v57, 1  ;;  %v10322_v62 = vpack.c.bf16 %v10320_v31, %v10321_v25  ;;  %v3677_v0 = vmul.f32 %v3533_v34, %v3389_v28  ;;  %v3547_v28 = vld [vmem:[#allocation8 + $0x2c0] sm:$0xff]  ;;  %v2285_v31 = vpop.permute.xlu1 %2284  ;;  %v10328_v25 = vld [vmem:[#allocation41_spill] sm:$0xff] }
 0x2c2   :  { %5466 = vmatpush3.bf16.msra.mxu1 %v10319_v38  ;;  %v2934_v43 = vsel %vm2898_vm3, %v2932_v11, %v2933_v48  ;;  %v3093_v24 = vrot.slane %v8539_v17, 1  ;;  %v2431_v35 = vsel %vm2330_vm2, %v8257_v21, %v8547_v55  ;;  %v10323_v1 = vpack.c.bf16 %v7874_v52, %v7872_v15  ;;  %v2105_v15 = vpop.permute.xlu0 %2104  ;;  %v10326_v63 = vld [vmem:[#allocation43_spill] sm:$0xff] }
 0x2c3   :  { %5492 = vmatprep.subr.bf16.mxu0 %v10322_v62  ;;  %v3676_v50 = vmul.f32 %v3532_v4, %v3388_v54  ;;  %v3326_v34 = vmax.f32 %v8494_v14, %v2934_v43  ;;  %v3092_v11 = vsel %vm2898_vm3, %v3059_v37, %v3091_v6  ;;  %v10325_v2 = vmax.f32 %v10324_v42, 0.0  ;;  %v3470_v54 = vld [vmem:[#allocation8 + $0x58] sm:$0xff]  ;;  %v3549_v42 = vld [vmem:[#allocation8 + $0x2d0] sm:$0xff] }
 0x2c4   :  { %5500 = vmatprep.subr.bf16.mxu1 %v10323_v1  ;;  %v3900_v56 = vadd.f32 %v3899_v30, %v3677_v0  ;;  %v3094_v21 = vsel %vm2898_vm3, %v3061_v51, %v3093_v24  ;;  %v3403_v52 = vmax.f32 %v8454_v10, %v3092_v11  ;;  %v10327_v38 = vpack.c.bf16 %v7870_v41, %v10326_v63  ;;  %v10329_v51 = vld [vmem:[#allocation50_spill] sm:$0xff]  ;;  %v3548_v11 = vld [vmem:[#allocation8 + $0x2c8] sm:$0xff] }
 0x2c5   :  { %v8578_v12 = vmax.f32 %v10325_v2, %v2431_v35  ;;  %v2360_v4 = vsel %vm2330_vm2, %v8541_v45, %v2105_v15  ;;  %v3863_v30 = vrot.slane %v3862_v59, 2  ;;  %v10330_v62 = vpack.c.bf16 %v10328_v25, %v10329_v51  ;;  %v10336_v25 = vld [vmem:[#allocation42_spill] sm:$0xff] }
 0x2c6   :  { %5494 = vmatpush3.bf16.msra.mxu0 %v10327_v38  ;;  %v3404_v41 = vmax.f32 %v8472_v27, %v3094_v21  ;;  %v3691_v0 = vmul.f32 %v3547_v28, %v3403_v52  ;;  %v2444_v43 = vsel %vm2330_vm2, %v8286_v23, %v2285_v31  ;;  %v3851_v35 = vadd.f32 %v3850_v46, %v8490_v57  ;;  %v10331_v27 = vld [vmem:[#allocation109_spill] sm:$0xff]  ;;  %v8620_v38 = vpop.permute.xlu0 %2130 }
 0x2c7   :  { %v3095_v37 = vrot.slane %v8578_v12, 1  ;;  %5496 = vmatprep.subr.bf16.mxu0 %v10330_v62  ;;  %v3885_v1 = vadd.f32 %v8481_v44, %v3676_v50  ;;  %v2445_v63 = vsel %vm2330_vm2, %v2285_v31, %v8314_v9  ;;  %v10332_v28 = vmax.f32 %v10331_v27, 0.0  ;;  %v10333_v46 = vld [vmem:[#allocation125_spill] sm:$0xff]  ;;  %v10338_v31 = vld [vmem:[#allocation126_spill] sm:$0xff] }
 0x2c8   :  { %v8611_v23 = vmul.f32 %v3470_v54, %v3326_v34  ;;  %v8613_v57 = vadd.f32 %v3870_v58, %v3691_v0  ;;  %v10334_v50 = vmax.f32 %v10333_v46, 0.0  ;;  %v10339_v62 = vmax.f32 %v10338_v31, 0.0  ;;  %v10340_v34 = vld [vmem:[#allocation111_spill] sm:$0xff]  ;;  %v3565_v10 = vld [vmem:[#allocation8 + $0x350] sm:$0xff] }
 0x2c9   :  { %v3096_v2 = vsel %vm2898_vm3, %v3063_v29, %v3095_v37  ;;  %v8609_v21 = vmax.f32 %v10332_v28, %v2444_v43  ;;  %v10335_v29 = vld [vmem:[#allocation45_spill] sm:$0xff]  ;;  %v10341_v54 = vmax.f32 %v10340_v34, 0.0  ;;  %v3864_v0 = vadd.f32 %v3863_v30, %v3862_v59 }
 0x2ca   :  { %v3405_v44 = vmax.f32 %v8485_v7, %v3096_v2  ;;  %v8618_v52 = vmax.f32 %v10334_v50, %v2360_v4  ;;  %v10337_v51 = vpack.c.bf16 %v10335_v29, %v10336_v25  ;;  %v8627_v43 = vmax.f32 %v10339_v62, %v2105_v15  ;;  %v8634_v2 = vpop.permute.xlu1 %2288  ;;  %v10343_v29 = vld [vmem:[#allocation94_spill] sm:$0xff]  ;;  %v3563_v62 = vld [vmem:[#allocation8 + $0x340] sm:$0xff] }
 0x2cb   :  { %v8631_v58 = vmax.f32 %v10341_v54, %v2445_v63  ;;  %v3123_v7 = vrot.slane %v8609_v21, 1  ;;  %10342 = vst [vmem:[#allocation75_spill] sm:$0xff] %v8634_v2  ;;  %v3692_v4 = vmul.f32 %v3548_v11, %v3404_v41  ;;  %v2372_v28 = vsel %vm2330_vm2, %v8266_v3, %v8620_v38  ;;  %v10354_v41 = vld [vmem:[#allocation97_spill] sm:$0xff] }
 0x2cc   :  { %5498 = vmatpush3.bf16.msra.mxu0 %v10337_v51  ;;  %v3693_v27 = vmul.f32 %v3549_v42, %v3405_v44  ;;  %v2446_v15 = vsel %vm2330_vm2, %v8314_v9, %v8634_v2  ;;  %v3865_v50 = vrot.slane %v3864_v0, 1  ;;  %v10344_v25 = vmax.f32 %v10343_v29, 0.0  ;;  %v10345_v42 = vld [vmem:[#allocation112_spill] sm:$0xff]  ;;  %v8654_v51 = vpop.permute.xlu0 %2134 }
 0x2cd   :  { %v3124_v46 = vsel %vm2898_vm3, %v3091_v6, %v3123_v7  ;;  %v3125_v63 = vrot.slane %v8631_v58, 1  ;;  %v10346_v3 = vmax.f32 %v10345_v42, 0.0  ;;  %v8656_v9 = vld [vmem:[#allocation9 + $0x5e0] sm:$0xff]  ;;  %v8658_v6 = vld [vmem:[#allocation9 + $0x5e8] sm:$0xff] }
 0x2ce   :  { %v8646_v59 = vmax.f32 %v10344_v25, %v2372_v28  ;;  %v3901_v30 = vadd.f32 %v3900_v56, %v3693_v27  ;;  %v3419_v11 = vmax.f32 %v8532_v53, %v3124_v46  ;;  %v3866_v56 = vadd.f32 %v3865_v50, %v3864_v0  ;;  %v2317_v27 = vpop.permute.xlu1 %2316  ;;  %v8663_v53 = vld [vmem:[#allocation9 + $0x560] sm:$0xff]  ;;  %v8665_v28 = vld [vmem:[#allocation9 + $0x568] sm:$0xff] }
 0x2cf   :  { %v8652_v44 = vmax.f32 %v10346_v3, %v2446_v15  ;;  %v3126_v34 = vsel %vm2898_vm3, %v3093_v24, %v3125_v63  ;;  %v8667_v15 = vadd.f32 %v3885_v1, %v3692_v4  ;;  %v2459_v25 = vsel %vm2330_vm2, %v8347_v33, %v2317_v27  ;;  %v3564_v42 = vld [vmem:[#allocation8 + $0x348] sm:$0xff]  ;;  %v3486_v24 = vld [vmem:[#allocation8 + $0xd8] sm:$0xff] }
 0x2d0   :  { %v2969_v54 = vrot.slane %v8646_v59, 1  ;;  %v3420_v46 = vmax.f32 %v8539_v17, %v3126_v34  ;;  %4534 = vmatprep.mubr.f32.mxu1 %v3866_v56  ;;  %v2460_v50 = vsel %vm2330_vm2, %v2317_v27, %v8386_v22  ;;  %v10347_v3 = vld [vmem:[#allocation114_spill] sm:$0xff]  ;;  %v3707_v34 = vmul.f32 %v3563_v62, %v3419_v11  ;;  %v2163_v56 = vpop.permute.xlu0 %2162  ;;  %v10351_v62 = vld [vmem:[#allocation68_spill] sm:$0xff] }
 0x2d1   :  { %v9577_v29 = vrot.slane %v8652_v44, 1  ;;  %v10348_v1 = vmax.f32 %v10347_v3, 0.0  ;;  %4535 = vmatmul.mubr.f32.vlgmr.msra.gmra.mrb[82].mxu1 %v3851_v35  ;;  %v10349_v3 = vld [vmem:[#allocation115_spill] sm:$0xff] }
 0x2d2   :  { %v2970_v0 = vsel %vm2898_vm3, %v2933_v48, %v2969_v54  ;;  %v8695_v35 = vpop.permute.xlu1 %2320 }
 0x2d3   :  { %v2746_v4 = vmax.f32 %v10348_v1, %v2459_v25  ;;  %v3342_v33 = vmax.f32 %v8517_v16, %v2970_v0  ;;  %v3128_v48 = vsel %vm2898_vm3, %v3095_v37, %v9577_v29  ;;  %v10350_v1 = vmax.f32 %v10349_v3, 0.0  ;;  %v10352_v0 = vld [vmem:[#allocation39_spill] sm:$0xff] }
 0x2d4   :  { %v3421_v25 = vmax.f32 %v8578_v12, %v3128_v48  ;;  %v2387_v16 = vsel %vm2330_vm2, %v8319_v32, %v2163_v56  ;;  %v10353_v14 = vpack.c.bf16 %v10351_v62, %v10352_v0  ;;  %v3708_v37 = vmul.f32 %v3564_v42, %v3420_v46  ;;  %v10357_v48 = vld [vmem:[#allocation70_spill] sm:$0xff]  ;;  %v3595_v42 = vld [vmem:[#allocation8 + $0x440] sm:$0x7f]  ;;  %v8716_v0 = vpop.permute.xlu0 %2164 }
 0x2d5   :  { %v2747_v17 = vmax.f32 %v10350_v1, %v2460_v50  ;;  %v3155_v11 = vrot.slane %v2746_v4, 1  ;;  %v3630_v31 = vmul.f32 %v3486_v24, %v3342_v33  ;;  %v10355_v29 = vmax.f32 %v10354_v41, 0.0  ;;  %v10356_v50 = vld [vmem:[#allocation71_spill] sm:$0xff]  ;;  %v3596_v41 = vld [vmem:[#allocation8 + $0x448] sm:$0x7f] }
 0x2d6   :  { %5502 = vmatpush3.bf16.msra.mxu1 %v10353_v14  ;;  %v2461_v12 = vsel %vm2330_vm2, %v8386_v22, %v8695_v35  ;;  %v10358_v3 = vpack.c.bf16 %v10356_v50, %v10357_v48  ;;  %v3709_v32 = vmul.f32 %v3565_v10, %v3421_v25  ;;  %v3579_v1 = vld [vmem:[#allocation8 + $0x3c0] sm:$0xff]  ;;  %v3580_v50 = vld [vmem:[#allocation8 + $0x3c8] sm:$0xff]  ;;  %v3872_v10 = vadd.f32 %v8613_v57, %v3707_v34  ;;  %v10365_v57 = vld [vmem:[#allocation46_spill] sm:$0xff] }
 0x2d7   :  { %v8702_v27 = vmax.f32 %v10355_v29, %v2387_v16  ;;  %v3156_v2 = vsel %vm2898_vm3, %v3123_v7, %v3155_v11  ;;  %v3157_v62 = vrot.slane %v2747_v17, 1  ;;  %v3451_v14 = vmax.f32 %v2746_v4, %v3155_v11  ;;  %v10359_v33 = vld [vmem:[#allocation116_spill] sm:$0xff]  ;;  %v2069_v11 = vpop.permute.xlu1 %2068 }
 0x2d8   :  { %5504 = vmatprep.subr.bf16.mxu1 %v10358_v3  ;;  %v3912_v46 = vadd.f32 %v3630_v31, %v8611_v23  ;;  %v3435_v29 = vmax.f32 %v8609_v21, %v3156_v2  ;;  %v10360_v22 = vmax.f32 %v10359_v33, 0.0  ;;  %v3902_v4 = vadd.f32 %v3901_v30, %v3709_v32  ;;  %v10361_v23 = vld [vmem:[#allocation118_spill] sm:$0xff]  ;;  %v10362_v31 = vld [vmem:[#allocation131_spill] sm:$0xff] }
 0x2d9   :  { %v3001_v24 = vrot.slane %v8702_v27, 1  ;;  %v3158_v7 = vsel %vm2898_vm3, %v3125_v63, %v3157_v62  ;;  %v3452_v25 = vmax.f32 %v2747_v17, %v3157_v62  ;;  %v10363_v48 = vpack.c.bf16 %v10361_v23, %v10362_v31  ;;  %v3502_v3 = vld [vmem:[#allocation8 + $0x158] sm:$0xff]  ;;  %v8730_v63 = vld [vmem:[#allocation9 + $0x5f0] sm:$0xff] }
 0x2da   :  { %v2748_v16 = vmax.f32 %v10360_v22, %v2461_v12  ;;  %v3436_v21 = vmax.f32 %v8631_v58, %v3158_v7  ;;  %v3723_v2 = vmul.f32 %v3579_v1, %v3435_v29  ;;  %v10364_v22 = vld [vmem:[#allocation53_spill] sm:$0xff]  ;;  %v8732_v30 = vld [vmem:[#allocation9 + $0x5f8] sm:$0xff]  ;;  %v3739_v17 = vmul.f32 %v3595_v42, %v3451_v14  ;;  %v8744_v14 = vpop.permute.xlu0 %2194 }
 0x2db   :  { %5506 = vmatpush3.bf16.msra.mxu1 %v10363_v48  ;;  %v3002_v12 = vsel %vm2898_vm3, %v2969_v54, %v3001_v24  ;;  %v10366_v34 = vpack.c.bf16 %v10364_v22, %v10365_v57  ;;  %v3740_v32 = vmul.f32 %v3596_v41, %v3452_v25  ;;  %v3597_v58 = vld [vmem:[#allocation8 + $0x450] sm:$0x7f]  ;;  %v2388_v1 = vsel %vm2330_vm2, %v2163_v56, %v8716_v0  ;;  %v8739_v54 = vld [vmem:[#allocation9 + $0x578] sm:$0xff] }
 0x2dc   :  { %v3159_v33 = vrot.slane %v2748_v16, 1  ;;  %v3358_v62 = vmax.f32 %v8646_v59, %v3002_v12  ;;  %v8737_v29 = vld [vmem:[#allocation9 + $0x570] sm:$0xff]  ;;  %v3724_v7 = vmul.f32 %v3580_v50, %v3436_v21  ;;  %v3873_v23 = vadd.f32 %v3872_v10, %v3723_v2  ;;  %v2073_v12 = vpop.permute.xlu1 %2072 }
 0x2dd   :  { %5508 = vmatprep.subr.bf16.mxu1 %v10366_v34  ;;  %v3581_v31 = vld [vmem:[#allocation8 + $0x3d0] sm:$0xff]  ;;  %v10367_v48 = vrot.slane %v8652_v44, 1  ;;  %v10370_v50 = vpack.c.bf16 %v8029_v60, %v8027_v8  ;;  %v5527_v10 = vpack.c.bf16 %v8732_v30, %v8730_v63  ;;  %v3887_v21 = vadd.f32 %v8667_v15, %v3708_v37 }
 0x2de   :  { %v3453_v57 = vmax.f32 %v2748_v16, %v3159_v33  ;;  %v3646_v42 = vmul.f32 %v3502_v3, %v3358_v62  ;;  %v10368_v41 = vld [vmem:[#allocation130_spill] sm:$0xff]  ;;  %v2343_v2 = vsel %vm2330_vm2, %v8424_v13, %v2069_v11  ;;  %v5529_v3 = vpack.c.bf16 %v8739_v54, %v8737_v29  ;;  %v10372_v62 = vld [vmem:[#allocation119_spill] sm:$0xff] }
 0x2df   :  { %v3160_v22 = vsel %vm2898_vm3, %v10367_v48, %v3159_v33  ;;  %v10369_v25 = vmax.f32 %v10368_v41, 0.0  ;;  %5510 = vmatpush3.bf16.msra.mxu1 %v10370_v50  ;;  %v3874_v33 = vsel %vm2898_vm3, %v3739_v17, 0.0  ;;  %v8766_v8 = vsel %vm2898_vm3, %v3740_v32, 0.0  ;;  %v3489_v54 = vld [vmem:[#allocation8 + $0xf0] sm:$0xff] }
 0x2e0   :  { %v3437_v59 = vmax.f32 %v8652_v44, %v3160_v22  ;;  %v3741_v16 = vmul.f32 %v3597_v58, %v3453_v57  ;;  %v10371_v44 = vpack.c.bf16 %v8048_v39, %v8046_v19  ;;  %v8768_v60 = vadd.f32 %v3912_v46, %v3646_v42  ;;  %v8778_v58 = vpop.permute.xlu0 %2226  ;;  %v10377_v22 = vld [vmem:[#allocation102_spill] sm:$0xff] }
 0x2e1   :  { %v8749_v56 = vmax.f32 %v10369_v25, %v2388_v1  ;;  %v8770_v15 = vadd.f32 %v3874_v33, %v3873_v23  ;;  %v3888_v37 = vadd.f32 %v3887_v21, %v3724_v7  ;;  %v2344_v13 = vsel %vm2330_vm2, %v2069_v11, %v8456_v49  ;;  %v2101_v7 = vpop.permute.xlu1 %2100  ;;  %v10374_v23 = vld [vmem:[#allocation29_spill] sm:$0xff]  ;;  %v10381_v25 = vld [vmem:[#allocation124_spill] sm:$0xff] }
 0x2e2   :  { %5512 = vmatprep.subr.bf16.mxu1 %v10371_v44  ;;  %v3725_v34 = vmul.f32 %v3581_v31, %v3437_v59  ;;  %v10373_v19 = vmax.f32 %v10372_v62, 0.0  ;;  %v2402_v46 = vsel %vm2330_vm2, %v8400_v20, %v8744_v14  ;;  %v2345_v32 = vsel %vm2330_vm2, %v8456_v49, %v2073_v12  ;;  %v10375_v31 = vld [vmem:[#allocation72_spill] sm:$0xff]  ;;  %v10383_v20 = vld [vmem:[#allocation58_spill] sm:$0xff] }
 0x2e3   :  { %v3003_v17 = vrot.slane %v8749_v56, 1  ;;  %v10376_v11 = vpack.c.bf16 %v10374_v23, %v10375_v31  ;;  %v3904_v48 = vsel %vm2898_vm3, %v3741_v16, 0.0  ;;  %v10378_v57 = vmax.f32 %v10377_v22, 0.0  ;;  %v10386_v49 = vld [vmem:[#allocation120_spill] sm:$0xff]  ;;  %v10388_v23 = vld [vmem:[#allocation105_spill] sm:$0xff] }
 0x2e4   :  { %v8776_v39 = vmax.f32 %v10373_v19, %v2343_v2  ;;  %v3903_v1 = vadd.f32 %v3902_v4, %v3725_v34  ;;  %v10379_v4 = vld [vmem:[#allocation121_spill] sm:$0xff]  ;;  %v10382_v50 = vmax.f32 %v10381_v25, 0.0  ;;  %v10384_v2 = vld [vmem:[#allocation40_spill] sm:$0xff]  ;;  %v10387_v33 = vmax.f32 %v10386_v49, 0.0  ;;  %v8813_v22 = vpop.permute.xlu0 %2258 }
 0x2e5   :  { %5514 = vmatpush3.bf16.msra.mxu1 %v10376_v11  ;;  %v2685_v42 = vmax.f32 %v10378_v57, %v2402_v46  ;;  %v10380_v59 = vmax.f32 %v10379_v4, 0.0  ;;  %v10385_v44 = vpack.c.bf16 %v10383_v20, %v10384_v2  ;;  %v2417_v16 = vsel %vm2330_vm2, %v8462_v40, %v8778_v58  ;;  %v10390_v4 = vld [vmem:[#allocation122_spill] sm:$0xff]  ;;  %v2133_v25 = vpop.permute.xlu1 %2132 }
 0x2e6   :  { %v2625_v21 = vmax.f32 %v10382_v50, %v2073_v12  ;;  %v8801_v34 = vmax.f32 %v10387_v33, %v2344_v13  ;;  %v2935_v62 = vrot.slane %v8776_v39, 1  ;;  %v2358_v19 = vsel %vm2330_vm2, %v8498_v5, %v2101_v7  ;;  %v10392_v50 = vld [vmem:[#allocation73_spill] sm:$0xff]  ;;  %v3518_v2 = vld [vmem:[#allocation8 + $0x1d8] sm:$0xff] }
 0x2e7   :  { %v2624_v41 = vmax.f32 %v10380_v59, %v2345_v32  ;;  %5516 = vmatprep.subr.bf16.mxu1 %v10385_v44  ;;  %v3033_v46 = vrot.slane %v2685_v42, 1  ;;  %v10389_v31 = vmax.f32 %v10388_v23, 0.0  ;;  %v8815_v13 = vadd.f32 %v3904_v48, %v3903_v1  ;;  %v3474_v48 = vld [vmem:[#allocation8 + $0x78] sm:$0xff] }
 0x2e8   :  { %v2944_v12 = vrot.slane %v2625_v21, 1  ;;  %v2359_v57 = vsel %vm2330_vm2, %v2101_v7, %v8541_v45  ;;  %v10391_v59 = vmax.f32 %v10390_v4, 0.0  ;;  %v2432_v5 = vsel %vm2330_vm2, %v8547_v55, %v8813_v22 }
 0x2e9   :  { %v2941_v32 = vrot.slane %v2624_v41, 1  ;;  %v8811_v11 = vmax.f32 %v10389_v31, %v2417_v16  ;;  %v10393_v20 = vpack.c.bf16 %v8232_v61, %v10392_v50  ;;  %v3034_v1 = vsel %vm2898_vm3, %v3001_v24, %v3033_v46  ;;  %v10397_v24 = vld [vmem:[#allocation123_spill] sm:$0xff] }
 0x2ea   :  { %v8821_v40 = vmax.f32 %v10391_v59, %v2358_v19  ;;  %v10394_v45 = vrot.slane %v8618_v52, 1  ;;  %v10395_v44 = vrot.slane %v8627_v43, 1  ;;  %v10396_v61 = vpack.c.bf16 %v8558_v18, %v8556_v47  ;;  %v10399_v59 = vld [vmem:[#allocation110_spill] sm:$0xff]  ;;  %v8854_v47 = vpop.permute.xlu0 %2290 }
 0x2eb   :  { %5518 = vmatpush3.bf16.msra.mxu1 %v10393_v20  ;;  %v3065_v55 = vrot.slane %v8811_v11, 1  ;;  %v3374_v33 = vmax.f32 %v8702_v27, %v3034_v1  ;;  %v10398_v23 = vmax.f32 %v10397_v24, 0.0  ;;  %v10400_v50 = vmax.f32 %v10399_v59, 0.0 }
 0x2ec   :  { %v2943_v7 = vsel %vm2898_vm3, %v2941_v32, %v10394_v45  ;;  %v2946_v49 = vsel %vm2898_vm3, %v2944_v12, %v10395_v44  ;;  %5520 = vmatprep.subr.bf16.mxu1 %v10396_v61  ;;  %v2938_v32 = vrot.slane %v8801_v34, 1  ;;  %v2936_v12 = vrot.slane %v8821_v40, 1  ;;  %v3534_v45 = vld [vmem:[#allocation8 + $0x258] sm:$0xff] }
 0x2ed   :  { %v3329_v16 = vmax.f32 %v2624_v41, %v2943_v7  ;;  %v3330_v19 = vmax.f32 %v2625_v21, %v2946_v49  ;;  %v8845_v31 = vmax.f32 %v10398_v23, %v2359_v57  ;;  %v3066_v4 = vsel %vm2898_vm3, %v3033_v46, %v3065_v55  ;;  %v2137_v57 = vpop.permute.xlu1 %2136  ;;  %v3473_v46 = vld [vmem:[#allocation8 + $0x70] sm:$0xff]  ;;  %v10403_v61 = vld [vmem:[#allocation127_spill] sm:$0xff] }
 0x2ee   :  { %v8852_v20 = vmax.f32 %v10400_v50, %v2432_v5  ;;  %v3662_v18 = vmul.f32 %v3518_v2, %v3374_v33  ;;  %v3390_v41 = vmax.f32 %v2685_v42, %v3066_v4  ;;  %v2373_v21 = vsel %vm2330_vm2, %v8620_v38, %v2133_v25  ;;  %v3471_v4 = vld [vmem:[#allocation8 + $0x60] sm:$0xff] }
 0x2ef   :  { %v3618_v27 = vmul.f32 %v3474_v48, %v3330_v19  ;;  %v10401_v1 = vpack.c.bf16 %v8572_v36, %v8570_v26  ;;  %v2937_v7 = vsel %vm2898_vm3, %v2935_v62, %v2936_v12  ;;  %v2939_v5 = vrot.slane %v8845_v31, 1 }
 0x2f0   :  { %v3097_v44 = vrot.slane %v8852_v20, 1  ;;  %v2374_v2 = vsel %vm2330_vm2, %v2133_v25, %v8654_v51  ;;  %v10402_v42 = vpack.c.bf16 %v8658_v6, %v8656_v9  ;;  %v3876_v38 = vrot.slane %v8770_v15, 4  ;;  %v10405_v25 = vld [vmem:[#allocation128_spill] sm:$0xff]  ;;  %v8881_v9 = vpop.permute.xlu0 %2322 }
 0x2f1   :  { %5522 = vmatpush3.bf16.msra.mxu1 %v10401_v1  ;;  %v3890_v26 = vadd.f32 %v8766_v8, %v3888_v37  ;;  %v3906_v36 = vrot.slane %v8815_v13, 4  ;;  %v3327_v48 = vmax.f32 %v8776_v39, %v2937_v7  ;;  %v2940_v62 = vsel %vm2898_vm3, %v2938_v32, %v2939_v5  ;;  %v8889_v32 = vpop.permute.xlu1 %2166  ;;  %v10411_v1 = vld [vmem:[#allocation129_spill] sm:$0xff]  ;;  %v3550_v7 = vld [vmem:[#allocation8 + $0x2d8] sm:$0xff] }
 0x2f2   :  { %5524 = vmatprep.subr.bf16.mxu1 %v10402_v42  ;;  %v3098_v49 = vsel %vm2898_vm3, %v3065_v55, %v3097_v44  ;;  %v10404_v33 = vmax.f32 %v10403_v61, 0.0  ;;  %v10406_v24 = vmax.f32 %v10405_v25, 0.0  ;;  %v3914_v6 = vadd.f32 %v8768_v60, %v3662_v18 }
 0x2f3   :  { %v8884_v8 = vmul.f32 %v3473_v46, %v3329_v16  ;;  %v8887_v37 = vsel %vm2330_vm2, %v3618_v27, 0.0  ;;  %v3678_v39 = vmul.f32 %v3534_v45, %v3390_v41  ;;  %v10407_v55 = vpack.c.bf16 %v8665_v28, %v8663_v53  ;;  %v10409_v28 = vld [vmem:[#allocation113_spill] sm:$0xff] }
 0x2f4   :  { %v2654_v19 = vmax.f32 %v10404_v33, %v2373_v21  ;;  %v8879_v23 = vmax.f32 %v10406_v24, %v2374_v2  ;;  %v10408_v21 = vld [vmem:[#allocation75_spill] sm:$0xff]  ;;  %v2375_v16 = vsel %vm2330_vm2, %v8654_v51, %v2137_v57  ;;  %v3328_v18 = vmax.f32 %v8801_v34, %v2940_v62  ;;  %v2169_v42 = vpop.permute.xlu0 %2168 }
 0x2f5   :  { %5526 = vmatpush3.bf16.msra.mxu1 %v10407_v55  ;;  %v2447_v60 = vsel %vm2330_vm2, %v10408_v21, %v8854_v47  ;;  %v3406_v53 = vmax.f32 %v8811_v11, %v3098_v49  ;;  %v10410_v27 = vmax.f32 %v10409_v28, 0.0  ;;  %v10412_v46 = vmax.f32 %v10411_v1, 0.0  ;;  %v3487_v2 = vld [vmem:[#allocation8 + $0xe0] sm:$0xff]  ;;  %v3472_v49 = vld [vmem:[#allocation8 + $0x68] sm:$0xff] }
 0x2f6   :  { %v2971_v59 = vrot.slane %v2654_v19, 1  ;;  %v2973_v50 = vrot.slane %v8879_v23, 1  ;;  %5528 = vmatprep.subr.bf16.mxu1 %v5527_v10  ;;  %v10413_v10 = vld [vmem:[#allocation133_spill] sm:$0xff]  ;;  %v3915_v62 = vadd.f32 %v3914_v6, %v3678_v39  ;;  %v3615_v61 = vmul.f32 %v3471_v4, %v3327_v48  ;;  %v3503_v4 = vld [vmem:[#allocation8 + $0x160] sm:$0xff] }
 0x2f7   :  { %v8907_v41 = vmax.f32 %v10410_v27, %v2447_v60  ;;  %v8911_v45 = vmax.f32 %v10412_v46, %v2375_v16  ;;  %v10414_v34 = vmax.f32 %v10413_v10, 0.0  ;;  %v3891_v55 = vrot.slane %v3890_v26, 4  ;;  %v10417_v27 = vld [vmem:[#allocation117_spill] sm:$0xff] }
 0x2f8   :  { %v2972_v51 = vsel %vm2898_vm3, %v2936_v12, %v2971_v59  ;;  %v2974_v63 = vsel %vm2898_vm3, %v2939_v5, %v2973_v50  ;;  %v3004_v30 = vsel %vm2898_vm3, %v2971_v59, %v3003_v17  ;;  %v3488_v5 = vld [vmem:[#allocation8 + $0xe8] sm:$0xff]  ;;  %v3694_v59 = vmul.f32 %v3550_v7, %v3406_v53 }
 0x2f9   :  { %v8922_v11 = vmax.f32 %v10414_v34, %v2137_v57  ;;  %v3343_v33 = vmax.f32 %v8821_v40, %v2972_v51  ;;  %v3344_v12 = vmax.f32 %v8845_v31, %v2974_v63  ;;  %5530 = vmatpush3.bf16.msra.mxu1 %v5529_v3  ;;  %v3129_v25 = vrot.slane %v8907_v41, 1  ;;  %v2197_v31 = vpop.permute.xlu1 %2196  ;;  %v3566_v63 = vld [vmem:[#allocation8 + $0x358] sm:$0xff] }
 0x2fa   :  { %v2975_v24 = vrot.slane %v8911_v45, 1  ;;  %v3359_v6 = vmax.f32 %v2654_v19, %v3004_v30  ;;  %v2462_v40 = vsel %vm2330_vm2, %v8695_v35, %v8881_v9  ;;  %v3616_v48 = vmul.f32 %v3472_v49, %v3328_v18 }
 0x2fb   :  { %v2977_v57 = vrot.slane %v8922_v11, 1  ;;  %v3631_v39 = vmul.f32 %v3487_v2, %v3343_v33  ;;  %v3130_v29 = vsel %vm2898_vm3, %v3097_v44, %v3129_v25  ;;  %v10415_v3 = vrot.slane %v8618_v52, 1  ;;  %v2199_v2 = vpop.permute.xlu0 %2198  ;;  %v3490_v33 = vld [vmem:[#allocation8 + $0xf8] sm:$0xff] }
 0x2fc   :  { %v3892_v60 = vadd.f32 %v3891_v55, %v3890_v26  ;;  %v3632_v16 = vmul.f32 %v3488_v5, %v3344_v12  ;;  %v10416_v53 = vrot.slane %v8627_v43, 1  ;;  %v3422_v44 = vmax.f32 %v8852_v20, %v3130_v29 }
 0x2fd   :  { %v2976_v21 = vsel %vm2898_vm3, %v10415_v3, %v2975_v24  ;;  %v3927_v19 = vadd.f32 %v3631_v39, %v3615_v61  ;;  %v10418_v1 = vmax.f32 %v10417_v27, 0.0  ;;  %v3877_v7 = vadd.f32 %v3876_v38, %v8770_v15  ;;  %v10419_v15 = vld [vmem:[#allocation132_spill] sm:$0xff]  ;;  %v2201_v55 = vpop.permute.xlu1 %2200  ;;  %v3598_v3 = vld [vmem:[#allocation8 + $0x458] sm:$0x7f] }
 0x2fe   :  { %v2978_v35 = vsel %vm2898_vm3, %v10416_v53, %v2977_v57  ;;  %v3345_v18 = vmax.f32 %v8618_v52, %v2976_v21  ;;  %v3893_v28 = vrot.slane %v3892_v60, 2  ;;  %v3916_v26 = vadd.f32 %v3915_v62, %v3694_v59  ;;  %v10421_v21 = vld [vmem:[#allocation134_spill] sm:$0xff] }
 0x2ff   :  { %v2749_v46 = vmax.f32 %v10418_v1, %v2462_v40  ;;  %v3647_v51 = vmul.f32 %v3503_v4, %v3359_v6  ;;  %v2389_v10 = vsel %vm2330_vm2, %v8716_v0, %v8889_v32  ;;  %v3346_v34 = vmax.f32 %v8627_v43, %v2978_v35  ;;  %v3582_v6 = vld [vmem:[#allocation8 + $0x3d8] sm:$0xff]  ;;  %v2229_v35 = vpop.permute.xlu0 %2228 }
 0x300   :  { %v3633_v30 = vmul.f32 %v3489_v54, %v3345_v18  ;;  %v3894_v52 = vadd.f32 %v3893_v28, %v3892_v60  ;;  %v3878_v20 = vrot.slane %v3877_v7, 2  ;;  %v8955_v61 = vadd.f32 %v3632_v16, %v3616_v48  ;;  %v10423_v16 = vld [vmem:[#allocation135_spill] sm:$0xff] }
 0x301   :  { %v3161_v49 = vrot.slane %v2749_v46, 1  ;;  %v10420_v38 = vmax.f32 %v10419_v15, 0.0  ;;  %v2390_v5 = vsel %vm2330_vm2, %v8889_v32, %v2169_v42  ;;  %v8966_v0 = vadd.f32 %v3927_v19, %v3647_v51  ;;  %v3504_v51 = vld [vmem:[#allocation8 + $0x168] sm:$0xff] }
 0x302   :  { %v8958_v12 = vadd.f32 %v3633_v30, %v8884_v8  ;;  %v3710_v43 = vmul.f32 %v3566_v63, %v3422_v44  ;;  %v3895_v59 = vrot.slane %v3894_v52, 1  ;;  %v3879_v8 = vadd.f32 %v3878_v20, %v3877_v7  ;;  %v10425_v63 = vld [vmem:[#allocation136_spill] sm:$0xff] }
 0x303   :  { %v8962_v62 = vmax.f32 %v10420_v38, %v2389_v10  ;;  %v3162_v39 = vsel %vm2898_vm3, %v3129_v25, %v3161_v49  ;;  %v3454_v48 = vmax.f32 %v2749_v46, %v3161_v49  ;;  %v3634_v29 = vmul.f32 %v3490_v33, %v3346_v34  ;;  %v2231_v34 = vpop.permute.xlu1 %2230  ;;  %v10427_v49 = vld [vmem:[#allocation137_spill] sm:$0xff] }
 0x304   :  { %v3438_v40 = vmax.f32 %v8907_v41, %v3162_v39  ;;  %v3896_v54 = vadd.f32 %v3895_v59, %v3894_v52  ;;  %v10422_v60 = vmax.f32 %v10421_v21, 0.0  ;;  %v10424_v19 = vmax.f32 %v10423_v16, 0.0  ;;  %v3506_v52 = vld [vmem:[#allocation8 + $0x178] sm:$0xff]  ;;  %v3505_v59 = vld [vmem:[#allocation8 + $0x170] sm:$0xff] }
 0x305   :  { %v3005_v4 = vrot.slane %v8962_v62, 1  ;;  %v3880_v25 = vrot.slane %v3879_v8, 1  ;;  %v2403_v44 = vsel %vm2330_vm2, %v8744_v14, %v2197_v31  ;;  %v3917_v28 = vadd.f32 %v3916_v26, %v3710_v43  ;;  %v10429_v39 = vld [vmem:[#allocation143_spill] sm:$0xff] }
 0x306   :  { %v8973_v32 = vmax.f32 %v10422_v60, %v2390_v5  ;;  %v8977_v53 = vmax.f32 %v10424_v19, %v2169_v42  ;;  %v3726_v18 = vmul.f32 %v3582_v6, %v3438_v40  ;;  %4604 = vmatprep.mubr.f32.mxu0 %v3896_v54  ;;  %v3742_v42 = vmul.f32 %v3598_v3, %v3454_v48  ;;  %v2233_v48 = vpop.permute.xlu0 %2232 }
 0x307   :  { %v3006_v41 = vsel %vm2898_vm3, %v2973_v50, %v3005_v4  ;;  %v3881_v7 = vadd.f32 %v3880_v25, %v3879_v8  ;;  %v10426_v30 = vmax.f32 %v10425_v63, 0.0  ;;  %v2404_v50 = vsel %vm2330_vm2, %v2197_v31, %v2199_v2  ;;  %v3519_v25 = vld [vmem:[#allocation8 + $0x1e0] sm:$0xff] }
 0x308   :  { %v3360_v27 = vmax.f32 %v8879_v23, %v3006_v41  ;;  %v3007_v1 = vrot.slane %v8973_v32, 1  ;;  %v3009_v46 = vrot.slane %v8977_v53, 1  ;;  %v3973_v14 = vsel %vm2330_vm2, %v3634_v29, 0.0  ;;  %v2261_v41 = vpop.permute.xlu1 %2260 }
 0x309   :  { %v8989_v10 = vmax.f32 %v10426_v30, %v2403_v44  ;;  %v10428_v20 = vmax.f32 %v10427_v49, 0.0  ;;  %v3918_v15 = vadd.f32 %v3917_v28, %v3726_v18  ;;  %4605 = vmatmul.mubr.f32.vlgmr.msra.gmra.mrb[84].mxu0 %v3881_v7  ;;  %v2405_v6 = vsel %vm2330_vm2, %v2199_v2, %v2201_v55  ;;  %v3522_v28 = vld [vmem:[#allocation8 + $0x1f8] sm:$0xff] }
 0x30a   :  { %v3008_v23 = vsel %vm2898_vm3, %v2975_v24, %v3007_v1  ;;  %v3010_v26 = vsel %vm2898_vm3, %v2977_v57, %v3009_v46  ;;  %v3648_v43 = vmul.f32 %v3504_v51, %v3360_v27  ;;  %v10430_v57 = vmax.f32 %v10429_v39, 0.0  ;;  %v10433_v27 = vld [vmem:[#allocation140_spill] sm:$0xff] }
 0x30b   :  { %v9001_v33 = vmax.f32 %v10428_v20, %v2404_v50  ;;  %v3361_v31 = vmax.f32 %v8911_v45, %v3008_v23  ;;  %v3362_v38 = vmax.f32 %v8922_v11, %v3010_v26  ;;  %v3035_v5 = vrot.slane %v8989_v10, 1  ;;  %v10431_v11 = vld [vmem:[#allocation138_spill] sm:$0xff]  ;;  %v3520_v50 = vld [vmem:[#allocation8 + $0x1e8] sm:$0xff]  ;;  %v2263_v26 = vpop.permute.xlu0 %2262 }
 0x30c   :  { %v9010_v40 = vmax.f32 %v10430_v57, %v2201_v55  ;;  %v3919_v8 = vsel %vm2898_vm3, %v3742_v42, 0.0  ;;  %v10432_v54 = vmax.f32 %v10431_v11, 0.0  ;;  %v2418_v55 = vsel %vm2330_vm2, %v8778_v58, %v2229_v35 }
 0x30d   :  { %v3037_v24 = vrot.slane %v9001_v33, 1  ;;  %v3650_v29 = vmul.f32 %v3506_v52, %v3362_v38  ;;  %v3036_v45 = vsel %vm2898_vm3, %v3003_v17, %v3035_v5  ;;  %v3974_v16 = vadd.f32 %v3973_v14, %v8887_v37  ;;  %v10435_v52 = vld [vmem:[#allocation142_spill] sm:$0xff]  ;;  %v3535_v38 = vld [vmem:[#allocation8 + $0x260] sm:$0xff] }
 0x30e   :  { %v9018_v3 = vmax.f32 %v10432_v54, %v2405_v6  ;;  %v3375_v21 = vmax.f32 %v8749_v56, %v3036_v45  ;;  %v3041_v60 = vrot.slane %v9010_v40, 1  ;;  %v9026_v19 = vadd.f32 %v3919_v8, %v3918_v15 }
 0x30f   :  { %v3038_v2 = vsel %vm2898_vm3, %v3005_v4, %v3037_v24  ;;  %v3649_v18 = vmul.f32 %v3505_v59, %v3361_v31  ;;  %v3943_v44 = vadd.f32 %v8955_v61, %v3648_v43  ;;  %v3975_v56 = vsel %vm2330_vm2, %v3650_v29, 0.0  ;;  %v10439_v59 = vld [vmem:[#allocation17_spill] sm:$0xff] }
 0x310   :  { %v3039_v17 = vrot.slane %v9018_v3, 1  ;;  %v3042_v4 = vsel %vm2898_vm3, %v3009_v46, %v3041_v60  ;;  %v10434_v42 = vmax.f32 %v10433_v27, 0.0  ;;  %v3376_v58 = vmax.f32 %v8962_v62, %v3038_v2  ;;  %v3521_v62 = vld [vmem:[#allocation8 + $0x1f0] sm:$0xff] }
 0x311   :  { %v3378_v51 = vmax.f32 %v8977_v53, %v3042_v4  ;;  %v2419_v63 = vsel %vm2330_vm2, %v2229_v35, %v2231_v34  ;;  %v3663_v30 = vmul.f32 %v3519_v25, %v3375_v21  ;;  %v10436_v46 = vmax.f32 %v10435_v52, 0.0  ;;  %v10437_v53 = vld [vmem:[#allocation21_spill] sm:$0xff] }
 0x312   :  { %v9034_v7 = vmax.f32 %v10434_v42, %v2418_v55  ;;  %v3040_v37 = vsel %vm2898_vm3, %v3007_v1, %v3039_v17  ;;  %v3958_v49 = vadd.f32 %v8958_v12, %v3649_v18  ;;  %v2420_v1 = vsel %vm2330_vm2, %v2231_v34, %v2233_v48  ;;  %v10441_v55 = vld [vmem:[#allocation144_spill] sm:$0xff]  ;;  %v3538_v18 = vld [vmem:[#allocation8 + $0x278] sm:$0xff] }
 0x313   :  { %v3377_v61 = vmax.f32 %v8973_v32, %v3040_v37  ;;  %v9044_v23 = vmax.f32 %v10436_v46, %v2419_v63  ;;  %v3666_v20 = vmul.f32 %v3522_v28, %v3378_v51  ;;  %v10438_v15 = vmax.f32 %v10437_v53, 0.0  ;;  %v3537_v37 = vld [vmem:[#allocation8 + $0x270] sm:$0xff]  ;;  %v10443_v51 = vld [vmem:[#allocation19_spill] sm:$0xff] }
 0x314   :  { %v3067_v14 = vrot.slane %v9034_v7, 1  ;;  %v3976_v31 = vadd.f32 %v3975_v56, %v3974_v16  ;;  %v10440_v6 = vmax.f32 %v10439_v59, 0.0  ;;  %v3664_v57 = vmul.f32 %v3520_v50, %v3376_v58  ;;  %v2293_v56 = vpop.permute.xlu0 %2292  ;;  %v3536_v58 = vld [vmem:[#allocation8 + $0x268] sm:$0xff] }
 0x315   :  { %v9050_v35 = vmax.f32 %v10438_v15, %v2233_v48  ;;  %v3069_v43 = vrot.slane %v9044_v23, 1  ;;  %v2433_v34 = vsel %vm2330_vm2, %v8813_v22, %v2261_v41  ;;  %v2265_v48 = vpop.permute.xlu1 %2264  ;;  %v3929_v29 = vadd.f32 %v8966_v0, %v3663_v30  ;;  %v10447_v50 = vld [vmem:[#allocation148_spill] sm:$0xff] }
 0x316   :  { %v3068_v32 = vsel %vm2898_vm3, %v3035_v5, %v3067_v14  ;;  %v9056_v39 = vmax.f32 %v10440_v6, %v2420_v1  ;;  %v3665_v45 = vmul.f32 %v3521_v62, %v3377_v61  ;;  %v3977_v54 = vsel %vm2330_vm2, %v3666_v20, 0.0 }
 0x317   :  { %v3391_v12 = vmax.f32 %v8989_v10, %v3068_v32  ;;  %v3073_v8 = vrot.slane %v9050_v35, 1  ;;  %v3070_v5 = vsel %vm2898_vm3, %v3037_v24, %v3069_v43  ;;  %v10442_v10 = vmax.f32 %v10441_v55, 0.0  ;;  %v4204_v55 = vld [vmem:[#allocation9 + $0x680] sm:$0xff] }
 0x318   :  { %v3071_v11 = vrot.slane %v9056_v39, 1  ;;  %v2434_v0 = vsel %vm2330_vm2, %v2261_v41, %v2263_v26  ;;  %v2435_v24 = vsel %vm2330_vm2, %v2263_v26, %v2265_v48  ;;  %v3944_v28 = vadd.f32 %v3943_v44, %v3664_v57 }
 0x319   :  { %v3679_v21 = vmul.f32 %v3535_v38, %v3391_v12  ;;  %v3074_v2 = vsel %vm2898_vm3, %v3041_v60, %v3073_v8  ;;  %v9069_v16 = vmax.f32 %v10442_v10, %v2433_v34  ;;  %v3392_v4 = vmax.f32 %v9001_v33, %v3070_v5  ;;  %v4205_v10 = vld [vmem:[#allocation9 + $0x688] sm:$0xff] }
 0x31a   :  { %v3072_v22 = vsel %vm2898_vm3, %v3039_v17, %v3071_v11  ;;  %v3394_v25 = vmax.f32 %v9010_v40, %v3074_v2  ;;  %v3959_v42 = vadd.f32 %v3958_v49, %v3665_v45  ;;  %v10444_v63 = vmax.f32 %v10443_v51, 0.0  ;;  %v10445_v40 = vld [vmem:[#allocation145_spill] sm:$0xff]  ;;  %v2295_v49 = vpop.permute.xlu1 %2294  ;;  %v4236_v51 = vld [vmem:[#allocation9 + $0x780] sm:$0xff] }
 0x31b   :  { %v3393_v27 = vmax.f32 %v9018_v3, %v3072_v22  ;;  %v3099_v60 = vrot.slane %v9069_v16, 1  ;;  %v10446_v30 = vmax.f32 %v10445_v40, 0.0  ;;  %v10448_v61 = vmax.f32 %v10447_v50, 0.0  ;;  %v3551_v3 = vld [vmem:[#allocation8 + $0x2e0] sm:$0xff]  ;;  %v3552_v45 = vld [vmem:[#allocation8 + $0x2e8] sm:$0xff]  ;;  %v3553_v22 = vld [vmem:[#allocation8 + $0x2f0] sm:$0xff] }
 0x31c   :  { %v9080_v17 = vmax.f32 %v10444_v63, %v2434_v0  ;;  %v3978_v33 = vadd.f32 %v3977_v54, %v3976_v31  ;;  %v3682_v52 = vmul.f32 %v3538_v18, %v3394_v25  ;;  %v2448_v26 = vsel %vm2330_vm2, %v8854_v47, %v2293_v56  ;;  %v10449_v31 = vld [vmem:[#allocation146_spill] sm:$0xff]  ;;  %v10451_v54 = vld [vmem:[#allocation147_spill] sm:$0xff]  ;;  %v4237_v63 = vld [vmem:[#allocation9 + $0x788] sm:$0xff] }
 0x31d   :  { %v9084_v41 = vmax.f32 %v10446_v30, %v2435_v24  ;;  %v9088_v44 = vmax.f32 %v10448_v61, %v2265_v48  ;;  %v3100_v46 = vsel %vm2898_vm3, %v3067_v14, %v3099_v60  ;;  %v3930_v62 = vadd.f32 %v3929_v29, %v3679_v21  ;;  %v3568_v61 = vld [vmem:[#allocation8 + $0x368] sm:$0xff] }
 0x31e   :  { %v3407_v20 = vmax.f32 %v9034_v7, %v3100_v46  ;;  %v3101_v1 = vrot.slane %v9080_v17, 1  ;;  %v3680_v15 = vmul.f32 %v3536_v58, %v3392_v4  ;;  %v3681_v38 = vmul.f32 %v3537_v37, %v3393_v27  ;;  %v4188_v4 = vld [vmem:[#allocation9 + $0x600] sm:$0xff] }
 0x31f   :  { %v3103_v53 = vrot.slane %v9084_v41, 1  ;;  %v3105_v32 = vrot.slane %v9088_v44, 1  ;;  %v10450_v59 = vmax.f32 %v10449_v31, 0.0  ;;  %v2449_v7 = vsel %vm2330_vm2, %v2293_v56, %v2295_v49 }
 0x320   :  { %v3695_v14 = vmul.f32 %v3551_v3, %v3407_v20  ;;  %v3102_v57 = vsel %vm2898_vm3, %v3069_v43, %v3101_v1  ;;  %v3979_v12 = vsel %vm2330_vm2, %v3682_v52, 0.0  ;;  %v10452_v21 = vmax.f32 %v10451_v54, 0.0  ;;  %v10453_v52 = vld [vmem:[#allocation149_spill] sm:$0xff] }
 0x321   :  { %v9099_v6 = vmax.f32 %v10450_v59, %v2448_v26  ;;  %v3104_v47 = vsel %vm2898_vm3, %v3071_v11, %v3103_v53  ;;  %v3408_v34 = vmax.f32 %v9044_v23, %v3102_v57  ;;  %v3106_v48 = vsel %vm2898_vm3, %v3073_v8, %v3105_v32  ;;  %v3554_v8 = vld [vmem:[#allocation8 + $0x2f8] sm:$0xff]  ;;  %v2325_v26 = vpop.permute.xlu1 %2324  ;;  %v4206_v57 = vld [vmem:[#allocation9 + $0x690] sm:$0xff] }
 0x322   :  { %v3409_v5 = vmax.f32 %v9056_v39, %v3104_v47  ;;  %v3410_v43 = vmax.f32 %v9050_v35, %v3106_v48  ;;  %v9116_v11 = vmax.f32 %v10452_v21, %v2449_v7  ;;  %v3921_v2 = vrot.slane %v9026_v19, 4  ;;  %v4190_v54 = vld [vmem:[#allocation9 + $0x610] sm:$0xff]  ;;  %v4191_v21 = vld [vmem:[#allocation9 + $0x618] sm:$0xff] }
 0x323   :  { %v3131_v29 = vrot.slane %v9099_v6, 1  ;;  %v3945_v23 = vadd.f32 %v3944_v28, %v3680_v15  ;;  %v9119_v18 = vadd.f32 %v3959_v42, %v3681_v38  ;;  %v3907_v35 = vadd.f32 %v3906_v36, %v8815_v13  ;;  %v2297_v28 = vpop.permute.xlu0 %2296  ;;  %v3567_v36 = vld [vmem:[#allocation8 + $0x360] sm:$0xff]  ;;  %v10455_v15 = vld [vmem:[#allocation22_spill] sm:$0xff] }
 0x324   :  { %v9127_v39 = vadd.f32 %v3979_v12, %v3978_v33  ;;  %v9129_v0 = vadd.f32 %v3930_v62, %v3695_v14  ;;  %v3133_v24 = vrot.slane %v9116_v11, 1  ;;  %v3922_v56 = vadd.f32 %v3921_v2, %v9026_v19  ;;  %v4220_v62 = vld [vmem:[#allocation9 + $0x700] sm:$0xff]  ;;  %v4221_v14 = vld [vmem:[#allocation9 + $0x708] sm:$0xff]  ;;  %v3570_v2 = vld [vmem:[#allocation8 + $0x378] sm:$0xff] }
 0x325   :  { %v3132_v25 = vsel %vm2898_vm3, %v3099_v60, %v3131_v29  ;;  %v3696_v27 = vmul.f32 %v3552_v45, %v3408_v34  ;;  %v3908_v58 = vrot.slane %v3907_v35, 2  ;;  %v5531_v37 = vpack.c.bf16 %v4205_v10, %v4204_v55  ;;  %v4189_v60 = vld [vmem:[#allocation9 + $0x608] sm:$0xff]  ;;  %v10457_v10 = vld [vmem:[#allocation150_spill] sm:$0xff] }
 0x326   :  { %v3423_v42 = vmax.f32 %v9069_v16, %v3132_v25  ;;  %v3697_v40 = vmul.f32 %v3553_v22, %v3409_v5  ;;  %v3698_v13 = vmul.f32 %v3554_v8, %v3410_v43  ;;  %v3134_v30 = vsel %vm2898_vm3, %v3101_v1, %v3133_v24 }
 0x327   :  { %v3923_v50 = vrot.slane %v3922_v56, 2  ;;  %v3424_v19 = vmax.f32 %v9080_v17, %v3134_v30  ;;  %v3909_v33 = vadd.f32 %v3908_v58, %v3907_v35  ;;  %5532 = vmatprep.subr.bf16.mxu0 %v5531_v37  ;;  %v2450_v16 = vsel %vm2330_vm2, %v2295_v49, %v2297_v28  ;;  %v4207_v17 = vld [vmem:[#allocation9 + $0x698] sm:$0xff]  ;;  %v2327_v43 = vpop.permute.xlu0 %2326  ;;  %v4238_v35 = vld [vmem:[#allocation9 + $0x790] sm:$0xff] }
 0x328   :  { %v10454_v3 = vmax.f32 %v10453_v52, 0.0  ;;  %v10456_v38 = vmax.f32 %v10455_v15, 0.0  ;;  %v5533_v1 = vpack.c.bf16 %v4189_v60, %v4188_v4  ;;  %v5563_v59 = vpack.c.bf16 %v4237_v63, %v4236_v51  ;;  %v2329_v60 = vpop.permute.xlu1 %2328  ;;  %v3569_v63 = vld [vmem:[#allocation8 + $0x370] sm:$0xff]  ;;  %v10459_v30 = vld [vmem:[#allocation151_spill] sm:$0xff] }
 0x329   :  { %v3924_v20 = vadd.f32 %v3923_v50, %v3922_v56  ;;  %v3946_v47 = vadd.f32 %v3945_v23, %v3696_v27  ;;  %v3711_v7 = vmul.f32 %v3567_v36, %v3423_v42  ;;  %v3910_v12 = vrot.slane %v3909_v33, 1  ;;  %v4239_v56 = vld [vmem:[#allocation9 + $0x798] sm:$0xff] }
 0x32a   :  { %v9141_v46 = vmax.f32 %v10454_v3, %v2297_v28  ;;  %v9145_v31 = vmax.f32 %v10456_v38, %v2450_v16  ;;  %v3712_v34 = vmul.f32 %v3568_v61, %v3424_v19  ;;  %5534 = vmatpush3.bf16.msra.mxu0 %v5533_v1  ;;  %5564 = vmatprep.subr.bf16.mxu1 %v5563_v59  ;;  %v10458_v23 = vmax.f32 %v10457_v10, 0.0  ;;  %v3599_v16 = vld [vmem:[#allocation8 + $0x460] sm:$0x7f]  ;;  %v10461_v38 = vld [vmem:[#allocation25_spill] sm:$0xff] }
 0x32b   :  { %v3925_v48 = vrot.slane %v3924_v20, 1  ;;  %v2463_v5 = vsel %vm2330_vm2, %v8881_v9, %v2325_v26  ;;  %v5565_v8 = vpack.c.bf16 %v4221_v14, %v4220_v62  ;;  %v5535_v25 = vpack.c.bf16 %v4207_v17, %v4206_v57  ;;  %v4222_v62 = vld [vmem:[#allocation9 + $0x710] sm:$0xff]  ;;  %v4208_v59 = vld [vmem:[#allocation9 + $0x6a0] sm:$0xff]  ;;  %v4209_v14 = vld [vmem:[#allocation9 + $0x6a8] sm:$0xff] }
 0x32c   :  { %v3137_v49 = vrot.slane %v9141_v46, 1  ;;  %v3135_v45 = vrot.slane %v9145_v31, 1  ;;  %v2750_v22 = vmax.f32 %v10458_v23, %v2463_v5  ;;  %v3911_v4 = vadd.f32 %v3910_v12, %v3909_v33  ;;  %v3600_v5 = vld [vmem:[#allocation8 + $0x468] sm:$0x7f] }
 0x32d   :  { %v3926_v28 = vadd.f32 %v3925_v48, %v3924_v20  ;;  %5536 = vmatprep.subr.bf16.mxu0 %v5535_v25  ;;  %v2464_v58 = vsel %vm2330_vm2, %v2325_v26, %v2327_v43  ;;  %v5537_v37 = vpack.c.bf16 %v4191_v21, %v4190_v54  ;;  %v3981_v51 = vsel %vm2330_vm2, %v3698_v13, 0.0  ;;  %v4223_v20 = vld [vmem:[#allocation9 + $0x718] sm:$0xff]  ;;  %v4193_v48 = vld [vmem:[#allocation9 + $0x628] sm:$0xff]  ;;  %v3585_v54 = vld [vmem:[#allocation8 + $0x3f0] sm:$0xff] }
 0x32e   :  { %v3138_v55 = vsel %vm2898_vm3, %v3105_v32, %v3137_v49  ;;  %v3136_v9 = vsel %vm2898_vm3, %v3103_v53, %v3135_v45  ;;  %v3163_v32 = vrot.slane %v2750_v22, 1  ;;  %v10460_v50 = vmax.f32 %v10459_v30, 0.0  ;;  %v3601_v21 = vld [vmem:[#allocation8 + $0x470] sm:$0x7f]  ;;  %v4195_v30 = vld [vmem:[#allocation9 + $0x638] sm:$0xff] }
 0x32f   :  { %v3426_v27 = vmax.f32 %v9088_v44, %v3138_v55  ;;  %v3425_v42 = vmax.f32 %v9084_v41, %v3136_v9  ;;  %4674 = vmatprep.mubr.f32.mxu1 %v3926_v28  ;;  %v5567_v19 = vpack.c.bf16 %v4239_v56, %v4238_v35  ;;  %v3961_v53 = vadd.f32 %v9119_v18, %v3697_v40  ;;  %v3583_v44 = vld [vmem:[#allocation8 + $0x3e0] sm:$0xff]  ;;  %v4241_v56 = vld [vmem:[#allocation9 + $0x7a8] sm:$0xff] }
 0x330   :  { %v2751_v61 = vmax.f32 %v10460_v50, %v2464_v58  ;;  %4675 = vmatmul.mubr.f32.vlgmr.msra.gmra.mrb[84].mxu1 %v3911_v4  ;;  %v3164_v41 = vsel %vm2898_vm3, %v3131_v29, %v3163_v32  ;;  %v3455_v33 = vmax.f32 %v2750_v22, %v3163_v32  ;;  %5538 = vmatpush3.bf16.msra.mxu0 %v5537_v37  ;;  %v10462_v29 = vmax.f32 %v10461_v38, 0.0  ;;  %v3586_v22 = vld [vmem:[#allocation8 + $0x3f8] sm:$0xff]  ;;  %v4240_v35 = vld [vmem:[#allocation9 + $0x7a0] sm:$0xff]  ;;  %v4210_v32 = vld [vmem:[#allocation9 + $0x6b0] sm:$0xff] }
 0x331   :  { %v3714_v36 = vmul.f32 %v3570_v2, %v3426_v27  ;;  %v3932_v13 = vadd.f32 %v9129_v0, %v3711_v7  ;;  %v3439_v52 = vmax.f32 %v9099_v6, %v3164_v41  ;;  %5566 = vmatpush3.bf16.msra.mxu1 %v5565_v8  ;;  %v2465_v26 = vsel %vm2330_vm2, %v2327_v43, %v2329_v60  ;;  %v3584_v0 = vld [vmem:[#allocation8 + $0x3e8] sm:$0xff]  ;;  %v10463_v7 = vld [vmem:[#allocation27_spill] sm:$0xff]  ;;  %v4226_v41 = vld [vmem:[#allocation9 + $0x730] sm:$0xff] }
 0x332   :  { %v3165_v3 = vrot.slane %v2751_v61, 1  ;;  %v3713_v18 = vmul.f32 %v3569_v63, %v3425_v42  ;;  %v3947_v40 = vadd.f32 %v3946_v47, %v3712_v34  ;;  %5568 = vmatprep.subr.bf16.mxu1 %v5567_v19  ;;  %v3982_v15 = vadd.f32 %v3981_v51, %v9127_v39  ;;  %v4192_v34 = vld [vmem:[#allocation9 + $0x620] sm:$0xff]  ;;  %v4225_v42 = vld [vmem:[#allocation9 + $0x728] sm:$0xff]  ;;  %v4211_v63 = vld [vmem:[#allocation9 + $0x6b8] sm:$0xff] }
 0x333   :  { %v2752_v1 = vmax.f32 %v10462_v29, %v2465_v26  ;;  %v3727_v57 = vmul.f32 %v3583_v44, %v3439_v52  ;;  %v3983_v17 = vsel %vm2330_vm2, %v3714_v36, 0.0  ;;  %v10464_v12 = vmax.f32 %v10463_v7, 0.0  ;;  %v4224_v27 = vld [vmem:[#allocation9 + $0x720] sm:$0xff]  ;;  %v4194_v36 = vld [vmem:[#allocation9 + $0x630] sm:$0xff]  ;;  %v4227_v52 = vld [vmem:[#allocation9 + $0x738] sm:$0xff]  ;;  %v5091_v26 = vpop.f32.mrb[80].mxu0 }
 0x334   :  { %v3166_v6 = vsel %vm2898_vm3, %v3133_v24, %v3165_v3  ;;  %v3743_v39 = vmul.f32 %v3599_v16, %v3455_v33  ;;  %v5569_v55 = vpack.c.bf16 %v4223_v20, %v4222_v62  ;;  %v3456_v23 = vmax.f32 %v2751_v61, %v3165_v3  ;;  %v3602_v24 = vld [vmem:[#allocation8 + $0x478] sm:$0x7f]  ;;  %v4242_v44 = vld [vmem:[#allocation9 + $0x7b0] sm:$0xff]  ;;  %v4213_v3 = vld [vmem:[#allocation9 + $0x6c8] sm:$0xff]  ;;  %v5092_v38 = vpop.f32.mrb[81].mxu0 }
 0x335   :  { %v2753_v47 = vmax.f32 %v10464_v12, %v2329_v60  ;;  %v3440_v43 = vmax.f32 %v9116_v11, %v3166_v6  ;;  %v3167_v2 = vrot.slane %v2752_v1, 1  ;;  %v3933_v10 = vadd.f32 %v3932_v13, %v3727_v57  ;;  %v4197_v57 = vld [vmem:[#allocation9 + $0x648] sm:$0xff] }
 0x336   :  { %v5539_v25 = vpack.c.bf16 %v4209_v14, %v4208_v59  ;;  %5570 = vmatpush3.bf16.msra.mxu1 %v5569_v55  ;;  %v5541_v11 = vpack.c.bf16 %v4193_v48, %v4192_v34  ;;  %v3962_v58 = vadd.f32 %v3961_v53, %v3713_v18  ;;  %v3984_v37 = vadd.f32 %v3983_v17, %v3982_v15  ;;  %v4243_v53 = vld [vmem:[#allocation9 + $0x7b8] sm:$0xff]  ;;  %v4245_v6 = vld [vmem:[#allocation9 + $0x7c8] sm:$0xff] }
 0x337   :  { %v3169_v8 = vrot.slane %v2753_v47, 1  ;;  %v3728_v28 = vmul.f32 %v3584_v0, %v3440_v43  ;;  %v3168_v4 = vsel %vm2898_vm3, %v3135_v45, %v3167_v2  ;;  %v3457_v9 = vmax.f32 %v2752_v1, %v3167_v2  ;;  %v4244_v0 = vld [vmem:[#allocation9 + $0x7c0] sm:$0xff]  ;;  %v4215_v34 = vld [vmem:[#allocation9 + $0x6d8] sm:$0xff] }
 0x338   :  { %v3441_v51 = vmax.f32 %v9145_v31, %v3168_v4  ;;  %5540 = vmatprep.subr.bf16.mxu0 %v5539_v25  ;;  %v3934_v45 = vsel %vm2898_vm3, %v3743_v39, 0.0  ;;  %v3744_v33 = vmul.f32 %v3600_v5, %v3456_v23  ;;  %v5571_v13 = vpack.c.bf16 %v4241_v56, %v4240_v35  ;;  %v4212_v31 = vld [vmem:[#allocation9 + $0x6c0] sm:$0xff]  ;;  %v4246_v23 = vld [vmem:[#allocation9 + $0x7d0] sm:$0xff] }
 0x339   :  { %v3170_v60 = vsel %vm2898_vm3, %v3137_v49, %v3169_v8  ;;  %v3458_v61 = vmax.f32 %v2753_v47, %v3169_v8  ;;  %v3745_v19 = vmul.f32 %v3601_v21, %v3457_v9  ;;  %5542 = vmatpush3.bf16.msra.mxu0 %v5541_v11  ;;  %v5573_v49 = vpack.c.bf16 %v4225_v42, %v4224_v27  ;;  %v4228_v43 = vld [vmem:[#allocation9 + $0x740] sm:$0xff]  ;;  %v4198_v56 = vld [vmem:[#allocation9 + $0x650] sm:$0xff]  ;;  %v4217_v11 = vld [vmem:[#allocation9 + $0x6e8] sm:$0xff] }
 0x33a   :  { %v3442_v50 = vmax.f32 %v9141_v46, %v3170_v60  ;;  %v3729_v16 = vmul.f32 %v3585_v54, %v3441_v51  ;;  %v9195_v62 = vadd.f32 %v3934_v45, %v3933_v10  ;;  %v3948_v20 = vadd.f32 %v3947_v40, %v3728_v28  ;;  %v4196_v46 = vld [vmem:[#allocation9 + $0x640] sm:$0xff]  ;;  %5572 = vmatprep.subr.bf16.mxu1 %v5571_v13  ;;  %v4214_v40 = vld [vmem:[#allocation9 + $0x6d0] sm:$0xff]  ;;  %v4229_v54 = vld [vmem:[#allocation9 + $0x748] sm:$0xff] }
 0x33b   :  { %v3746_v15 = vmul.f32 %v3602_v24, %v3458_v61  ;;  %v5543_v1 = vpack.c.bf16 %v4211_v63, %v4210_v32  ;;  %v5545_v59 = vpack.c.bf16 %v4195_v30, %v4194_v36  ;;  %v5575_v14 = vpack.c.bf16 %v4243_v53, %v4242_v44  ;;  %5574 = vmatpush3.bf16.msra.mxu1 %v5573_v49  ;;  %v4199_v28 = vld [vmem:[#allocation9 + $0x658] sm:$0xff]  ;;  %v4216_v9 = vld [vmem:[#allocation9 + $0x6e0] sm:$0xff]  ;;  %v4230_v32 = vld [vmem:[#allocation9 + $0x750] sm:$0xff] }
 0x33c   :  { %v3730_v18 = vmul.f32 %v3586_v22, %v3442_v50  ;;  %v3963_v29 = vadd.f32 %v3962_v58, %v3729_v16  ;;  %v3964_v17 = vsel %vm2898_vm3, %v3745_v19, 0.0  ;;  %v5577_v12 = vpack.c.bf16 %v4227_v52, %v4226_v41  ;;  %v4247_v22 = vld [vmem:[#allocation9 + $0x7d8] sm:$0xff]  ;;  %v4200_v51 = vld [vmem:[#allocation9 + $0x660] sm:$0xff]  ;;  %v4249_v36 = vld [vmem:[#allocation9 + $0x7e8] sm:$0xff] }
 0x33d   :  { %v5547_v47 = vpack.c.bf16 %v4213_v3, %v4212_v31  ;;  %v3949_v48 = vsel %vm2898_vm3, %v3744_v33, 0.0  ;;  %5544 = vmatprep.subr.bf16.mxu0 %v5543_v1  ;;  %5576 = vmatprep.subr.bf16.mxu1 %v5575_v14  ;;  %v3988_v2 = vsel %vm3987_vm4, %v3746_v15, 0.0  ;;  %v5549_v55 = vpack.c.bf16 %v4197_v57, %v4196_v46  ;;  %v4231_v58 = vld [vmem:[#allocation9 + $0x758] sm:$0xff]  ;;  %v4248_v63 = vld [vmem:[#allocation9 + $0x7e0] sm:$0xff]  ;;  %v4201_v61 = vld [vmem:[#allocation9 + $0x668] sm:$0xff] }
 0x33e   :  { %v3985_v7 = vsel %vm2330_vm2, %v3730_v18, 0.0  ;;  %v3965_v39 = vadd.f32 %v3964_v17, %v3963_v29  ;;  %v3950_v21 = vadd.f32 %v3949_v48, %v3948_v20  ;;  %5546 = vmatpush3.bf16.msra.mxu0 %v5545_v59  ;;  %v5579_v10 = vpack.c.bf16 %v4245_v6, %v4244_v0  ;;  %v4218_v19 = vld [vmem:[#allocation9 + $0x6f0] sm:$0xff]  ;;  %v4219_v44 = vld [vmem:[#allocation9 + $0x6f8] sm:$0xff]  ;;  %v4232_v49 = vld [vmem:[#allocation9 + $0x760] sm:$0xff] }
 0x33f   :  { %v3986_v5 = vadd.f32 %v3985_v7, %v3984_v37  ;;  %v3936_v24 = vrot.slane %v9195_v62, 4  ;;  %5548 = vmatprep.subr.bf16.mxu0 %v5547_v47  ;;  %v5551_v35 = vpack.c.bf16 %v4215_v34, %v4214_v40  ;;  %5578 = vmatpush3.bf16.msra.mxu1 %v5577_v12  ;;  %v5581_v4 = vpack.c.bf16 %v4229_v54, %v4228_v43  ;;  %v4233_v52 = vld [vmem:[#allocation9 + $0x768] sm:$0xff]  ;;  %v4250_v15 = vld [vmem:[#allocation9 + $0x7f0] sm:$0xff]  ;;  %v4251_v46 = vld [vmem:[#allocation9 + $0x7f8] sm:$0x7f] }
 0x340   :  { %v3966_v8 = vrot.slane %v3965_v39, 4  ;;  %5580 = vmatprep.subr.bf16.mxu1 %v5579_v10  ;;  %v5583_v42 = vpack.c.bf16 %v4247_v22, %v4246_v23  ;;  %v9202_v37 = vadd.f32 %v5092_v38, %v5091_v26  ;;  %v5553_v60 = vpack.c.bf16 %v4199_v28, %v4198_v56  ;;  %v4202_v29 = vld [vmem:[#allocation9 + $0x670] sm:$0xff]  ;;  %v4235_v7 = vld [vmem:[#allocation9 + $0x778] sm:$0xff] }
 0x341   :  { %v3989_v25 = vadd.f32 %v3988_v2, %v3986_v5  ;;  %v3951_v30 = vrot.slane %v3950_v21, 4  ;;  %v5555_v50 = vpack.c.bf16 %v4217_v11, %v4216_v9  ;;  %v3937_v53 = vadd.f32 %v3936_v24, %v9195_v62  ;;  %v4203_v62 = vld [vmem:[#allocation9 + $0x678] sm:$0xff]  ;;  %v4234_v17 = vld [vmem:[#allocation9 + $0x770] sm:$0xff] }
 0x342   :  { %5550 = vmatpush3.bf16.msra.mxu0 %v5549_v55  ;;  %v3967_v41 = vadd.f32 %v3966_v8, %v3965_v39  ;;  %v5585_v33 = vpack.c.bf16 %v4231_v58, %v4230_v32  ;;  %v5587_v13 = vpack.c.bf16 %v4249_v36, %v4248_v63  ;;  %v5557_v20 = vpack.c.bf16 %v4201_v61, %v4200_v51 }
 0x343   :  { %v3990_v27 = vrot.slane %v3989_v25, 4  ;;  %5552 = vmatprep.subr.bf16.mxu0 %v5551_v35  ;;  %5582 = vmatpush3.bf16.msra.mxu1 %v5581_v4  ;;  %v3952_v16 = vadd.f32 %v3951_v30, %v3950_v21  ;;  %v3938_v31 = vrot.slane %v3937_v53, 2  ;;  %v5559_v18 = vpack.c.bf16 %v4219_v44, %v4218_v19 }
 0x344   :  { %5584 = vmatprep.subr.bf16.mxu1 %v5583_v42  ;;  %v3968_v26 = vrot.slane %v3967_v41, 2  ;;  %v5589_v57 = vpack.c.bf16 %v4233_v52, %v4232_v49  ;;  %v5591_v6 = vpack.c.bf16 %v4251_v46, %v4250_v15  ;;  %v5561_v47 = vpack.c.bf16 %v4203_v62, %v4202_v29 }
 0x345   :  { %v3991_v45 = vadd.f32 %v3990_v27, %v3989_v25  ;;  %v3953_v38 = vrot.slane %v3952_v16, 2  ;;  %v3939_v1 = vadd.f32 %v3938_v31, %v3937_v53  ;;  %v5594_v5 = vpack.c.bf16 %v4235_v7, %v4234_v17 }
 0x346   :  { %5554 = vmatpush3.bf16.msra.mxu0 %v5553_v60  ;;  %v3969_v14 = vadd.f32 %v3968_v26, %v3967_v41  ;;  %v4253_v2 = vstv %s9227_s4  ;;  %s5767_s4 = smov [#allocation11]  }
 0x347   :  { %v3992_v3 = vrot.slane %v3991_v45, 2  ;;  %5556 = vmatprep.subr.bf16.mxu0 %v5555_v50  ;;  %5586 = vmatpush3.bf16.msra.mxu1 %v5585_v33  ;;  %v3954_v0 = vadd.f32 %v3953_v38, %v3952_v16  ;;  %v3940_v34 = vrot.slane %v3939_v1, 1  ;;  %v4327_v23 = vadd.f32 %v9202_v37, %v4253_v2  ;;  %s4828_s19 = sshll.u32 %s5767_s4, 4  ;;  %s4829_s19 = int_to_ptr.vmem [resolvable:$true] %s4828_s19 }
 0x348   :  { %5588 = vmatprep.subr.bf16.mxu1 %v5587_v13  ;;  %v3970_v39 = vrot.slane %v3969_v14, 1  ;;  %s5726_s20 = scalar_lea.vmem %s4829_s19, 16  ;;  %s5730_s21 = scalar_lea.vmem %s4829_s19, 32 }
 0x349   :  { %v3993_v59 = vadd.f32 %v3992_v3, %v3991_v45  ;;  %v3955_v40 = vrot.slane %v3954_v0, 1  ;;  %v3941_v54 = vadd.f32 %v3940_v34, %v3939_v1  ;;  %p5727_p4 = scmp.ne.s32.totalorder %s4829_s19, %s5726_s20  ;;  %p5731_p5 = scmp.lt.s32.totalorder %s4829_s19, %s4829_s19 }
 0x34a   :  { %5558 = vmatpush3.bf16.msra.mxu0 %v5557_v20  ;;  %v3971_v21 = vadd.f32 %v3970_v39, %v3969_v14  ;;  %p5732_p6 = scmp.lt.s32.totalorder %s5730_s21, %s5726_s20 }
 0x34b   :  { %v3994_v12 = vrot.slane %v3993_v59, 1  ;;  %5560 = vmatprep.subr.bf16.mxu0 %v5559_v18  ;;  %5590 = vmatpush3.bf16.msra.mxu1 %v5589_v57  ;;  %v3956_v43 = vadd.f32 %v3955_v40, %v3954_v0 }
 0x34c   :  { %5593 = vmatprep.subr.msk.bf16.mxu1 %vm5592_vm6, %v5591_v6  ;;  %p5733_p7 = por %p5732_p6, %p5731_p5 }
 0x34d   :  { %v3995_v48 = vadd.f32 %v3994_v12, %v3993_v59  ;;  %4744 = vmatprep.mubr.f32.mxu0 %v3956_v43 }
 0x34e   :  { %5562 = vmatpush3.bf16.msra.mxu0 %v5561_v47  ;;  %p5734_p8 = pnand %p5733_p7, %p5727_p4 }
 0x34f   :  { %5058 = vmatprep.mubr.msk.f32.mxu1 %vm2330_vm2, %v3995_v48  ;;  %5595 = vmatpush3.bf16.msra.mxu1 %v5594_v5 }
 0x351   :  { %4745 = vmatmul.mubr.f32.vlgmr.msra.gmra.mrb[86].mxu0 %v3941_v54 }
 0x352   :  { %4815 = vmatmul.mubr.f32.vlgmr.msra.gmra.mrb[86].mxu1 %v3971_v21 }
 0x36a   :  { %v5126_v55 = vpop.f32.mrb[80].mxu1 }
 0x36b   :  { %v5127_v10 = vpop.f32.mrb[81].mxu1 }
 0x36c   :  { %v5128_v22 = vadd.f32 %v5127_v10, %v5126_v55 }
 0x36e   :  { %v4397_v24 = vadd.f32 %v5128_v22, %v4327_v23 }
 0x372   :  { %v5161_v8 = vpop.f32.mrb[82].mxu0 }
 0x373   :  { %v5162_v25 = vpop.f32.mrb[83].mxu0 }
 0x374   :  { %v5163_v35 = vadd.f32 %v5162_v25, %v5161_v8 }
 0x376   :  { %v4467_v56 = vadd.f32 %v5163_v35, %v4397_v24 }
 0x3a4   :  { %v5196_v28 = vpop.f32.mrb[82].mxu1 }
 0x3a5   :  { %v5197_v4 = vpop.f32.mrb[83].mxu1 }
 0x3a6   :  { %v5198_v9 = vadd.f32 %v5197_v4, %v5196_v28 }
 0x3a8   :  { %v4537_v11 = vadd.f32 %v5198_v9, %v4467_v56 }
 0x3dc   :  { %v5231_v27 = vpop.f32.mrb[84].mxu0 }
 0x3dd   :  { %v5232_v42 = vpop.f32.mrb[85].mxu0 }
 0x3de   :  { %v5233_v32 = vadd.f32 %v5232_v42, %v5231_v27 }
 0x3e0   :  { %v4607_v58 = vadd.f32 %v5233_v32, %v4537_v11 }
 0x403   :  { %v5266_v60 = vpop.f32.mrb[84].mxu1 }
 0x404   :  { %v5267_v51 = vpop.f32.mrb[85].mxu1 }
 0x405   :  { %v5268_v63 = vadd.f32 %v5267_v51, %v5266_v60 }
 0x407   :  { %v4677_v36 = vadd.f32 %v5268_v63, %v4607_v58 }
 0x424   :  { %v5301_v30 = vpop.f32.mrb[86].mxu0 }
 0x425   :  { %v5302_v37 = vpop.f32.mrb[87].mxu0  ;;  %v5336_v50 = vpop.f32.mrb[86].mxu1 }
 0x426   :  { %v5303_v45 = vadd.f32 %v5302_v37, %v5301_v30  ;;  %v5337_v61 = vpop.f32.mrb[87].mxu1 }
 0x427   :  { %v5338_v44 = vadd.f32 %v5337_v61, %v5336_v50 }
 0x428   :  { %v4747_v19 = vadd.f32 %v5303_v45, %v4677_v36 }
 0x42a   :  { %v4817_v53 = vadd.f32 %v5338_v44, %v4747_v19 }
 0x42c   :  { %v4820_v41 = vmax.f32 %v4817_v53, 0.0 }
 0x42e   :  { %4821 = vst [vmem:[#allocation11] sm:$0x1] %v4820_v41 }
 0x42f   :  { %5737 = shalt.err (!%p5734_p8)
}
 0x430   :  { %s5738_s24 = scalar_lea.hbm %s9228_s5, 16 }
 0x431   :  { %p5739_p9 = scmp.ne.s32.totalorder %s9228_s5, %s5738_s24  ;;  %p5742_p10 = scmp.lt.u32.totalorder %s5738_s24, %s9228_s5 }
 0x433   :  { %p5744_p11 = pnand %p5742_p10, %p5739_p9 }
 0x435   :  { %5747 = shalt.err (!%p5744_p11)
}
 0x436   :  { %4831 = dma.vmem_to_hbm [thread:$0]  %s4829_s19, 16, %s9228_s5, [#allocation5]  }
 0x437   :  { %5754 = dma.done.wait [#allocation5], 16  }
 0x438   :  { %5755 = vsyncadd [#allocation5], 4294967280 }
 0x439   :  { %4835 = vsyncpa [#allocation4], 1 }
 0x43a   :  { %4836 = vsyncpa [#allocation7], 1 }
 0x43b   :  { %4837 = vsyncpa [#allocation10], 1 }
 0x43c   :  { %4838 = vsyncpa [#allocation5], 1 }

</bundles_post_ra>
